<compile_context>
chip_gen: v6e
topology: v6e:2x2x1
jax: 0.10.0
libtpu: 0.0.40
codegen_flags: <defaults>
</compile_context>

<pallas_src>
import functools

import jax
import jax.numpy as jnp
import numpy as np
from jax import lax
from jax.experimental import pallas as pl
from jax.experimental.pallas import tpu as pltpu


def _resblock_kernel(x_ref, mask_ref, w1_ref, b1_ref, w2_ref, b2_ref,
                     w3x_ref, w3r_ref, b3_ref, o_ref, *, H, W):
    """One image per grid step.  Layout: channels on sublanes, H*W on lanes."""
    HW = H * W
    f32 = jnp.float32

    def im2col_t(a):
        """(C, HW) f32 -> (9*C, HW) bf16 tap patch (taps stacked on sublanes).

        Row block k holds a[:, y+dy, x+dx] for tap k = (dy+1)*3 + (dx+1),
        zeroed outside the image.  The spatial shift is one XLU roll of the
        flattened image; the resident 0/1 mask kills both the out-of-image
        border taps and the row-wrap positions of the +-1 column shifts.
        """
        cols = []
        for k in range(9):                       # no loop-carried accumulator
            dy, dx = k // 3 - 1, k % 3 - 1
            s = dy * W + dx                      # flat-index tap offset
            if s == 0:
                cols.append(a)                   # centre tap: no shift, no mask
            else:
                shifted = pltpu.roll(a, (-s) % HW, axis=1)   # shifted[:, p] = a[:, p+s]
                cols.append(shifted * mask_ref[k])
        return jnp.concatenate(cols, axis=0).astype(jnp.bfloat16)

    def leaky(v):                                # LeakyReLU(0.2), f32 (v5e-safe)
        return jnp.where(v >= 0, v, 0.2 * v)

    x = x_ref[0].astype(f32)                     # (cin, HW)
    px = im2col_t(x)                             # (9*cin, HW) bf16, reused by conv3

    # conv1 / conv2: one MXU matmul each (K = 9*cin / 9*feat, N = HW lanes).
    r = leaky(jnp.dot(w1_ref[...], px, preferred_element_type=f32) + b1_ref[...])
    r = leaky(jnp.dot(w2_ref[...], im2col_t(r), preferred_element_type=f32) + b2_ref[...])

    # conv3 over concat([x, r], channels) == conv3_x(x) + conv3_r(r).
    out = (jnp.dot(w3x_ref[...], px, preferred_element_type=f32)
           + jnp.dot(w3r_ref[...], im2col_t(r), preferred_element_type=f32)
           + b3_ref[...])                        # (cout, HW), already channel-first
    o_ref[...] = out.reshape(1, *out.shape).astype(o_ref.dtype)


def _tap_border_masks(H, W):
    """(9, 1, H*W) f32 0/1 masks: mask[k, 0, y*W+x] == 1 iff (y+dy, x+dx) is inside."""
    y, x = np.mgrid[0:H, 0:W]
    m = np.zeros((9, 1, H * W), np.float32)
    for k in range(9):
        dy, dx = k // 3 - 1, k % 3 - 1
        ok = (y + dy >= 0) & (y + dy < H) & (x + dx >= 0) & (x + dx < W)
        m[k, 0, :] = ok.reshape(-1)
    return m


def res_block(x_nchw, params):
    """ResBlock.forward.  x_nchw: (N, Cin, H, W) -> (N, Cout, H, W)."""
    (w1, b1), (w2, b2), (w3x, w3r, b3) = params   # tap-major (9, cin, cout) weights
    N, cin, H, W = x_nchw.shape
    feat = w1.shape[-1]
    cout = w3x.shape[-1]
    HW = H * W

    x_flat = x_nchw.reshape(N, cin, HW)           # metadata-only reshape (stays NCHW)
    masks = jnp.asarray(_tap_border_masks(H, W))  # tiny, VMEM-resident constant

    bf16 = jnp.bfloat16
    # Weights reshaped for the transposed matmul, (C_out, 9*C_in), pre-cast to bf16.
    w1t = w1.reshape(9 * cin, feat).T.astype(bf16)
    w2t = w2.reshape(9 * feat, feat).T.astype(bf16)
    w3xt = w3x.reshape(9 * cin, cout).T.astype(bf16)
    w3rt = w3r.reshape(9 * feat, cout).T.astype(bf16)

    kernel = functools.partial(_resblock_kernel, H=H, W=W)
    y = pl.pallas_call(
        kernel,
        out_shape=jax.ShapeDtypeStruct((N, cout, HW), x_nchw.dtype),
        grid_spec=pltpu.PrefetchScalarGridSpec(
            num_scalar_prefetch=0,
            grid=(N,),
            in_specs=[
                pl.BlockSpec((1, cin, HW), lambda n: (n, 0, 0)),
                # Masks / weights / biases: constant index_map -> VMEM-resident.
                pl.BlockSpec((9, 1, HW), lambda n: (0, 0, 0)),
                pl.BlockSpec((feat, 9 * cin), lambda n: (0, 0)),
                pl.BlockSpec((feat, 1), lambda n: (0, 0)),
                pl.BlockSpec((feat, 9 * feat), lambda n: (0, 0)),
                pl.BlockSpec((feat, 1), lambda n: (0, 0)),
                pl.BlockSpec((cout, 9 * cin), lambda n: (0, 0)),
                pl.BlockSpec((cout, 9 * feat), lambda n: (0, 0)),
                pl.BlockSpec((cout, 1), lambda n: (0, 0)),
            ],
            out_specs=pl.BlockSpec((1, cout, HW), lambda n: (n, 0, 0)),
        ),
        compiler_params=pltpu.CompilerParams(
            dimension_semantics=("parallel",)),
    )(x_flat, masks, w1t, b1.reshape(feat, 1), w2t, b2.reshape(feat, 1),
      w3xt, w3rt, b3.reshape(cout, 1))
    return y.reshape(N, cout, H, W)               # metadata-only reshape


def init_resblock_params(key, channel_in, channel_out, feature=64):
    """Deterministic params matching the PyTorch module's shapes.

    Weights are tap-major: (9, cin, cout) with tap k = kh*3 + kw.  conv3's
    weight is kept pre-split into its x slice and its residual slice
    (channel concat == sum of two convs)."""
    k1, k2, k3, k4, kb1, kb2, kb3 = jax.random.split(key, 7)

    def conv_w(k, cin, cout, fan_in):
        std = (2.0 / fan_in) ** 0.5
        return std * jax.random.normal(k, (9, cin, cout), jnp.float32)

    w1 = conv_w(k1, channel_in, feature, 9 * channel_in)
    w2 = conv_w(k2, feature, feature, 9 * feature)
    fan3 = 9 * (feature + channel_in)
    w3x = conv_w(k3, channel_in, channel_out, fan3)
    w3r = conv_w(k4, feature, channel_out, fan3)
    b1 = 0.01 * jax.random.normal(kb1, (feature,), jnp.float32)
    b2 = 0.01 * jax.random.normal(kb2, (feature,), jnp.float32)
    b3 = 0.01 * jax.random.normal(kb3, (channel_out,), jnp.float32)
    return (w1, b1), (w2, b2), (w3x, w3r, b3)


# ----- pure-JAX reference for correctness checking -----
def _conv3x3_ref(x_nhwc, w_tap, b, *, lrelu, cast_bf16):
    cin, cout = w_tap.shape[1], w_tap.shape[2]
    w_hwio = w_tap.reshape(3, 3, cin, cout)
    if cast_bf16:  # mirror the kernel's bf16 matmul operands / f32 accumulation
        x_nhwc = x_nhwc.astype(jnp.bfloat16).astype(jnp.float32)
        w_hwio = w_hwio.astype(jnp.bfloat16).astype(jnp.float32)
    y = lax.conv_general_dilated(
        x_nhwc, w_hwio, window_strides=(1, 1), padding=((1, 1), (1, 1)),
        dimension_numbers=("NHWC", "HWIO", "NHWC"),
        precision=lax.Precision.HIGHEST)
    y = y + b[None, None, None, :]
    return jnp.where(y >= 0, y, 0.2 * y) if lrelu else y


def res_block_ref(x_nchw, params, *, cast_bf16=False):
    (w1, b1), (w2, b2), (w3x, w3r, b3) = params
    x = jnp.transpose(x_nchw, (0, 2, 3, 1))
    r = _conv3x3_ref(x, w1, b1, lrelu=True, cast_bf16=cast_bf16)
    r = _conv3x3_ref(r, w2, b2, lrelu=True, cast_bf16=cast_bf16)
    w3 = jnp.concatenate([w3x, w3r], axis=1)           # (9, cin+feat, cout)
    y = _conv3x3_ref(jnp.concatenate([x, r], axis=-1), w3, b3,
                     lrelu=False, cast_bf16=cast_bf16)
    return jnp.transpose(y, (0, 3, 1, 2))


if __name__ == "__main__":
    N, channel_in, channel_out, H, W = 2, 4, 4, 16, 16

    key = jax.random.PRNGKey(0)
    key, kx = jax.random.split(key)
    x = jax.random.normal(kx, (N, channel_in, H, W), jnp.float32)
    params = init_resblock_params(key, channel_in, channel_out)

    out = jax.jit(res_block)(x, params)
    out = jax.block_until_ready(out)
    assert out.shape == (N, channel_out, H, W)

    # Tight structural check against a reference using the same bf16 matmul
    # operands; loose sanity check against exact f32 module semantics (bounds
    # only the bf16 quantization noise).
    ref_bf16 = res_block_ref(x, params, cast_bf16=True)
    err_b = float(jnp.max(jnp.abs(out - ref_bf16)))
    assert jnp.allclose(out, ref_bf16, atol=3e-2, rtol=3e-2), err_b

    ref_f32 = res_block_ref(x, params, cast_bf16=False)
    err_f = float(jnp.max(jnp.abs(out - ref_f32)))
    assert jnp.allclose(out, ref_f32, atol=2.5e-1, rtol=2.5e-1), err_f

    print("KERNEL_OK")
</pallas_src>

<mosaic_0001>
module attributes {stable_mosaic.version = 11 : i64} {
  func.func @_resblock_kernel(%arg0: i32, %arg1: memref<1x4x256xf32, #tpu.memory_space<vmem>>, %arg2: memref<9x1x256xf32, #tpu.memory_space<vmem>>, %arg3: memref<64x36xbf16, #tpu.memory_space<vmem>>, %arg4: memref<64x1xf32, #tpu.memory_space<vmem>>, %arg5: memref<64x576xbf16, #tpu.memory_space<vmem>>, %arg6: memref<64x1xf32, #tpu.memory_space<vmem>>, %arg7: memref<4x36xbf16, #tpu.memory_space<vmem>>, %arg8: memref<4x576xbf16, #tpu.memory_space<vmem>>, %arg9: memref<4x1xf32, #tpu.memory_space<vmem>>, %arg10: memref<1x4x256xf32, #tpu.memory_space<vmem>>) attributes {dimension_semantics = [#tpu.dimension_semantics<parallel>], iteration_bounds = array<i64: 2>, scalar_prefetch = 0 : i64, scratch_operands = 0 : i64, tpu.core_type = #tpu.core_type<tc>, window_params = [{transform_indices = @transform_0, window_bounds = array<i64: 1, 4, 256>}, {pipeline_mode = #tpu.pipeline_mode<synchronous>, transform_indices = @transform_1, window_bounds = array<i64: 9, 1, 256>}, {pipeline_mode = #tpu.pipeline_mode<synchronous>, transform_indices = @transform_2, window_bounds = array<i64: 64, 36>}, {pipeline_mode = #tpu.pipeline_mode<synchronous>, transform_indices = @transform_3, window_bounds = array<i64: 64, 1>}, {pipeline_mode = #tpu.pipeline_mode<synchronous>, transform_indices = @transform_4, window_bounds = array<i64: 64, 576>}, {pipeline_mode = #tpu.pipeline_mode<synchronous>, transform_indices = @transform_5, window_bounds = array<i64: 64, 1>}, {pipeline_mode = #tpu.pipeline_mode<synchronous>, transform_indices = @transform_6, window_bounds = array<i64: 4, 36>}, {pipeline_mode = #tpu.pipeline_mode<synchronous>, transform_indices = @transform_7, window_bounds = array<i64: 4, 576>}, {pipeline_mode = #tpu.pipeline_mode<synchronous>, transform_indices = @transform_8, window_bounds = array<i64: 4, 1>}, {transform_indices = @transform_9, window_bounds = array<i64: 1, 4, 256>}]} {
    %c0 = arith.constant 0 : index
    %c0_0 = arith.constant 0 : index
    %c0_1 = arith.constant 0 : index
    %0 = vector.load %arg1[%c0, %c0_0, %c0_1] : memref<1x4x256xf32, #tpu.memory_space<vmem>>, vector<1x4x256xf32>
    %1 = vector.shape_cast %0 : vector<1x4x256xf32> to vector<4x256xf32>
    %c17_i32 = arith.constant 17 : i32
    %2 = tpu.dynamic_rotate %1 by %c17_i32 dim 1 : vector<4x256xf32>, i32 -> vector<4x256xf32>
    %c0_2 = arith.constant 0 : index
    %c0_3 = arith.constant 0 : index
    %c0_4 = arith.constant 0 : index
    %3 = vector.load %arg2[%c0_2, %c0_3, %c0_4] : memref<9x1x256xf32, #tpu.memory_space<vmem>>, vector<1x1x256xf32>
    %4 = vector.shape_cast %3 : vector<1x1x256xf32> to vector<1x256xf32>
    %5 = vector.broadcast %4 : vector<1x256xf32> to vector<4x256xf32>
    %6 = arith.mulf %2, %5 : vector<4x256xf32>
    %c16_i32 = arith.constant 16 : i32
    %7 = tpu.dynamic_rotate %1 by %c16_i32 dim 1 : vector<4x256xf32>, i32 -> vector<4x256xf32>
    %c1 = arith.constant 1 : index
    %c0_5 = arith.constant 0 : index
    %c0_6 = arith.constant 0 : index
    %8 = vector.load %arg2[%c1, %c0_5, %c0_6] : memref<9x1x256xf32, #tpu.memory_space<vmem>>, vector<1x1x256xf32>
    %9 = vector.shape_cast %8 : vector<1x1x256xf32> to vector<1x256xf32>
    %10 = vector.broadcast %9 : vector<1x256xf32> to vector<4x256xf32>
    %11 = arith.mulf %7, %10 : vector<4x256xf32>
    %c15_i32 = arith.constant 15 : i32
    %12 = tpu.dynamic_rotate %1 by %c15_i32 dim 1 : vector<4x256xf32>, i32 -> vector<4x256xf32>
    %c2 = arith.constant 2 : index
    %c0_7 = arith.constant 0 : index
    %c0_8 = arith.constant 0 : index
    %13 = vector.load %arg2[%c2, %c0_7, %c0_8] : memref<9x1x256xf32, #tpu.memory_space<vmem>>, vector<1x1x256xf32>
    %14 = vector.shape_cast %13 : vector<1x1x256xf32> to vector<1x256xf32>
    %15 = vector.broadcast %14 : vector<1x256xf32> to vector<4x256xf32>
    %16 = arith.mulf %12, %15 : vector<4x256xf32>
    %c1_i32 = arith.constant 1 : i32
    %17 = tpu.dynamic_rotate %1 by %c1_i32 dim 1 : vector<4x256xf32>, i32 -> vector<4x256xf32>
    %c3 = arith.constant 3 : index
    %c0_9 = arith.constant 0 : index
    %c0_10 = arith.constant 0 : index
    %18 = vector.load %arg2[%c3, %c0_9, %c0_10] : memref<9x1x256xf32, #tpu.memory_space<vmem>>, vector<1x1x256xf32>
    %19 = vector.shape_cast %18 : vector<1x1x256xf32> to vector<1x256xf32>
    %20 = vector.broadcast %19 : vector<1x256xf32> to vector<4x256xf32>
    %21 = arith.mulf %17, %20 : vector<4x256xf32>
    %c255_i32 = arith.constant 255 : i32
    %22 = tpu.dynamic_rotate %1 by %c255_i32 dim 1 : vector<4x256xf32>, i32 -> vector<4x256xf32>
    %c5 = arith.constant 5 : index
    %c0_11 = arith.constant 0 : index
    %c0_12 = arith.constant 0 : index
    %23 = vector.load %arg2[%c5, %c0_11, %c0_12] : memref<9x1x256xf32, #tpu.memory_space<vmem>>, vector<1x1x256xf32>
    %24 = vector.shape_cast %23 : vector<1x1x256xf32> to vector<1x256xf32>
    %25 = vector.broadcast %24 : vector<1x256xf32> to vector<4x256xf32>
    %26 = arith.mulf %22, %25 : vector<4x256xf32>
    %c241_i32 = arith.constant 241 : i32
    %27 = tpu.dynamic_rotate %1 by %c241_i32 dim 1 : vector<4x256xf32>, i32 -> vector<4x256xf32>
    %c6 = arith.constant 6 : index
    %c0_13 = arith.constant 0 : index
    %c0_14 = arith.constant 0 : index
    %28 = vector.load %arg2[%c6, %c0_13, %c0_14] : memref<9x1x256xf32, #tpu.memory_space<vmem>>, vector<1x1x256xf32>
    %29 = vector.shape_cast %28 : vector<1x1x256xf32> to vector<1x256xf32>
    %30 = vector.broadcast %29 : vector<1x256xf32> to vector<4x256xf32>
    %31 = arith.mulf %27, %30 : vector<4x256xf32>
    %c240_i32 = arith.constant 240 : i32
    %32 = tpu.dynamic_rotate %1 by %c240_i32 dim 1 : vector<4x256xf32>, i32 -> vector<4x256xf32>
    %c7 = arith.constant 7 : index
    %c0_15 = arith.constant 0 : index
    %c0_16 = arith.constant 0 : index
    %33 = vector.load %arg2[%c7, %c0_15, %c0_16] : memref<9x1x256xf32, #tpu.memory_space<vmem>>, vector<1x1x256xf32>
    %34 = vector.shape_cast %33 : vector<1x1x256xf32> to vector<1x256xf32>
    %35 = vector.broadcast %34 : vector<1x256xf32> to vector<4x256xf32>
    %36 = arith.mulf %32, %35 : vector<4x256xf32>
    %c239_i32 = arith.constant 239 : i32
    %37 = tpu.dynamic_rotate %1 by %c239_i32 dim 1 : vector<4x256xf32>, i32 -> vector<4x256xf32>
    %c8 = arith.constant 8 : index
    %c0_17 = arith.constant 0 : index
    %c0_18 = arith.constant 0 : index
    %38 = vector.load %arg2[%c8, %c0_17, %c0_18] : memref<9x1x256xf32, #tpu.memory_space<vmem>>, vector<1x1x256xf32>
    %39 = vector.shape_cast %38 : vector<1x1x256xf32> to vector<1x256xf32>
    %40 = vector.broadcast %39 : vector<1x256xf32> to vector<4x256xf32>
    %41 = arith.mulf %37, %40 : vector<4x256xf32>
    %42 = tpu.concatenate %6, %11, %16, %21, %1, %26, %31, %36, %41 in 0 : vector<4x256xf32>, vector<4x256xf32>, vector<4x256xf32>, vector<4x256xf32>, vector<4x256xf32>, vector<4x256xf32>, vector<4x256xf32>, vector<4x256xf32>, vector<4x256xf32> -> vector<36x256xf32>
    %43 = arith.truncf %42 : vector<36x256xf32> to vector<36x256xbf16>
    %c0_19 = arith.constant 0 : index
    %c0_20 = arith.constant 0 : index
    %44 = vector.load %arg3[%c0_19, %c0_20] : memref<64x36xbf16, #tpu.memory_space<vmem>>, vector<64x36xbf16>
    %cst = arith.constant dense<0.000000e+00> : vector<64x256xf32>
    %45 = tpu.matmul %44, %43, %cst {dimension_numbers = #tpu.dot_dimension_numbers<[1], [0], [0], [1], [0, 0, 1, 1], [], []>} : vector<64x36xbf16>, vector<36x256xbf16>, vector<64x256xf32> -> vector<64x256xf32>
    %c0_21 = arith.constant 0 : index
    %c0_22 = arith.constant 0 : index
    %46 = vector.load %arg4[%c0_21, %c0_22] : memref<64x1xf32, #tpu.memory_space<vmem>>, vector<64x1xf32>
    %47 = vector.broadcast %46 : vector<64x1xf32> to vector<64x256xf32>
    %48 = arith.addf %45, %47 : vector<64x256xf32>
    %cst_23 = arith.constant 0.000000e+00 : f32
    %49 = vector.broadcast %cst_23 : f32 to vector<64x256xf32>
    %50 = arith.cmpf oge, %48, %49 : vector<64x256xf32>
    %cst_24 = arith.constant 2.000000e-01 : f32
    %51 = vector.broadcast %cst_24 : f32 to vector<64x256xf32>
    %52 = arith.mulf %51, %48 : vector<64x256xf32>
    %53 = arith.select %50, %48, %52 : vector<64x256xi1>, vector<64x256xf32>
    %c0_25 = arith.constant 0 : index
    %c0_26 = arith.constant 0 : index
    %54 = vector.load %arg5[%c0_25, %c0_26] : memref<64x576xbf16, #tpu.memory_space<vmem>>, vector<64x576xbf16>
    %c17_i32_27 = arith.constant 17 : i32
    %55 = tpu.dynamic_rotate %53 by %c17_i32_27 dim 1 : vector<64x256xf32>, i32 -> vector<64x256xf32>
    %c0_28 = arith.constant 0 : index
    %c0_29 = arith.constant 0 : index
    %c0_30 = arith.constant 0 : index
    %56 = vector.load %arg2[%c0_28, %c0_29, %c0_30] : memref<9x1x256xf32, #tpu.memory_space<vmem>>, vector<1x1x256xf32>
    %57 = vector.shape_cast %56 : vector<1x1x256xf32> to vector<1x256xf32>
    %58 = vector.broadcast %57 : vector<1x256xf32> to vector<64x256xf32>
    %59 = arith.mulf %55, %58 : vector<64x256xf32>
    %c16_i32_31 = arith.constant 16 : i32
    %60 = tpu.dynamic_rotate %53 by %c16_i32_31 dim 1 : vector<64x256xf32>, i32 -> vector<64x256xf32>
    %c1_32 = arith.constant 1 : index
    %c0_33 = arith.constant 0 : index
    %c0_34 = arith.constant 0 : index
    %61 = vector.load %arg2[%c1_32, %c0_33, %c0_34] : memref<9x1x256xf32, #tpu.memory_space<vmem>>, vector<1x1x256xf32>
    %62 = vector.shape_cast %61 : vector<1x1x256xf32> to vector<1x256xf32>
    %63 = vector.broadcast %62 : vector<1x256xf32> to vector<64x256xf32>
    %64 = arith.mulf %60, %63 : vector<64x256xf32>
    %c15_i32_35 = arith.constant 15 : i32
    %65 = tpu.dynamic_rotate %53 by %c15_i32_35 dim 1 : vector<64x256xf32>, i32 -> vector<64x256xf32>
    %c2_36 = arith.constant 2 : index
    %c0_37 = arith.constant 0 : index
    %c0_38 = arith.constant 0 : index
    %66 = vector.load %arg2[%c2_36, %c0_37, %c0_38] : memref<9x1x256xf32, #tpu.memory_space<vmem>>, vector<1x1x256xf32>
    %67 = vector.shape_cast %66 : vector<1x1x256xf32> to vector<1x256xf32>
    %68 = vector.broadcast %67 : vector<1x256xf32> to vector<64x256xf32>
    %69 = arith.mulf %65, %68 : vector<64x256xf32>
    %c1_i32_39 = arith.constant 1 : i32
    %70 = tpu.dynamic_rotate %53 by %c1_i32_39 dim 1 : vector<64x256xf32>, i32 -> vector<64x256xf32>
    %c3_40 = arith.constant 3 : index
    %c0_41 = arith.constant 0 : index
    %c0_42 = arith.constant 0 : index
    %71 = vector.load %arg2[%c3_40, %c0_41, %c0_42] : memref<9x1x256xf32, #tpu.memory_space<vmem>>, vector<1x1x256xf32>
    %72 = vector.shape_cast %71 : vector<1x1x256xf32> to vector<1x256xf32>
    %73 = vector.broadcast %72 : vector<1x256xf32> to vector<64x256xf32>
    %74 = arith.mulf %70, %73 : vector<64x256xf32>
    %c255_i32_43 = arith.constant 255 : i32
    %75 = tpu.dynamic_rotate %53 by %c255_i32_43 dim 1 : vector<64x256xf32>, i32 -> vector<64x256xf32>
    %c5_44 = arith.constant 5 : index
    %c0_45 = arith.constant 0 : index
    %c0_46 = arith.constant 0 : index
    %76 = vector.load %arg2[%c5_44, %c0_45, %c0_46] : memref<9x1x256xf32, #tpu.memory_space<vmem>>, vector<1x1x256xf32>
    %77 = vector.shape_cast %76 : vector<1x1x256xf32> to vector<1x256xf32>
    %78 = vector.broadcast %77 : vector<1x256xf32> to vector<64x256xf32>
    %79 = arith.mulf %75, %78 : vector<64x256xf32>
    %c241_i32_47 = arith.constant 241 : i32
    %80 = tpu.dynamic_rotate %53 by %c241_i32_47 dim 1 : vector<64x256xf32>, i32 -> vector<64x256xf32>
    %c6_48 = arith.constant 6 : index
    %c0_49 = arith.constant 0 : index
    %c0_50 = arith.constant 0 : index
    %81 = vector.load %arg2[%c6_48, %c0_49, %c0_50] : memref<9x1x256xf32, #tpu.memory_space<vmem>>, vector<1x1x256xf32>
    %82 = vector.shape_cast %81 : vector<1x1x256xf32> to vector<1x256xf32>
    %83 = vector.broadcast %82 : vector<1x256xf32> to vector<64x256xf32>
    %84 = arith.mulf %80, %83 : vector<64x256xf32>
    %c240_i32_51 = arith.constant 240 : i32
    %85 = tpu.dynamic_rotate %53 by %c240_i32_51 dim 1 : vector<64x256xf32>, i32 -> vector<64x256xf32>
    %c7_52 = arith.constant 7 : index
    %c0_53 = arith.constant 0 : index
    %c0_54 = arith.constant 0 : index
    %86 = vector.load %arg2[%c7_52, %c0_53, %c0_54] : memref<9x1x256xf32, #tpu.memory_space<vmem>>, vector<1x1x256xf32>
    %87 = vector.shape_cast %86 : vector<1x1x256xf32> to vector<1x256xf32>
    %88 = vector.broadcast %87 : vector<1x256xf32> to vector<64x256xf32>
    %89 = arith.mulf %85, %88 : vector<64x256xf32>
    %c239_i32_55 = arith.constant 239 : i32
    %90 = tpu.dynamic_rotate %53 by %c239_i32_55 dim 1 : vector<64x256xf32>, i32 -> vector<64x256xf32>
    %c8_56 = arith.constant 8 : index
    %c0_57 = arith.constant 0 : index
    %c0_58 = arith.constant 0 : index
    %91 = vector.load %arg2[%c8_56, %c0_57, %c0_58] : memref<9x1x256xf32, #tpu.memory_space<vmem>>, vector<1x1x256xf32>
    %92 = vector.shape_cast %91 : vector<1x1x256xf32> to vector<1x256xf32>
    %93 = vector.broadcast %92 : vector<1x256xf32> to vector<64x256xf32>
    %94 = arith.mulf %90, %93 : vector<64x256xf32>
    %95 = tpu.concatenate %59, %64, %69, %74, %53, %79, %84, %89, %94 in 0 : vector<64x256xf32>, vector<64x256xf32>, vector<64x256xf32>, vector<64x256xf32>, vector<64x256xf32>, vector<64x256xf32>, vector<64x256xf32>, vector<64x256xf32>, vector<64x256xf32> -> vector<576x256xf32>
    %96 = arith.truncf %95 : vector<576x256xf32> to vector<576x256xbf16>
    %cst_59 = arith.constant dense<0.000000e+00> : vector<64x256xf32>
    %97 = tpu.matmul %54, %96, %cst_59 {dimension_numbers = #tpu.dot_dimension_numbers<[1], [0], [0], [1], [0, 0, 1, 1], [], []>} : vector<64x576xbf16>, vector<576x256xbf16>, vector<64x256xf32> -> vector<64x256xf32>
    %c0_60 = arith.constant 0 : index
    %c0_61 = arith.constant 0 : index
    %98 = vector.load %arg6[%c0_60, %c0_61] : memref<64x1xf32, #tpu.memory_space<vmem>>, vector<64x1xf32>
    %99 = vector.broadcast %98 : vector<64x1xf32> to vector<64x256xf32>
    %100 = arith.addf %97, %99 : vector<64x256xf32>
    %cst_62 = arith.constant 0.000000e+00 : f32
    %101 = vector.broadcast %cst_62 : f32 to vector<64x256xf32>
    %102 = arith.cmpf oge, %100, %101 : vector<64x256xf32>
    %cst_63 = arith.constant 2.000000e-01 : f32
    %103 = vector.broadcast %cst_63 : f32 to vector<64x256xf32>
    %104 = arith.mulf %103, %100 : vector<64x256xf32>
    %105 = arith.select %102, %100, %104 : vector<64x256xi1>, vector<64x256xf32>
    %c0_64 = arith.constant 0 : index
    %c0_65 = arith.constant 0 : index
    %106 = vector.load %arg7[%c0_64, %c0_65] : memref<4x36xbf16, #tpu.memory_space<vmem>>, vector<4x36xbf16>
    %cst_66 = arith.constant dense<0.000000e+00> : vector<4x256xf32>
    %107 = tpu.matmul %106, %43, %cst_66 {dimension_numbers = #tpu.dot_dimension_numbers<[1], [0], [0], [1], [0, 0, 1, 1], [], []>} : vector<4x36xbf16>, vector<36x256xbf16>, vector<4x256xf32> -> vector<4x256xf32>
    %c0_67 = arith.constant 0 : index
    %c0_68 = arith.constant 0 : index
    %108 = vector.load %arg8[%c0_67, %c0_68] : memref<4x576xbf16, #tpu.memory_space<vmem>>, vector<4x576xbf16>
    %c17_i32_69 = arith.constant 17 : i32
    %109 = tpu.dynamic_rotate %105 by %c17_i32_69 dim 1 : vector<64x256xf32>, i32 -> vector<64x256xf32>
    %c0_70 = arith.constant 0 : index
    %c0_71 = arith.constant 0 : index
    %c0_72 = arith.constant 0 : index
    %110 = vector.load %arg2[%c0_70, %c0_71, %c0_72] : memref<9x1x256xf32, #tpu.memory_space<vmem>>, vector<1x1x256xf32>
    %111 = vector.shape_cast %110 : vector<1x1x256xf32> to vector<1x256xf32>
    %112 = vector.broadcast %111 : vector<1x256xf32> to vector<64x256xf32>
    %113 = arith.mulf %109, %112 : vector<64x256xf32>
    %c16_i32_73 = arith.constant 16 : i32
    %114 = tpu.dynamic_rotate %105 by %c16_i32_73 dim 1 : vector<64x256xf32>, i32 -> vector<64x256xf32>
    %c1_74 = arith.constant 1 : index
    %c0_75 = arith.constant 0 : index
    %c0_76 = arith.constant 0 : index
    %115 = vector.load %arg2[%c1_74, %c0_75, %c0_76] : memref<9x1x256xf32, #tpu.memory_space<vmem>>, vector<1x1x256xf32>
    %116 = vector.shape_cast %115 : vector<1x1x256xf32> to vector<1x256xf32>
    %117 = vector.broadcast %116 : vector<1x256xf32> to vector<64x256xf32>
    %118 = arith.mulf %114, %117 : vector<64x256xf32>
    %c15_i32_77 = arith.constant 15 : i32
    %119 = tpu.dynamic_rotate %105 by %c15_i32_77 dim 1 : vector<64x256xf32>, i32 -> vector<64x256xf32>
    %c2_78 = arith.constant 2 : index
    %c0_79 = arith.constant 0 : index
    %c0_80 = arith.constant 0 : index
    %120 = vector.load %arg2[%c2_78, %c0_79, %c0_80] : memref<9x1x256xf32, #tpu.memory_space<vmem>>, vector<1x1x256xf32>
    %121 = vector.shape_cast %120 : vector<1x1x256xf32> to vector<1x256xf32>
    %122 = vector.broadcast %121 : vector<1x256xf32> to vector<64x256xf32>
    %123 = arith.mulf %119, %122 : vector<64x256xf32>
    %c1_i32_81 = arith.constant 1 : i32
    %124 = tpu.dynamic_rotate %105 by %c1_i32_81 dim 1 : vector<64x256xf32>, i32 -> vector<64x256xf32>
    %c3_82 = arith.constant 3 : index
    %c0_83 = arith.constant 0 : index
    %c0_84 = arith.constant 0 : index
    %125 = vector.load %arg2[%c3_82, %c0_83, %c0_84] : memref<9x1x256xf32, #tpu.memory_space<vmem>>, vector<1x1x256xf32>
    %126 = vector.shape_cast %125 : vector<1x1x256xf32> to vector<1x256xf32>
    %127 = vector.broadcast %126 : vector<1x256xf32> to vector<64x256xf32>
    %128 = arith.mulf %124, %127 : vector<64x256xf32>
    %c255_i32_85 = arith.constant 255 : i32
    %129 = tpu.dynamic_rotate %105 by %c255_i32_85 dim 1 : vector<64x256xf32>, i32 -> vector<64x256xf32>
    %c5_86 = arith.constant 5 : index
    %c0_87 = arith.constant 0 : index
    %c0_88 = arith.constant 0 : index
    %130 = vector.load %arg2[%c5_86, %c0_87, %c0_88] : memref<9x1x256xf32, #tpu.memory_space<vmem>>, vector<1x1x256xf32>
    %131 = vector.shape_cast %130 : vector<1x1x256xf32> to vector<1x256xf32>
    %132 = vector.broadcast %131 : vector<1x256xf32> to vector<64x256xf32>
    %133 = arith.mulf %129, %132 : vector<64x256xf32>
    %c241_i32_89 = arith.constant 241 : i32
    %134 = tpu.dynamic_rotate %105 by %c241_i32_89 dim 1 : vector<64x256xf32>, i32 -> vector<64x256xf32>
    %c6_90 = arith.constant 6 : index
    %c0_91 = arith.constant 0 : index
    %c0_92 = arith.constant 0 : index
    %135 = vector.load %arg2[%c6_90, %c0_91, %c0_92] : memref<9x1x256xf32, #tpu.memory_space<vmem>>, vector<1x1x256xf32>
    %136 = vector.shape_cast %135 : vector<1x1x256xf32> to vector<1x256xf32>
    %137 = vector.broadcast %136 : vector<1x256xf32> to vector<64x256xf32>
    %138 = arith.mulf %134, %137 : vector<64x256xf32>
    %c240_i32_93 = arith.constant 240 : i32
    %139 = tpu.dynamic_rotate %105 by %c240_i32_93 dim 1 : vector<64x256xf32>, i32 -> vector<64x256xf32>
    %c7_94 = arith.constant 7 : index
    %c0_95 = arith.constant 0 : index
    %c0_96 = arith.constant 0 : index
    %140 = vector.load %arg2[%c7_94, %c0_95, %c0_96] : memref<9x1x256xf32, #tpu.memory_space<vmem>>, vector<1x1x256xf32>
    %141 = vector.shape_cast %140 : vector<1x1x256xf32> to vector<1x256xf32>
    %142 = vector.broadcast %141 : vector<1x256xf32> to vector<64x256xf32>
    %143 = arith.mulf %139, %142 : vector<64x256xf32>
    %c239_i32_97 = arith.constant 239 : i32
    %144 = tpu.dynamic_rotate %105 by %c239_i32_97 dim 1 : vector<64x256xf32>, i32 -> vector<64x256xf32>
    %c8_98 = arith.constant 8 : index
    %c0_99 = arith.constant 0 : index
    %c0_100 = arith.constant 0 : index
    %145 = vector.load %arg2[%c8_98, %c0_99, %c0_100] : memref<9x1x256xf32, #tpu.memory_space<vmem>>, vector<1x1x256xf32>
    %146 = vector.shape_cast %145 : vector<1x1x256xf32> to vector<1x256xf32>
    %147 = vector.broadcast %146 : vector<1x256xf32> to vector<64x256xf32>
    %148 = arith.mulf %144, %147 : vector<64x256xf32>
    %149 = tpu.concatenate %113, %118, %123, %128, %105, %133, %138, %143, %148 in 0 : vector<64x256xf32>, vector<64x256xf32>, vector<64x256xf32>, vector<64x256xf32>, vector<64x256xf32>, vector<64x256xf32>, vector<64x256xf32>, vector<64x256xf32>, vector<64x256xf32> -> vector<576x256xf32>
    %150 = arith.truncf %149 : vector<576x256xf32> to vector<576x256xbf16>
    %cst_101 = arith.constant dense<0.000000e+00> : vector<4x256xf32>
    %151 = tpu.matmul %108, %150, %cst_101 {dimension_numbers = #tpu.dot_dimension_numbers<[1], [0], [0], [1], [0, 0, 1, 1], [], []>} : vector<4x576xbf16>, vector<576x256xbf16>, vector<4x256xf32> -> vector<4x256xf32>
    %152 = arith.addf %107, %151 : vector<4x256xf32>
    %c0_102 = arith.constant 0 : index
    %c0_103 = arith.constant 0 : index
    %153 = vector.load %arg9[%c0_102, %c0_103] : memref<4x1xf32, #tpu.memory_space<vmem>>, vector<4x1xf32>
    %154 = vector.broadcast %153 : vector<4x1xf32> to vector<4x256xf32>
    %155 = arith.addf %152, %154 : vector<4x256xf32>
    %156 = vector.shape_cast %155 : vector<4x256xf32> to vector<1x4x256xf32>
    %c0_104 = arith.constant 0 : index
    %c0_105 = arith.constant 0 : index
    %c0_106 = arith.constant 0 : index
    %157 = vector.load %arg10[%c0_104, %c0_105, %c0_106] : memref<1x4x256xf32, #tpu.memory_space<vmem>>, vector<1x4x256xf32>
    tpu.vector_store %arg10[%c0_104, %c0_105, %c0_106], %156 {strides = array<i32>} : memref<1x4x256xf32, #tpu.memory_space<vmem>>, vector<1x4x256xf32>,
    return
  }
  func.func @transform_0(%arg0: i32) -> (i32, i32, i32) {
    %c0_i32 = arith.constant 0 : i32
    %c0_i32_0 = arith.constant 0 : i32
    %c0_i32_1 = arith.constant 0 : i32
    return %arg0, %c0_i32, %c0_i32_0 : i32, i32, i32
  }
  func.func @transform_1(%arg0: i32) -> (i32, i32, i32) {
    %c0_i32 = arith.constant 0 : i32
    %c0_i32_0 = arith.constant 0 : i32
    %c0_i32_1 = arith.constant 0 : i32
    %c0_i32_2 = arith.constant 0 : i32
    return %c0_i32, %c0_i32_0, %c0_i32_1 : i32, i32, i32
  }
  func.func @transform_2(%arg0: i32) -> (i32, i32) {
    %c0_i32 = arith.constant 0 : i32
    %c0_i32_0 = arith.constant 0 : i32
    %c0_i32_1 = arith.constant 0 : i32
    return %c0_i32, %c0_i32_0 : i32, i32
  }
  func.func @transform_3(%arg0: i32) -> (i32, i32) {
    %c0_i32 = arith.constant 0 : i32
    %c0_i32_0 = arith.constant 0 : i32
    %c0_i32_1 = arith.constant 0 : i32
    return %c0_i32, %c0_i32_0 : i32, i32
  }
  func.func @transform_4(%arg0: i32) -> (i32, i32) {
    %c0_i32 = arith.constant 0 : i32
    %c0_i32_0 = arith.constant 0 : i32
    %c0_i32_1 = arith.constant 0 : i32
    return %c0_i32, %c0_i32_0 : i32, i32
  }
  func.func @transform_5(%arg0: i32) -> (i32, i32) {
    %c0_i32 = arith.constant 0 : i32
    %c0_i32_0 = arith.constant 0 : i32
    %c0_i32_1 = arith.constant 0 : i32
    return %c0_i32, %c0_i32_0 : i32, i32
  }
  func.func @transform_6(%arg0: i32) -> (i32, i32) {
    %c0_i32 = arith.constant 0 : i32
    %c0_i32_0 = arith.constant 0 : i32
    %c0_i32_1 = arith.constant 0 : i32
    return %c0_i32, %c0_i32_0 : i32, i32
  }
  func.func @transform_7(%arg0: i32) -> (i32, i32) {
    %c0_i32 = arith.constant 0 : i32
    %c0_i32_0 = arith.constant 0 : i32
    %c0_i32_1 = arith.constant 0 : i32
    return %c0_i32, %c0_i32_0 : i32, i32
  }
  func.func @transform_8(%arg0: i32) -> (i32, i32) {
    %c0_i32 = arith.constant 0 : i32
    %c0_i32_0 = arith.constant 0 : i32
    %c0_i32_1 = arith.constant 0 : i32
    return %c0_i32, %c0_i32_0 : i32, i32
  }
  func.func @transform_9(%arg0: i32) -> (i32, i32, i32) {
    %c0_i32 = arith.constant 0 : i32
    %c0_i32_0 = arith.constant 0 : i32
    %c0_i32_1 = arith.constant 0 : i32
    return %arg0, %c0_i32, %c0_i32_0 : i32, i32, i32
  }
}

</mosaic_0001>

<bundles_post_ra>
// kernel: res_block.1
= control target key start
LH: loop header
LB: loop body
LE: loop exit
PB: predicated region body
PF: predicated region fallthrough
CT: control target
= control target key end

     0   :  { %s2841_s30 = smov 0   ;;  %s5665_s0 = inlined_call_operand.vmem [shape: f32[2,4,256], index: 0, kind: input, shape index: {}]   ;;  %s5666_s1 = inlined_call_operand.vmem [shape: f32[9,1,256], index: 1, kind: input, shape index: {}]   ;;  %s5667_s2 = inlined_call_operand.vmem [shape: bf16[64,36], index: 2, kind: input, shape index: {}]   ;;  %s5668_s3 = inlined_call_operand.vmem [shape: f32[64,1], index: 3, kind: input, shape index: {}]   ;;  %s5669_s4 = inlined_call_operand.vmem [shape: bf16[64,576], index: 4, kind: input, shape index: {}]   ;;  %s5670_s5 = inlined_call_operand.vmem [shape: f32[64,1], index: 5, kind: input, shape index: {}]   ;;  %s5671_s6 = inlined_call_operand.vmem [shape: bf16[4,36], index: 6, kind: input, shape index: {}]   ;;  %s5672_s7 = inlined_call_operand.vmem [shape: bf16[4,576], index: 7, kind: input, shape index: {}]   ;;  %s5673_s8 = inlined_call_operand.vmem [shape: f32[4,1], index: 8, kind: input, shape index: {}]   ;;  %s5674_s9 = inlined_call_operand.vmem [shape: f32[2,4,256], index: 9, kind: output, shape index: {}]  }
   0x1 LB: > { %s2662_s10 = sadd.s32 4294967295, %s2779_s30   ;;  %p2666_p0 = scmp.ge.s32.totalorder %s2779_s30, 1  ;;  %s2779_s30 = sphi %s2841_s30, %s19_s30  }
   0x2   : > { %p287_p1 = scmp.lt.s32.totalorder %s2779_s30, 3 }
   0x4   : > { %p288_p2 = pnand %p2666_p0, %p287_p1 }
   0x6   : > { %291 = sbr.rel (%p288_p2) target bundleno = 1532 (0x5fc), region = 56 }
   0xb   : > { %p323_p3 = scmp.lt.s32.totalorder %s2662_s10, 1  ;;  %s2781_s15 = smov 127   ;;  %v5675_v2 = vmov 0   ;;  %v568_v3 = vld [vmem:[%s5668_s3 + $0x30] sm:$0xff]  ;;  %v569_v4 = vld [vmem:[%s5668_s3 + $0x38] sm:$0xff]  ;;  %v567_v5 = vld [vmem:[%s5668_s3 + $0x28] sm:$0xff]  ;;  %v342_v11 = vlaneseq }
   0xc   : > { %s2782_s16 = smov 111   ;;  %s2783_s17 = smov 112   ;;  %682 = vmatprep.mubr.bf16.mxu0 %v5675_v2  ;;  %2737 = vset.pattern.permute.xlu0 %v5675_v2  ;;  %v566_v6 = vld [vmem:[%s5668_s3 + $0x20] sm:$0xff]  ;;  %v565_v7 = vld [vmem:[%s5668_s3 + $0x18] sm:$0xff]  ;;  %v564_v8 = vld [vmem:[%s5668_s3 + $0x10] sm:$0xff]  ;;  %vm643_vm4 = vcmask 1041408  }
   0xd   : > { %s6126_s10 = smov (!%p323_p3, %s2662_s10), 1  ;;  %s2784_s18 = smov 113   ;;  %2738 = vset.pattern.permute.xlu1 %v5675_v2  ;;  %v563_v9 = vld [vmem:[%s5668_s3 + $0x8] sm:$0xff]  ;;  %v562_v10 = vld [vmem:[%s5668_s3] sm:$0xff]  ;;  %v2922_v12 = vshrl.u32 %v342_v11, 7  ;;  %v2924_v13 = vand.u32 127, %v342_v11 }
   0xe   : > { %s2717_s11 = sshll.u32 %s6126_s10, 3  ;;  %s2785_s19 = smov 16   ;;  %v2674_v18 = vld [vmem:[%s5666_s1 + $0xa] sm:$0x3]  ;;  %v2676_v19 = vld [vmem:[%s5666_s1 + $0xe] sm:$0x3] }
   0xf   : > { %s327_s14 = scalar_lea.vmem %s5665_s0, %s2717_s11  ;;  %s2786_s20 = smov 1   ;;  %5828 = vst [vmem:[#allocation2_spill] sm:$0xff] %v2922_v12  ;;  %v2927_v16 = vsub.s32 0, %v2922_v12  ;;  %v2930_v17 = vsub.s32 1, %v2922_v12  ;;  %vm431_vm0 = vcmp.lt.s32.totalorder %v2924_v13, 127  ;;  %vm475_vm1 = vcmp.lt.s32.totalorder %v2924_v13, 112 }
  0x10   : > { %v2857_v0 = vld [vmem:[%s327_s14] sm:$0xff]  ;;  %s2788_s21 = smov 17   ;;  %s2789_s22 = smov 15   ;;  %v2677_v20 = vld [vmem:[%s5666_s1 + $0x10] sm:$0x3]  ;;  %vm497_vm2 = vcmp.lt.s32.totalorder %v2924_v13, 111 }
  0x11   : > { %427 = vrot.lane.b32.xlu1 %v2857_v0, %s2781_s15  ;;  %493 = vrot.lane.b32.xlu0 %v2857_v0, %s2782_s16  ;;  %v2865_v1 = vcombine.high %v2857_v0, %v2857_v0  ;;  %v2943_v22 = vrot.slane %v2674_v18, %v2927_v16  ;;  %v2946_v23 = vrot.slane %v2674_v18, %v2930_v17  ;;  %v2675_v27 = vld [vmem:[%s5666_s1 + $0xc] sm:$0x3]  ;;  %vm453_vm3 = vcmp.lt.s32.totalorder %v2924_v13, 113  ;;  %s332_s13 = scalar_lea.vmem %s5674_s9, %s2717_s11 }
  0x12   : > { %v2958_v28 = vrot.slane %v2676_v19, %v2927_v16  ;;  %v2961_v29 = vrot.slane %v2676_v19, %v2930_v17  ;;  %v2964_v30 = vrot.slane %v2677_v20, %v2930_v17  ;;  %v2967_v31 = vrot.slane %v2677_v20, %v2927_v16 }
  0x13   : > { %5829 = vst [vmem:[#allocation3_spill] sm:$0xff] %v2943_v22  ;;  %v2973_v36 = vrot.slane %v2675_v27, %v2927_v16  ;;  %v2976_v37 = vrot.slane %v2675_v27, %v2930_v17  ;;  %vm539_vm5 = vcmask 1043456   ;;  %vm365_vm6 = vcmp.lt.s32.totalorder %v2924_v13, 16 }
  0x14   : > { %5830 = vst [vmem:[#allocation4_spill] sm:$0xff] %v2958_v28  ;;  %5831 = vst [vmem:[#allocation5_spill] sm:$0xff] %v2961_v29  ;;  %vm409_vm7 = vcmp.lt.s32.totalorder %v2924_v13, 1  ;;  %vm344_vm8 = vcmp.lt.s32.totalorder %v2924_v13, 17  ;;  %vm387_vm9 = vcmp.lt.s32.totalorder %v2924_v13, 15  ;;  %vm630_vm10 = vcmask 293888  }
  0x15   : > { %471 = vrot.lane.b32.xlu0 %v2857_v0, %s2783_s17  ;;  %429 = vrot.lane.b32.xlu1 %v2865_v1, %s2781_s15  ;;  %5832 = vst [vmem:[#allocation6_spill] sm:$0xff] %v2964_v30  ;;  %5833 = vst [vmem:[#allocation7_spill] sm:$0xff] %v2967_v31 }
  0x16   : > { %5834 = vst [vmem:[#allocation8_spill] sm:$0xff] %v2973_v36  ;;  %5835 = vst [vmem:[#allocation9_spill] sm:$0xff] %v2976_v37 }
  0x19   : > { %473 = vrot.lane.b32.xlu1 %v2865_v1, %s2783_s17  ;;  %495 = vrot.lane.b32.xlu0 %v2865_v1, %s2782_s16 }
  0x1d   : > { %451 = vrot.lane.b32.xlu1 %v2865_v1, %s2784_s18  ;;  %449 = vrot.lane.b32.xlu0 %v2857_v0, %s2784_s18 }
  0x21   : > { %363 = vrot.lane.b32.xlu1 %v2865_v1, %s2785_s19  ;;  %361 = vrot.lane.b32.xlu0 %v2857_v0, %s2785_s19 }
  0x25   : > { %407 = vrot.lane.b32.xlu1 %v2865_v1, %s2786_s20  ;;  %405 = vrot.lane.b32.xlu0 %v2857_v0, %s2786_s20 }
  0x29   : > { %340 = vrot.lane.b32.xlu1 %v2865_v1, %s2788_s21  ;;  %338 = vrot.lane.b32.xlu0 %v2857_v0, %s2788_s21 }
  0x2d   : > { %385 = vrot.lane.b32.xlu1 %v2865_v1, %s2789_s22  ;;  %383 = vrot.lane.b32.xlu0 %v2857_v0, %s2789_s22 }
  0x31   : > { %602 = vperm.xlu0 %2737, %v568_v3   ;;  %607 = vperm.xlu1 %2738, %v569_v4  }
  0x35   : > { %597 = vperm.xlu0 %2737, %v567_v5   ;;  %592 = vperm.xlu1 %2738, %v566_v6   ;;  %v2671_v6 = vld [vmem:[%s5666_s1 + $0x2] sm:$0x3] }
  0x39   : > { %587 = vperm.xlu0 %2737, %v565_v7   ;;  %582 = vperm.xlu1 %2738, %v564_v8   ;;  %v3026_v8 = vrot.slane %v2671_v6, %v2927_v16 }
  0x3d   : > { %577 = vperm.xlu0 %2737, %v563_v9   ;;  %572 = vperm.xlu1 %2738, %v562_v10   ;;  %v3029_v9 = vrot.slane %v2671_v6, %v2930_v17  ;;  %v347_v10 = vld [vmem:[%s5666_s1] sm:$0x3] }
  0x83   : > { %v428_v14 = vpop.permute.xlu1 %427  ;;  %v494_v15 = vpop.permute.xlu0 %493 }
  0x87   : > { %v472_v21 = vpop.permute.xlu0 %471  ;;  %v430_v24 = vpop.permute.xlu1 %429 }
  0x88   : > { %v432_v25 = vsel %vm431_vm0, %v428_v14, %v430_v24  ;;  %v433_v26 = vsel %vm431_vm0, %v430_v24, %v428_v14 }
  0x89   : > { %v447_v32 = vmul.f32 %v2943_v22, %v432_v25  ;;  %v448_v33 = vmul.f32 %v2946_v23, %v433_v26  ;;  %v3053_v25 = vrot.slane %v347_v10, %v2927_v16  ;;  %v3056_v26 = vrot.slane %v347_v10, %v2930_v17 }
  0x8b   : > { %v474_v34 = vpop.permute.xlu1 %473  ;;  %v496_v35 = vpop.permute.xlu0 %495  ;;  %v529_v46 = vrot.slane %v447_v32, 4  ;;  %v530_v47 = vrot.slane %v448_v33, 4 }
  0x8c   : > { %v476_v38 = vsel %vm475_vm1, %v472_v21, %v474_v34  ;;  %v477_v39 = vsel %vm475_vm1, %v474_v34, %v472_v21  ;;  %v498_v40 = vsel %vm497_vm2, %v494_v15, %v496_v35  ;;  %v499_v41 = vsel %vm497_vm2, %v496_v35, %v494_v15  ;;  %v2672_v21 = vld [vmem:[%s5666_s1 + $0x4] sm:$0x3] }
  0x8d   : > { %v491_v42 = vmul.f32 %v2958_v28, %v476_v38  ;;  %v492_v43 = vmul.f32 %v2961_v29, %v477_v39  ;;  %v514_v44 = vmul.f32 %v2964_v30, %v499_v41  ;;  %v513_v45 = vmul.f32 %v2967_v31, %v498_v40 }
  0x8e   : > { %v545_v61 = vsel %vm539_vm5, %v2865_v1, %v530_v47  ;;  %v544_v63 = vsel %vm539_vm5, %v2857_v0, %v529_v46  ;;  %v2673_v1 = vld [vmem:[%s5666_s1 + $0x6] sm:$0x3]  ;;  %v3067_v40 = vrot.slane %v2672_v21, %v2927_v16  ;;  %v3070_v41 = vrot.slane %v2672_v21, %v2930_v17 }
  0x8f   : > { %v452_v48 = vpop.permute.xlu1 %451  ;;  %v450_v49 = vpop.permute.xlu0 %449  ;;  %v2990_v50 = vpack.c.bf16 %v514_v44, %v514_v44  ;;  %v552_v51 = vpack.c.bf16 %v513_v45, %v513_v45  ;;  %v535_v52 = vrot.slane %v491_v42, 4  ;;  %v536_v55 = vrot.slane %v492_v43, 4 }
  0x90   : > { %v454_v53 = vsel %vm453_vm3, %v450_v49, %v452_v48  ;;  %v455_v54 = vsel %vm453_vm3, %v452_v48, %v450_v49  ;;  %v3039_v15 = vrot.slane %v2673_v1, %v2927_v16  ;;  %v3042_v18 = vrot.slane %v2673_v1, %v2930_v17  ;;  %5842 = vst [vmem:[#allocation16_spill] sm:$0xff] %v3067_v40 }
  0x91   : > { %5836 = vst [vmem:[#allocation10_spill] sm:$0xff] %v2990_v50  ;;  %v469_v56 = vmul.f32 %v2973_v36, %v454_v53  ;;  %v470_v57 = vmul.f32 %v2976_v37, %v455_v54  ;;  %2682 = vmatprep.subr.msk.bf16.mxu0 %vm643_vm4, %v2990_v50  ;;  %v3001_v58 = vsel %vm643_vm4, %v552_v51, 0  ;;  %5843 = vst [vmem:[#allocation17_spill] sm:$0xff] %v3070_v41 }
  0x92   : > { %5837 = vst [vmem:[#allocation11_spill] sm:$0xff] %v3001_v58  ;;  %661 = vmatpush1.bf16.msra.mxu0 %v3001_v58  ;;  %5840 = vst [vmem:[#allocation14_spill] sm:$0xff] %v3039_v15 }
  0x93   : > { %v364_v59 = vpop.permute.xlu1 %363  ;;  %v362_v60 = vpop.permute.xlu0 %361  ;;  %v547_v62 = vsel %vm539_vm5, %v470_v57, %v536_v55  ;;  %v546_v3 = vsel %vm539_vm5, %v469_v56, %v535_v52  ;;  %5841 = vst [vmem:[#allocation15_spill] sm:$0xff] %v3042_v18 }
  0x94   : > { %v3010_v4 = vpack.c.bf16 %v547_v62, %v545_v61  ;;  %v3012_v5 = vpack.c.bf16 %v546_v3, %v544_v63  ;;  %v366_v11 = vsel %vm365_vm6, %v362_v60, %v364_v59  ;;  %v367_v14 = vsel %vm365_vm6, %v364_v59, %v362_v60  ;;  %v2740_v60 = vld [vmem:[%s5667_s2] sm:$0xff]   ;;  %v2741_v61 = vld [vmem:[%s5667_s2 + $0x8] sm:$0xff]   ;;  %v2742_v62 = vld [vmem:[%s5667_s2 + $0x10] sm:$0xff]  }
  0x95   : > { %v381_v32 = vmul.f32 %v3026_v8, %v367_v14  ;;  %v382_v33 = vmul.f32 %v3029_v9, %v366_v11  ;;  %v2743_v63 = vld [vmem:[%s5667_s2 + $0x18] sm:$0xff]  }
  0x96   : > { %5838 = vst [vmem:[#allocation12_spill] sm:$0xff] %v3010_v4  ;;  %5839 = vst [vmem:[#allocation13_spill] sm:$0xff] %v3012_v5  ;;  %662 = vmatprep.subr.bf16.mxu0 %v3010_v4 }
  0x97   : > { %v408_v0 = vpop.permute.xlu1 %407  ;;  %663 = vmatpush1.bf16.msra.mxu0 %v3012_v5  ;;  %v406_v7 = vpop.permute.xlu0 %405  ;;  %v517_v46 = vrot.slane %v381_v32, 4  ;;  %v518_v47 = vrot.slane %v382_v33, 4 }
  0x98   : > { %v410_v19 = vsel %vm409_vm7, %v406_v7, %v408_v0  ;;  %v411_v20 = vsel %vm409_vm7, %v408_v0, %v406_v7 }
  0x99   : > { %v425_v38 = vmul.f32 %v3039_v15, %v411_v20  ;;  %v426_v39 = vmul.f32 %v3042_v18, %v410_v19 }
  0x9b   : > { %v341_v24 = vpop.permute.xlu1 %340  ;;  %v339_v27 = vpop.permute.xlu0 %338  ;;  %v523_v51 = vrot.slane %v425_v38, 4  ;;  %v524_v16 = vrot.slane %v426_v39, 4 }
  0x9c   : > { %v345_v34 = vsel %vm344_vm8, %v339_v27, %v341_v24  ;;  %v346_v35 = vsel %vm344_vm8, %v341_v24, %v339_v27 }
  0x9d   : > { %v359_v42 = vmul.f32 %v3053_v25, %v346_v35  ;;  %v360_v43 = vmul.f32 %v3056_v26, %v345_v34  ;;  %v6121_v13 = vld [vmem:[#allocation13_spill] sm:$0xff] }
  0x9f   : > { %v386_v44 = vpop.permute.xlu1 %385  ;;  %v384_v45 = vpop.permute.xlu0 %383  ;;  %v541_v53 = vsel %vm539_vm5, %v360_v43, %v518_v47  ;;  %v540_v55 = vsel %vm539_vm5, %v359_v42, %v517_v46 }
  0xa0   : > { %v388_v48 = vsel %vm387_vm9, %v384_v45, %v386_v44  ;;  %v389_v49 = vsel %vm387_vm9, %v386_v44, %v384_v45 }
  0xa1   : > { %v403_v52 = vmul.f32 %v3067_v40, %v389_v49  ;;  %v404_v17 = vmul.f32 %v3070_v41, %v388_v48 }
  0xa3   : > { %v543_v54 = vsel %vm539_vm5, %v404_v17, %v524_v16  ;;  %v542_v56 = vsel %vm539_vm5, %v403_v52, %v523_v51 }
  0xa4   : > { %v3084_v57 = vpack.c.bf16 %v543_v54, %v541_v53  ;;  %v3086_v59 = vpack.c.bf16 %v542_v56, %v540_v55 }
  0xa6   : > { %5844 = vst [vmem:[#allocation18_spill] sm:$0xff] %v3084_v57  ;;  %5845 = vst [vmem:[#allocation19_spill] sm:$0xff] %v3086_v59  ;;  %664 = vmatprep.subr.bf16.mxu0 %v3084_v57 }
  0xa7   : > { %665 = vmatpush1.bf16.msra.mxu0 %v3086_v59 }
  0xaa   : > { %2683 = vmatmul.mubr.msk.bf16.vlgmr.msra.gmra.mxu0 %vm630_vm10, %v2740_v60 }
  0xab   : > { %692 = vmatprep.mubr.bf16.mxu0 %v5675_v2 }
  0xac   : > { %v3109_v3 = vpop.permute.xlu1 %607  ;;  %v3111_v6 = vpop.permute.xlu0 %602 }
  0xb0   : > { %v3113_v1 = vpop.permute.xlu1 %592  ;;  %v3115_v0 = vpop.permute.xlu0 %597 }
  0xb2   : > { %2684 = vmatmul.mubr.msk.bf16.gmra.mxu0 %vm630_vm10, %v2741_v61 }
  0xb3   : > { %702 = vmatprep.mubr.bf16.mxu0 %v5675_v2 }
  0xb4   : > { %v583_v7 = vpop.permute.xlu1 %582  ;;  %v3117_v10 = vpop.permute.xlu0 %587 }
  0xb8   : > { %v573_v11 = vpop.permute.xlu1 %572  ;;  %v578_v24 = vpop.permute.xlu0 %577 }
  0xba   : > { %2685 = vmatmul.mubr.msk.bf16.gmra.mxu0 %vm630_vm10, %v2742_v62 }
  0xbb   : > { %712 = vmatprep.mubr.bf16.mxu0 %v5675_v2 }
  0xc2   : > { %2686 = vmatmul.mubr.msk.bf16.gmra.mxu0 %vm630_vm10, %v2743_v63 }
 0x16a   : > { %v684_v14 = vpop.f32.mrf.mxu0 }
 0x16b   : > { %v685_v19 = vadd.f32 %v684_v14, %v573_v11 }
 0x16c   : > { %v686_v20 = vpop.f32.mrf.mxu0 }
 0x16d   : > { %vm723_vm11 = vcmp.ge.f32.partialorder %v685_v19, 0.0  ;;  %v739_v21 = vmul.f32 0.2, %v685_v19  ;;  %v687_v38 = vadd.f32 %v686_v20, %v573_v11 }
 0x16e   : > { %v688_v27 = vpop.f32.mrf.mxu0 }
 0x16f   : > { %v3119_v32 = vsel %vm723_vm11, %v685_v19, %v739_v21  ;;  %v689_v33 = vadd.f32 %v688_v27, %v578_v24  ;;  %v740_v42 = vmul.f32 0.2, %v687_v38  ;;  %vm724_vm13 = vcmp.ge.f32.partialorder %v687_v38, 0.0 }
 0x170   : > { %5846 = vst [vmem:[#allocation20_spill] sm:$0xff] %v3119_v32  ;;  %859 = vrot.lane.b32.xlu1 %v3119_v32, %s2785_s19  ;;  %v690_v39 = vpop.f32.mrf.mxu0 }
 0x171   : > { %vm725_vm12 = vcmp.ge.f32.partialorder %v689_v33, 0.0  ;;  %v741_v34 = vmul.f32 0.2, %v689_v33  ;;  %v691_v43 = vadd.f32 %v690_v39, %v578_v24  ;;  %v3141_v44 = vsel %vm724_vm13, %v687_v38, %v740_v42 }
 0x172   : > { %5848 = vst [vmem:[#allocation22_spill] sm:$0xff] %v3141_v44  ;;  %v694_v47 = vpop.f32.mrf.mxu0 }
 0x173   : > { %v3123_v35 = vsel %vm725_vm12, %v689_v33, %v741_v34  ;;  %v742_v45 = vmul.f32 0.2, %v691_v43  ;;  %vm726_vm14 = vcmp.ge.f32.partialorder %v691_v43, 0.0  ;;  %v695_v49 = vadd.f32 %v694_v47, %v583_v7 }
 0x174   : > { %5847 = vst [vmem:[#allocation21_spill] sm:$0xff] %v3123_v35  ;;  %795 = vrot.lane.b32.xlu1 %v3119_v32, %s2788_s21  ;;  %861 = vrot.lane.b32.xlu0 %v3123_v35, %s2785_s19  ;;  %v696_v48 = vpop.f32.mrf.mxu0 }
 0x175   : > { %v3147_v46 = vsel %vm726_vm14, %v691_v43, %v742_v45  ;;  %v743_v16 = vmul.f32 0.2, %v695_v49  ;;  %vm727_vm15 = vcmp.ge.f32.partialorder %v695_v49, 0.0  ;;  %v697_v55 = vadd.f32 %v696_v48, %v583_v7 }
 0x176   : > { %5849 = vst [vmem:[#allocation23_spill] sm:$0xff] %v3147_v46  ;;  %v698_v51 = vpop.f32.mrf.mxu0 }
 0x177   : > { %v699_v52 = vadd.f32 %v698_v51, %v3117_v10  ;;  %v3166_v17 = vsel %vm727_vm15, %v695_v49, %v743_v16  ;;  %v744_v60 = vmul.f32 0.2, %v697_v55  ;;  %vm728_vm11 = vcmp.ge.f32.partialorder %v697_v55, 0.0 }
 0x178   : > { %1051 = vrot.lane.b32.xlu1 %v3119_v32, %s2781_s15  ;;  %797 = vrot.lane.b32.xlu0 %v3123_v35, %s2788_s21  ;;  %5850 = vst [vmem:[#allocation24_spill] sm:$0xff] %v3166_v17  ;;  %v700_v56 = vpop.f32.mrf.mxu0 }
 0x179   : > { %v745_v53 = vmul.f32 0.2, %v699_v52  ;;  %vm729_vm5 = vcmp.ge.f32.partialorder %v699_v52, 0.0  ;;  %v701_v61 = vadd.f32 %v700_v56, %v3117_v10  ;;  %v3195_v62 = vsel %vm728_vm11, %v697_v55, %v744_v60 }
 0x17a   : > { %5852 = vst [vmem:[#allocation26_spill] sm:$0xff] %v3195_v62  ;;  %v704_v10 = vpop.f32.mrf.mxu0 }
 0x17b   : > { %v3172_v54 = vsel %vm729_vm5, %v699_v52, %v745_v53  ;;  %v746_v63 = vmul.f32 0.2, %v701_v61  ;;  %vm730_vm12 = vcmp.ge.f32.partialorder %v701_v61, 0.0  ;;  %v705_v14 = vadd.f32 %v704_v10, %v3113_v1 }
 0x17c   : > { %987 = vrot.lane.b32.xlu1 %v3119_v32, %s2786_s20  ;;  %1053 = vrot.lane.b32.xlu0 %v3123_v35, %s2781_s15  ;;  %5851 = vst [vmem:[#allocation25_spill] sm:$0xff] %v3172_v54  ;;  %v706_v11 = vpop.f32.mrf.mxu0 }
 0x17d   : > { %v3201_v7 = vsel %vm730_vm12, %v701_v61, %v746_v63  ;;  %v747_v20 = vmul.f32 0.2, %v705_v14  ;;  %vm731_vm13 = vcmp.ge.f32.partialorder %v705_v14, 0.0  ;;  %v707_v34 = vadd.f32 %v706_v11, %v3113_v1 }
 0x17e   : > { %5853 = vst [vmem:[#allocation27_spill] sm:$0xff] %v3201_v7  ;;  %v708_v19 = vpop.f32.mrf.mxu0 }
 0x17f   : > { %v709_v21 = vadd.f32 %v708_v19, %v3115_v0  ;;  %v3225_v24 = vsel %vm731_vm13, %v705_v14, %v747_v20  ;;  %v748_v39 = vmul.f32 0.2, %v707_v34  ;;  %vm732_vm15 = vcmp.ge.f32.partialorder %v707_v34, 0.0 }
 0x180   : > { %923 = vrot.lane.b32.xlu1 %v3119_v32, %s2789_s22  ;;  %989 = vrot.lane.b32.xlu0 %v3123_v35, %s2786_s20  ;;  %5854 = vst [vmem:[#allocation28_spill] sm:$0xff] %v3225_v24  ;;  %v710_v38 = vpop.f32.mrf.mxu0 }
 0x181   : > { %v749_v27 = vmul.f32 0.2, %v709_v21  ;;  %vm733_vm14 = vcmp.ge.f32.partialorder %v709_v21, 0.0  ;;  %v711_v42 = vadd.f32 %v710_v38, %v3115_v0  ;;  %v3255_v43 = vsel %vm732_vm15, %v707_v34, %v748_v39 }
 0x182   : > { %5856 = vst [vmem:[#allocation30_spill] sm:$0xff] %v3255_v43  ;;  %v714_v49 = vpop.f32.mrf.mxu0  ;;  %vm1527_vm15 = vcmask 523264  }
 0x183   : > { %v3231_v33 = vsel %vm733_vm14, %v709_v21, %v749_v27  ;;  %v750_v1 = vmul.f32 0.2, %v711_v42  ;;  %vm734_vm5 = vcmp.ge.f32.partialorder %v711_v42, 0.0  ;;  %v715_v56 = vadd.f32 %v714_v49, %v3111_v6 }
 0x184   : > { %875 = vrot.lane.b32.xlu1 %v3141_v44, %s2785_s19  ;;  %925 = vrot.lane.b32.xlu0 %v3123_v35, %s2789_s22  ;;  %5855 = vst [vmem:[#allocation29_spill] sm:$0xff] %v3231_v33  ;;  %v716_v52 = vpop.f32.mrf.mxu0 }
 0x185   : > { %v3263_v0 = vsel %vm734_vm5, %v711_v42, %v750_v1  ;;  %v751_v10 = vmul.f32 0.2, %v715_v56  ;;  %vm735_vm11 = vcmp.ge.f32.partialorder %v715_v56, 0.0 }
 0x186   : > { %5857 = vst [vmem:[#allocation31_spill] sm:$0xff] %v3263_v0  ;;  %v718_v60 = vpop.f32.mrf.mxu0 }
 0x187   : > { %v719_v11 = vadd.f32 %v718_v60, %v3109_v3  ;;  %v3307_v20 = vsel %vm735_vm11, %v715_v56, %v751_v10  ;;  %v717_v10 = vadd.f32 %v716_v52, %v3111_v6 }
 0x188   : > { %811 = vrot.lane.b32.xlu1 %v3141_v44, %s2788_s21  ;;  %877 = vrot.lane.b32.xlu0 %v3147_v46, %s2785_s19  ;;  %5861 = vst [vmem:[#allocation35_spill] sm:$0xff] %v3307_v20 }
 0x189   : > { %v753_v21 = vmul.f32 0.2, %v719_v11  ;;  %vm737_vm12 = vcmp.ge.f32.partialorder %v719_v11, 0.0  ;;  %v752_v59 = vmul.f32 0.2, %v717_v10  ;;  %vm736_vm13 = vcmp.ge.f32.partialorder %v717_v10, 0.0 }
 0x18b   : > { %v3317_v38 = vsel %vm737_vm12, %v719_v11, %v753_v21  ;;  %v720_v11 = vpop.f32.mrf.mxu0  ;;  %v3361_v5 = vsel %vm736_vm13, %v717_v10, %v752_v59 }
 0x18c   : > { %1067 = vrot.lane.b32.xlu1 %v3141_v44, %s2781_s15  ;;  %813 = vrot.lane.b32.xlu0 %v3147_v46, %s2788_s21  ;;  %5862 = vst [vmem:[#allocation36_spill] sm:$0xff] %v3317_v38  ;;  %v721_v57 = vadd.f32 %v720_v11, %v3109_v3  ;;  %5866 = vst [vmem:[#allocation40_spill] sm:$0xff] %v3361_v5 }
 0x18e   : > { %v754_v4 = vmul.f32 0.2, %v721_v57  ;;  %vm738_vm14 = vcmp.ge.f32.partialorder %v721_v57, 0.0 }
 0x190   : > { %1003 = vrot.lane.b32.xlu1 %v3141_v44, %s2786_s20  ;;  %1069 = vrot.lane.b32.xlu0 %v3147_v46, %s2781_s15  ;;  %v3371_v58 = vsel %vm738_vm14, %v721_v57, %v754_v4 }
 0x191   : > { %5867 = vst [vmem:[#allocation41_spill] sm:$0xff] %v3371_v58 }
 0x194   : > { %939 = vrot.lane.b32.xlu1 %v3141_v44, %s2789_s22  ;;  %1005 = vrot.lane.b32.xlu0 %v3147_v46, %s2786_s20 }
 0x198   : > { %863 = vrot.lane.b32.xlu1 %v3166_v17, %s2785_s19  ;;  %941 = vrot.lane.b32.xlu0 %v3147_v46, %s2789_s22 }
 0x19c   : > { %799 = vrot.lane.b32.xlu1 %v3166_v17, %s2788_s21  ;;  %865 = vrot.lane.b32.xlu0 %v3172_v54, %s2785_s19 }
 0x1a0   : > { %1055 = vrot.lane.b32.xlu1 %v3166_v17, %s2781_s15  ;;  %801 = vrot.lane.b32.xlu0 %v3172_v54, %s2788_s21 }
 0x1a4   : > { %991 = vrot.lane.b32.xlu1 %v3166_v17, %s2786_s20  ;;  %1057 = vrot.lane.b32.xlu0 %v3172_v54, %s2781_s15 }
 0x1a8   : > { %927 = vrot.lane.b32.xlu1 %v3166_v17, %s2789_s22  ;;  %993 = vrot.lane.b32.xlu0 %v3172_v54, %s2786_s20 }
 0x1ac   : > { %1183 = vrot.lane.b32.xlu1 %v3166_v17, %s2783_s17  ;;  %929 = vrot.lane.b32.xlu0 %v3172_v54, %s2789_s22 }
 0x1b0   : > { %879 = vrot.lane.b32.xlu1 %v3195_v62, %s2785_s19  ;;  %1185 = vrot.lane.b32.xlu0 %v3172_v54, %s2783_s17 }
 0x1b4   : > { %815 = vrot.lane.b32.xlu1 %v3195_v62, %s2788_s21  ;;  %881 = vrot.lane.b32.xlu0 %v3201_v7, %s2785_s19 }
 0x1b8   : > { %1071 = vrot.lane.b32.xlu1 %v3195_v62, %s2781_s15  ;;  %817 = vrot.lane.b32.xlu0 %v3201_v7, %s2788_s21 }
 0x1bc   : > { %1007 = vrot.lane.b32.xlu1 %v3195_v62, %s2786_s20  ;;  %1073 = vrot.lane.b32.xlu0 %v3201_v7, %s2781_s15 }
 0x1c0   : > { %943 = vrot.lane.b32.xlu1 %v3195_v62, %s2789_s22  ;;  %1009 = vrot.lane.b32.xlu0 %v3201_v7, %s2786_s20 }
 0x1c4   : > { %1199 = vrot.lane.b32.xlu1 %v3195_v62, %s2783_s17  ;;  %945 = vrot.lane.b32.xlu0 %v3201_v7, %s2789_s22 }
 0x1c8   : > { %867 = vrot.lane.b32.xlu1 %v3225_v24, %s2785_s19  ;;  %1201 = vrot.lane.b32.xlu0 %v3201_v7, %s2783_s17 }
 0x1cc   : > { %803 = vrot.lane.b32.xlu1 %v3225_v24, %s2788_s21  ;;  %869 = vrot.lane.b32.xlu0 %v3231_v33, %s2785_s19 }
 0x1d0   : > { %1059 = vrot.lane.b32.xlu1 %v3225_v24, %s2781_s15  ;;  %805 = vrot.lane.b32.xlu0 %v3231_v33, %s2788_s21 }
 0x1d4   : > { %995 = vrot.lane.b32.xlu1 %v3225_v24, %s2786_s20  ;;  %1061 = vrot.lane.b32.xlu0 %v3231_v33, %s2781_s15 }
 0x1d8   : > { %931 = vrot.lane.b32.xlu1 %v3225_v24, %s2789_s22  ;;  %997 = vrot.lane.b32.xlu0 %v3231_v33, %s2786_s20 }
 0x1dc   : > { %1187 = vrot.lane.b32.xlu1 %v3225_v24, %s2783_s17  ;;  %933 = vrot.lane.b32.xlu0 %v3231_v33, %s2789_s22 }
 0x1e0   : > { %883 = vrot.lane.b32.xlu1 %v3255_v43, %s2785_s19  ;;  %1189 = vrot.lane.b32.xlu0 %v3231_v33, %s2783_s17 }
 0x1e2   : > { %v3261_v45 = vpop.permute.xlu1 %859 }
 0x1e4   : > { %819 = vrot.lane.b32.xlu1 %v3255_v43, %s2788_s21  ;;  %885 = vrot.lane.b32.xlu0 %v3263_v0, %s2785_s19 }
 0x1e6   : > { %v3269_v47 = vpop.permute.xlu1 %795  ;;  %v3271_v48 = vpop.permute.xlu0 %861 }
 0x1e8   : > { %1075 = vrot.lane.b32.xlu1 %v3255_v43, %s2781_s15  ;;  %821 = vrot.lane.b32.xlu0 %v3263_v0, %s2788_s21 }
 0x1ea   : > { %v3277_v51 = vpop.permute.xlu1 %1051  ;;  %v3279_v16 = vpop.permute.xlu0 %797 }
 0x1ec   : > { %1011 = vrot.lane.b32.xlu1 %v3255_v43, %s2786_s20  ;;  %1077 = vrot.lane.b32.xlu0 %v3263_v0, %s2781_s15 }
 0x1ee   : > { %v3285_v53 = vpop.permute.xlu1 %987  ;;  %v3287_v55 = vpop.permute.xlu0 %1053 }
 0x1f0   : > { %947 = vrot.lane.b32.xlu1 %v3255_v43, %s2789_s22  ;;  %1013 = vrot.lane.b32.xlu0 %v3263_v0, %s2786_s20 }
 0x1f2   : > { %v3294_v61 = vpop.permute.xlu1 %923  ;;  %v3296_v63 = vpop.permute.xlu0 %989 }
 0x1f3   : > { %5858 = vst [vmem:[#allocation32_spill] sm:$0xff] %v3294_v61  ;;  %5859 = vst [vmem:[#allocation33_spill] sm:$0xff] %v3296_v63 }
 0x1f4   : > { %1203 = vrot.lane.b32.xlu1 %v3255_v43, %s2783_s17  ;;  %949 = vrot.lane.b32.xlu0 %v3263_v0, %s2789_s22 }
 0x1f6   : > { %v3303_v14 = vpop.permute.xlu1 %875  ;;  %v3305_v19 = vpop.permute.xlu0 %925 }
 0x1f7   : > { %5860 = vst [vmem:[#allocation34_spill] sm:$0xff] %v3305_v19 }
 0x1f8   : > { %871 = vrot.lane.b32.xlu1 %v3307_v20, %s2785_s19  ;;  %1205 = vrot.lane.b32.xlu0 %v3263_v0, %s2783_s17 }
 0x1fa   : > { %v3313_v27 = vpop.permute.xlu1 %811  ;;  %v3315_v34 = vpop.permute.xlu0 %877 }
 0x1fc   : > { %807 = vrot.lane.b32.xlu1 %v3307_v20, %s2788_s21  ;;  %873 = vrot.lane.b32.xlu0 %v3317_v38, %s2785_s19 }
 0x1fe   : > { %v3323_v39 = vpop.permute.xlu1 %1067  ;;  %v3325_v42 = vpop.permute.xlu0 %813 }
 0x200   : > { %1063 = vrot.lane.b32.xlu1 %v3307_v20, %s2781_s15  ;;  %809 = vrot.lane.b32.xlu0 %v3317_v38, %s2788_s21 }
 0x202   : > { %v3331_v1 = vpop.permute.xlu1 %1003  ;;  %v3333_v49 = vpop.permute.xlu0 %1069 }
 0x204   : > { %999 = vrot.lane.b32.xlu1 %v3307_v20, %s2786_s20  ;;  %1065 = vrot.lane.b32.xlu0 %v3317_v38, %s2781_s15 }
 0x206   : > { %v3339_v56 = vpop.permute.xlu1 %939  ;;  %v3341_v60 = vpop.permute.xlu0 %1005 }
 0x207   : > { %5863 = vst [vmem:[#allocation37_spill] sm:$0xff] %v3339_v56  ;;  %5864 = vst [vmem:[#allocation38_spill] sm:$0xff] %v3341_v60  ;;  %v2758_v60 = vld [vmem:[%s5669_s4 + $0xc] ss:$20 sps:$4 sm:$0xff]  }
 0x208   : > { %935 = vrot.lane.b32.xlu1 %v3307_v20, %s2789_s22  ;;  %1001 = vrot.lane.b32.xlu0 %v3317_v38, %s2786_s20 }
 0x209   : > { %1645 = vmatprep.mubr.bf16.mxu0 %v2758_v60  ;;  %v1383_v60 = vld [vmem:[%s5670_s5 + $0x20] sm:$0xff] }
 0x20a   : > { %v3348_v21 = vpop.permute.xlu1 %863  ;;  %v3350_v2 = vpop.permute.xlu0 %941 }
 0x20b   : > { %5865 = vst [vmem:[#allocation39_spill] sm:$0xff] %v3350_v2 }
 0x20c   : > { %1191 = vrot.lane.b32.xlu1 %v3307_v20, %s2783_s17  ;;  %937 = vrot.lane.b32.xlu0 %v3317_v38, %s2789_s22 }
 0x20e   : > { %v3357_v6 = vpop.permute.xlu1 %799  ;;  %v3359_v52 = vpop.permute.xlu0 %865 }
 0x210   : > { %887 = vrot.lane.b32.xlu1 %v3361_v5, %s2785_s19  ;;  %1193 = vrot.lane.b32.xlu0 %v3317_v38, %s2783_s17 }
 0x212   : > { %v3367_v3 = vpop.permute.xlu1 %1055  ;;  %v3369_v11 = vpop.permute.xlu0 %801 }
 0x214   : > { %1179 = vrot.lane.b32.xlu1 %v3119_v32, %s2783_s17  ;;  %889 = vrot.lane.b32.xlu0 %v3371_v58, %s2785_s19 }
 0x216   : > { %v3377_v59 = vpop.permute.xlu1 %991  ;;  %v3379_v10 = vpop.permute.xlu0 %1057 }
 0x217   : > { %5868 = vst [vmem:[#allocation42_spill] sm:$0xff] %v3377_v59 }
 0x218   : > { %823 = vrot.lane.b32.xlu1 %v3361_v5, %s2788_s21  ;;  %1181 = vrot.lane.b32.xlu0 %v3123_v35, %s2783_s17 }
 0x21a   : > { %v3385_v50 = vpop.permute.xlu1 %927  ;;  %v3387_v4 = vpop.permute.xlu0 %993 }
 0x21b   : > { %5869 = vst [vmem:[#allocation43_spill] sm:$0xff] %v3385_v50  ;;  %5870 = vst [vmem:[#allocation44_spill] sm:$0xff] %v3387_v4  ;;  %v1379_v4 = vld [vmem:[%s5670_s5] sm:$0xff] }
 0x21c   : > { %1079 = vrot.lane.b32.xlu1 %v3361_v5, %s2781_s15  ;;  %1197 = vrot.lane.b32.xlu0 %v3147_v46, %s2783_s17 }
 0x21e   : > { %v3393_v57 = vpop.permute.xlu1 %1183  ;;  %v3395_v12 = vpop.permute.xlu0 %929 }
 0x21f   : > { %5871 = vst [vmem:[#allocation45_spill] sm:$0xff] %v3393_v57  ;;  %5872 = vst [vmem:[#allocation46_spill] sm:$0xff] %v3395_v12 }
 0x220   : > { %1015 = vrot.lane.b32.xlu1 %v3361_v5, %s2786_s20  ;;  %1129 = vrot.lane.b32.xlu0 %v3317_v38, %s2784_s18 }
 0x222   : > { %v3401_v30 = vpop.permute.xlu1 %879  ;;  %v3403_v31 = vpop.permute.xlu0 %1185 }
 0x223   : > { %5873 = vst [vmem:[#allocation47_spill] sm:$0xff] %v3403_v31 }
 0x224   : > { %951 = vrot.lane.b32.xlu1 %v3361_v5, %s2789_s22  ;;  %825 = vrot.lane.b32.xlu0 %v3371_v58, %s2788_s21 }
 0x226   : > { %v3409_v37 = vpop.permute.xlu1 %815  ;;  %v3411_v36 = vpop.permute.xlu0 %881 }
 0x228   : > { %1207 = vrot.lane.b32.xlu1 %v3361_v5, %s2783_s17  ;;  %1257 = vrot.lane.b32.xlu0 %v3317_v38, %s2782_s16 }
 0x22a   : > { %v3417_v57 = vpop.permute.xlu1 %1071  ;;  %v3419_v28 = vpop.permute.xlu0 %817 }
 0x22c   : > { %1195 = vrot.lane.b32.xlu1 %v3141_v44, %s2783_s17  ;;  %1125 = vrot.lane.b32.xlu0 %v3231_v33, %s2784_s18 }
 0x22e   : > { %v3425_v31 = vpop.permute.xlu1 %1007  ;;  %v3427_v29 = vpop.permute.xlu0 %1073 }
 0x22f   : > { %5874 = vst [vmem:[#allocation48_spill] sm:$0xff] %v3425_v31 }
 0x230   : > { %1127 = vrot.lane.b32.xlu1 %v3307_v20, %s2784_s18  ;;  %1081 = vrot.lane.b32.xlu0 %v3371_v58, %s2781_s15 }
 0x232   : > { %v3433_v61 = vpop.permute.xlu1 %943  ;;  %v3435_v56 = vpop.permute.xlu0 %1009 }
 0x233   : > { %5875 = vst [vmem:[#allocation49_spill] sm:$0xff] %v3433_v61  ;;  %5876 = vst [vmem:[#allocation50_spill] sm:$0xff] %v3435_v56 }
 0x234   : > { %1143 = vrot.lane.b32.xlu1 %v3361_v5, %s2784_s18  ;;  %1017 = vrot.lane.b32.xlu0 %v3371_v58, %s2786_s20 }
 0x236   : > { %v3441_v50 = vpop.permute.xlu1 %1199  ;;  %v3443_v19 = vpop.permute.xlu0 %945 }
 0x237   : > { %5877 = vst [vmem:[#allocation51_spill] sm:$0xff] %v3441_v50  ;;  %5878 = vst [vmem:[#allocation52_spill] sm:$0xff] %v3443_v19 }
 0x238   : > { %1255 = vrot.lane.b32.xlu1 %v3307_v20, %s2782_s16  ;;  %1141 = vrot.lane.b32.xlu0 %v3263_v0, %s2784_s18  ;;  %v2746_v20 = vld [vmem:[%s5669_s4 + $0x4] ss:$20 sps:$4 sm:$0xff]  }
 0x239   : > { %1572 = vmatprep.mubr.bf16.mxu1 %v2746_v20 }
 0x23a   : > { %v3449_v2 = vpop.permute.xlu1 %867  ;;  %v3451_v61 = vpop.permute.xlu0 %1201 }
 0x23b   : > { %5879 = vst [vmem:[#allocation53_spill] sm:$0xff] %v3451_v61 }
 0x23c   : > { %1271 = vrot.lane.b32.xlu1 %v3361_v5, %s2782_s16  ;;  %1253 = vrot.lane.b32.xlu0 %v3231_v33, %s2782_s16 }
 0x23e   : > { %v3457_v12 = vpop.permute.xlu1 %803  ;;  %v3459_v50 = vpop.permute.xlu0 %869 }
 0x240   : > { %1123 = vrot.lane.b32.xlu1 %v3225_v24, %s2784_s18  ;;  %1269 = vrot.lane.b32.xlu0 %v3263_v0, %s2782_s16 }
 0x242   : > { %v3465_v19 = vpop.permute.xlu1 %1059  ;;  %v3467_v40 = vpop.permute.xlu0 %805 }
 0x244   : > { %1139 = vrot.lane.b32.xlu1 %v3255_v43, %s2784_s18  ;;  %953 = vrot.lane.b32.xlu0 %v3371_v58, %s2789_s22 }
 0x246   : > { %v3473_v61 = vpop.permute.xlu1 %995  ;;  %v3475_v33 = vpop.permute.xlu0 %1061 }
 0x247   : > { %5880 = vst [vmem:[#allocation54_spill] sm:$0xff] %v3473_v61 }
 0x248   : > { %1251 = vrot.lane.b32.xlu1 %v3225_v24, %s2782_s16  ;;  %1121 = vrot.lane.b32.xlu0 %v3172_v54, %s2784_s18 }
 0x24a   : > { %v3481_v41 = vpop.permute.xlu1 %931  ;;  %v3483_v38 = vpop.permute.xlu0 %997 }
 0x24b   : > { %5881 = vst [vmem:[#allocation55_spill] sm:$0xff] %v3481_v41 }
 0x24c   : > { %1267 = vrot.lane.b32.xlu1 %v3255_v43, %s2782_s16  ;;  %1137 = vrot.lane.b32.xlu0 %v3201_v7, %s2784_s18 }
 0x24e   : > { %v3492_v0 = vpop.permute.xlu1 %1187  ;;  %v3494_v24 = vpop.permute.xlu0 %933 }
 0x24f   : > { %5882 = vst [vmem:[#allocation56_spill] sm:$0xff] %v3492_v0  ;;  %5883 = vst [vmem:[#allocation57_spill] sm:$0xff] %v3494_v24 }
 0x250   : > { %1119 = vrot.lane.b32.xlu1 %v3166_v17, %s2784_s18  ;;  %1209 = vrot.lane.b32.xlu0 %v3371_v58, %s2783_s17 }
 0x252   : > { %v3500_v41 = vpop.permute.xlu1 %883  ;;  %v3502_v5 = vpop.permute.xlu0 %1189 }
 0x253   : > { %5884 = vst [vmem:[#allocation58_spill] sm:$0xff] %v3502_v5 }
 0x254   : > { %1135 = vrot.lane.b32.xlu1 %v3195_v62, %s2784_s18  ;;  %1249 = vrot.lane.b32.xlu0 %v3172_v54, %s2782_s16 }
 0x256   : > { %v3508_v20 = vpop.permute.xlu1 %819  ;;  %v886_v0 = vpop.permute.xlu0 %885 }
 0x258   : > { %1247 = vrot.lane.b32.xlu1 %v3166_v17, %s2782_s16  ;;  %1265 = vrot.lane.b32.xlu0 %v3201_v7, %s2782_s16 }
 0x25a   : > { %v3514_v43 = vpop.permute.xlu1 %1075  ;;  %v3516_v24 = vpop.permute.xlu0 %821 }
 0x25c   : > { %1263 = vrot.lane.b32.xlu1 %v3195_v62, %s2782_s16  ;;  %1117 = vrot.lane.b32.xlu0 %v3123_v35, %s2784_s18 }
 0x25e   : > { %v3522_v5 = vpop.permute.xlu1 %1011  ;;  %v3524_v54 = vpop.permute.xlu0 %1077 }
 0x25f   : > { %5885 = vst [vmem:[#allocation59_spill] sm:$0xff] %v3522_v5 }
 0x260   : > { %1115 = vrot.lane.b32.xlu1 %v3119_v32, %s2784_s18  ;;  %1145 = vrot.lane.b32.xlu0 %v3371_v58, %s2784_s18 }
 0x262   : > { %v3530_v17 = vpop.permute.xlu1 %947  ;;  %v3532_v7 = vpop.permute.xlu0 %1013 }
 0x263   : > { %5886 = vst [vmem:[#allocation60_spill] sm:$0xff] %v3530_v17 }
 0x264   : > { %1131 = vrot.lane.b32.xlu1 %v3141_v44, %s2784_s18  ;;  %1273 = vrot.lane.b32.xlu0 %v3371_v58, %s2782_s16 }
 0x266   : > { %v3538_v62 = vpop.permute.xlu1 %1203  ;;  %v3540_v63 = vpop.permute.xlu0 %949 }
 0x267   : > { %5887 = vst [vmem:[#allocation61_spill] sm:$0xff] %v3538_v62  ;;  %5888 = vst [vmem:[#allocation62_spill] sm:$0xff] %v3540_v63  ;;  %v1385_v62 = vld [vmem:[%s5670_s5 + $0x30] sm:$0xff] }
 0x268   : > { %1243 = vrot.lane.b32.xlu1 %v3119_v32, %s2782_s16  ;;  %1133 = vrot.lane.b32.xlu0 %v3147_v46, %s2784_s18 }
 0x26a   : > { %v872_v17 = vpop.permute.xlu1 %871  ;;  %v3549_v59 = vpop.permute.xlu0 %1205 }
 0x26b   : > { %5889 = vst [vmem:[#allocation63_spill] sm:$0xff] %v3549_v59 }
 0x26c   : > { %1259 = vrot.lane.b32.xlu1 %v3141_v44, %s2782_s16  ;;  %1245 = vrot.lane.b32.xlu0 %v3123_v35, %s2782_s16  ;;  %v1386_v44 = vld [vmem:[%s5670_s5 + $0x38] sm:$0xff] }
 0x26e   : > { %v3558_v58 = vpop.permute.xlu1 %807  ;;  %v874_v32 = vpop.permute.xlu0 %873 }
 0x270   : > { %1419 = vperm.xlu1 %2738, %v1385_v62   ;;  %1261 = vrot.lane.b32.xlu0 %v3147_v46, %s2782_s16  ;;  %v1381_v62 = vld [vmem:[%s5670_s5 + $0x10] sm:$0xff]  ;;  %v1384_v46 = vld [vmem:[%s5670_s5 + $0x28] sm:$0xff] }
 0x272   : > { %v3565_v59 = vpop.permute.xlu1 %1063  ;;  %v3570_v35 = vpop.permute.xlu0 %809 }
 0x274   : > { %1409 = vperm.xlu1 %2738, %v1383_v60   ;;  %1424 = vperm.xlu0 %2737, %v1386_v44   ;;  %v1382_v44 = vld [vmem:[%s5670_s5 + $0x18] sm:$0xff] }
 0x276   : > { %v3575_v63 = vpop.permute.xlu1 %999  ;;  %v3580_v31 = vpop.permute.xlu0 %1065 }
 0x277   : > { %5890 = vst [vmem:[#allocation64_spill] sm:$0xff] %v3575_v63  ;;  %5891 = vst [vmem:[#allocation65_spill] sm:$0xff] %v3580_v31  ;;  %v902_v31 = vsel %vm365_vm6, %v3411_v36, %v3359_v52 }
 0x278   : > { %1399 = vperm.xlu1 %2738, %v1381_v62   ;;  %1414 = vperm.xlu0 %2737, %v1384_v46   ;;  %v1380_v46 = vld [vmem:[%s5670_s5 + $0x8] sm:$0xff] }
 0x27a   : > { %v3585_v60 = vpop.permute.xlu1 %935  ;;  %v3590_v56 = vpop.permute.xlu0 %1001 }
 0x27b   : > { %5892 = vst [vmem:[#allocation66_spill] sm:$0xff] %v3585_v60  ;;  %5893 = vst [vmem:[#allocation67_spill] sm:$0xff] %v3590_v56  ;;  %v896_v60 = vsel %vm365_vm6, %v3459_v50, %v886_v0 }
 0x27c   : > { %1389 = vperm.xlu1 %2738, %v1379_v4   ;;  %1404 = vperm.xlu0 %2737, %v1382_v44   ;;  %v918_v56 = vmul.f32 %v896_v60, %v3029_v9  ;;  %v903_v60 = vsel %vm365_vm6, %v3500_v41, %v3449_v2 }
 0x27e   : > { %v3592_v15 = vpop.permute.xlu1 %1191  ;;  %v3597_v62 = vpop.permute.xlu0 %937 }
 0x27f   : > { %5894 = vst [vmem:[#allocation68_spill] sm:$0xff] %v3592_v15  ;;  %5895 = vst [vmem:[#allocation69_spill] sm:$0xff] %v3597_v62 }
 0x280   : > { %1394 = vperm.xlu0 %2737, %v1380_v46   ;;  %v895_v46 = vsel %vm365_vm6, %v3449_v2, %v3500_v41 }
 0x282   : > { %v888_v18 = vpop.permute.xlu1 %887  ;;  %v3599_v63 = vpop.permute.xlu0 %1193 }
 0x283   : > { %5896 = vst [vmem:[#allocation70_spill] sm:$0xff] %v3599_v63  ;;  %v905_v4 = vsel %vm365_vm6, %v888_v18, %v872_v17  ;;  %v897_v15 = vsel %vm365_vm6, %v872_v17, %v888_v18  ;;  %v904_v63 = vsel %vm365_vm6, %v886_v0, %v3459_v50  ;;  %v894_v50 = vsel %vm365_vm6, %v3359_v52, %v3411_v36 }
 0x284   : > { %v920_v18 = vmul.f32 %v897_v15, %v3029_v9  ;;  %v919_v5 = vmul.f32 %v905_v4, %v3026_v8  ;;  %v917_v4 = vmul.f32 %v904_v63, %v3026_v8  ;;  %v914_v2 = vmul.f32 %v894_v50, %v3029_v9 }
 0x285   : > { %v900_v63 = vsel %vm365_vm6, %v3315_v34, %v3271_v48  ;;  %v901_v36 = vsel %vm365_vm6, %v3401_v30, %v3348_v21 }
 0x286   : > { %v3606_v44 = vpop.permute.xlu1 %1179  ;;  %v890_v62 = vpop.permute.xlu0 %889 }
 0x287   : > { %5897 = vst [vmem:[#allocation71_spill] sm:$0xff] %v3606_v44  ;;  %v906_v61 = vsel %vm365_vm6, %v890_v62, %v874_v32  ;;  %v898_v44 = vsel %vm365_vm6, %v874_v32, %v890_v62  ;;  %v916_v32 = vmul.f32 %v895_v46, %v3029_v9 }
 0x288   : > { %v922_v17 = vmul.f32 %v898_v44, %v3029_v9  ;;  %v921_v22 = vmul.f32 %v906_v61, %v3026_v8  ;;  %v893_v61 = vsel %vm365_vm6, %v3348_v21, %v3401_v30  ;;  %v909_v21 = vmul.f32 %v900_v63, %v3026_v8 }
 0x289   : > { %v1320_v41 = vpack.c.bf16 %v918_v56, %v916_v32  ;;  %v912_v56 = vmul.f32 %v893_v61, %v3029_v9  ;;  %v827_v61 = vsel %vm344_vm8, %v3269_v47, %v3313_v27 }
 0x28a   : > { %v824_v0 = vpop.permute.xlu1 %823  ;;  %v3635_v15 = vpop.permute.xlu0 %1181  ;;  %v1322_v62 = vpack.c.bf16 %v922_v17, %v920_v18  ;;  %v1321_v44 = vpack.c.bf16 %v921_v22, %v919_v5  ;;  %v892_v22 = vsel %vm365_vm6, %v3271_v48, %v3315_v34  ;;  %v915_v5 = vmul.f32 %v903_v60, %v3026_v8 }
 0x28b   : > { %v891_v18 = vsel %vm365_vm6, %v3261_v45, %v3303_v14  ;;  %v913_v17 = vmul.f32 %v902_v31, %v3026_v8  ;;  %v899_v48 = vsel %vm365_vm6, %v3303_v14, %v3261_v45  ;;  %v910_v30 = vmul.f32 %v892_v22, %v3029_v9 }
 0x28c   : > { %1540 = vmatprep.subr.bf16.mxu1 %v1322_v62  ;;  %v1319_v50 = vpack.c.bf16 %v917_v4, %v915_v5  ;;  %v1318_v34 = vpack.c.bf16 %v914_v2, %v912_v56  ;;  %v911_v60 = vmul.f32 %v901_v36, %v3026_v8  ;;  %v908_v62 = vmul.f32 %v891_v18, %v3029_v9 }
 0x28d   : > { %1541 = vmatpush1.bf16.msra.mxu1 %v1321_v44  ;;  %v835_v31 = vsel %vm344_vm8, %v3313_v27, %v3269_v47  ;;  %v907_v45 = vmul.f32 %v899_v48, %v3026_v8  ;;  %v832_v4 = vsel %vm344_vm8, %v3467_v40, %v3516_v24  ;;  %v833_v22 = vsel %vm344_vm8, %v3558_v58, %v824_v0 }
 0x28e   : > { %v3652_v46 = vpop.permute.xlu1 %1079  ;;  %1542 = vmatprep.subr.bf16.mxu1 %v1320_v41  ;;  %v3663_v52 = vpop.permute.xlu0 %1197  ;;  %v1317_v14 = vpack.c.bf16 %v913_v17, %v911_v60  ;;  %v1316_v2 = vpack.c.bf16 %v910_v30, %v908_v62  ;;  %v3696_v41 = vmul.f32 %v835_v31, %v3053_v25  ;;  %v841_v5 = vsel %vm344_vm8, %v824_v0, %v3558_v58 }
 0x28f   : > { %v1315_v47 = vpack.c.bf16 %v909_v21, %v907_v45  ;;  %v1091_v27 = vsel %vm431_vm0, %v3323_v39, %v3277_v51  ;;  %v828_v36 = vsel %vm344_vm8, %v3279_v16, %v3325_v42  ;;  %v836_v56 = vsel %vm344_vm8, %v3325_v42, %v3279_v16 }
 0x290   : > { %v831_v58 = vsel %vm344_vm8, %v3457_v12, %v3508_v20  ;;  %v840_v18 = vsel %vm344_vm8, %v3516_v24, %v3467_v40  ;;  %v854_v17 = vmul.f32 %v832_v4, %v3056_v26  ;;  %v855_v42 = vmul.f32 %v841_v5, %v3053_v25 }
 0x291   : > { %1543 = vmatpush1.bf16.msra.mxu1 %v1319_v50  ;;  %v856_v48 = vmul.f32 %v833_v22, %v3056_v26  ;;  %v3738_v40 = vmul.f32 %v836_v56, %v3053_v25  ;;  %v3741_v24 = vmul.f32 %v828_v36, %v3056_v26  ;;  %v830_v21 = vsel %vm344_vm8, %v3369_v11, %v3419_v28 }
 0x292   : > { %v3677_v32 = vpop.permute.xlu1 %1015  ;;  %1544 = vmatprep.subr.bf16.mxu1 %v1318_v34  ;;  %v3684_v44 = vpop.permute.xlu0 %1129  ;;  %v839_v62 = vsel %vm344_vm8, %v3508_v20, %v3457_v12  ;;  %v852_v31 = vmul.f32 %v831_v58, %v3056_v26  ;;  %v853_v12 = vmul.f32 %v840_v18, %v3053_v25  ;;  %v3774_v20 = vsel %vm431_vm0, %v3277_v51, %v3323_v39 }
 0x293   : > { %v850_v22 = vmul.f32 %v830_v21, %v3056_v26  ;;  %v3793_v39 = vsel %vm409_vm7, %v3285_v53, %v3331_v1  ;;  %v1094_v18 = vsel %vm431_vm0, %v3427_v29, %v3379_v10  ;;  %v1086_v21 = vsel %vm431_vm0, %v3379_v10, %v3427_v29  ;;  %v5898_v29 = vld [vmem:[#allocation65_spill] sm:$0xff] }
 0x294   : > { %v1312_v5 = vpack.c.bf16 %v854_v17, %v852_v31  ;;  %v1095_v17 = vsel %vm431_vm0, %v3514_v43, %v3465_v19 }
 0x295   : > { %1545 = vmatpush1.bf16.msra.mxu1 %v1317_v14 }
 0x296   : > { %v3704_v63 = vpop.permute.xlu1 %951  ;;  %1546 = vmatprep.subr.bf16.mxu1 %v1316_v2  ;;  %v826_v0 = vpop.permute.xlu0 %825  ;;  %v844_v2 = vmul.f32 %v827_v61, %v3056_v26  ;;  %v3777_v61 = vmul.f32 %v1091_v27, %v2946_v23 }
 0x297   : > { %v834_v50 = vsel %vm344_vm8, %v3570_v35, %v826_v0  ;;  %v842_v16 = vsel %vm344_vm8, %v826_v0, %v3570_v35  ;;  %v838_v35 = vsel %vm344_vm8, %v3419_v28, %v3369_v11  ;;  %v829_v28 = vsel %vm344_vm8, %v3357_v6, %v3409_v37 }
 0x298   : > { %v857_v30 = vmul.f32 %v842_v16, %v3053_v25  ;;  %v858_v34 = vmul.f32 %v834_v50, %v3056_v26  ;;  %v837_v11 = vsel %vm344_vm8, %v3409_v37, %v3357_v6  ;;  %v1092_v37 = vsel %vm431_vm0, %v3333_v49, %v3287_v55 }
 0x299   : > { %1547 = vmatpush1.bf16.msra.mxu1 %v1315_v47  ;;  %v849_v6 = vmul.f32 %v838_v35, %v3053_v25  ;;  %v851_v47 = vmul.f32 %v839_v62, %v3053_v25  ;;  %v1308_v51 = vpack.c.bf16 %v3741_v24, %v844_v2  ;;  %v847_v27 = vmul.f32 %v837_v11, %v3053_v25  ;;  %v5900_v11 = vld [vmem:[#allocation59_spill] sm:$0xff] }
 0x29a   : > { %v3751_v60 = vpop.permute.xlu1 %1207  ;;  %v3758_v45 = vpop.permute.xlu0 %1257  ;;  %v1314_v14 = vpack.c.bf16 %v858_v34, %v856_v48  ;;  %v1313_v4 = vpack.c.bf16 %v857_v30, %v855_v42  ;;  %v848_v56 = vmul.f32 %v829_v28, %v3056_v26  ;;  %v1307_v0 = vpack.c.bf16 %v3738_v40, %v3696_v41 }
 0x29b   : > { %v1096_v50 = vsel %vm431_vm0, %v3524_v54, %v3475_v33  ;;  %v1311_v16 = vpack.c.bf16 %v853_v12, %v851_v47  ;;  %v3817_v41 = vsel %vm431_vm0, %v3287_v55, %v3333_v49  ;;  %v3820_v42 = vmul.f32 %v1092_v37, %v2946_v23  ;;  %v5901_v12 = vld [vmem:[#allocation54_spill] sm:$0xff] }
 0x29c   : > { %1548 = vmatprep.subr.bf16.mxu1 %v1314_v14  ;;  %v3826_v48 = vsel %vm431_vm0, %v3367_v3, %v3417_v57  ;;  %v1310_v30 = vpack.c.bf16 %v850_v22, %v848_v56  ;;  %v1093_v34 = vsel %vm431_vm0, %v3417_v57, %v3367_v3  ;;  %v1089_v55 = vsel %vm431_vm0, %v3565_v59, %v3652_v46  ;;  %v5899_v14 = vld [vmem:[#allocation3_spill] sm:$0xff] }
 0x29d   : > { %1549 = vmatpush1.bf16.msra.mxu1 %v1313_v4  ;;  %v1097_v49 = vsel %vm431_vm0, %v3652_v46, %v3565_v59  ;;  %v1309_v24 = vpack.c.bf16 %v849_v6, %v847_v27  ;;  %v3847_v3 = vmul.f32 %v1094_v18, %v2946_v23  ;;  %v1108_v57 = vmul.f32 %v1095_v17, %v2946_v23 }
 0x29e   : > { %v3786_v36 = vpop.permute.xlu1 %1195  ;;  %1550 = vmatprep.subr.bf16.mxu1 %v1312_v5  ;;  %v3797_v58 = vpop.permute.xlu0 %1125  ;;  %v1110_v35 = vmul.f32 %v1096_v50, %v2946_v23  ;;  %v1088_v59 = vsel %vm431_vm0, %v3475_v33, %v3524_v54  ;;  %v1024_v46 = vsel %vm409_vm7, %v3483_v38, %v3532_v7  ;;  %v1111_v4 = vmul.f32 %v1089_v55, %v5899_v14  ;;  %v5902_v5 = vld [vmem:[#allocation64_spill] sm:$0xff]  ;;  %v5903_v50 = vld [vmem:[#allocation15_spill] sm:$0xff] }
 0x29f   : > { %v1112_v2 = vmul.f32 %v1097_v49, %v2946_v23  ;;  %v1087_v33 = vsel %vm431_vm0, %v3465_v19, %v3514_v43  ;;  %v1023_v22 = vsel %vm409_vm7, %v5901_v12, %v5900_v11  ;;  %v1025_v37 = vsel %vm409_vm7, %v5902_v5, %v3677_v32  ;;  %v5905_v49 = vld [vmem:[#allocation14_spill] sm:$0xff] }
 0x2a0   : > { %v1033_v6 = vsel %vm409_vm7, %v3677_v32, %v5902_v5  ;;  %v1109_v43 = vmul.f32 %v1088_v59, %v5899_v14  ;;  %v1352_v18 = vpack.c.bf16 %v1110_v35, %v1108_v57  ;;  %v1032_v17 = vsel %vm409_vm7, %v3532_v7, %v3483_v38  ;;  %v5906_v38 = vld [vmem:[#allocation50_spill] sm:$0xff] }
 0x2a1   : > { %1551 = vmatpush1.bf16.msra.mxu1 %v1311_v16  ;;  %v1046_v16 = vmul.f32 %v1024_v46, %v5903_v50  ;;  %v1104_v7 = vmul.f32 %v1093_v34, %v2946_v23  ;;  %v1107_v46 = vmul.f32 %v1087_v33, %v5899_v14  ;;  %v1105_v33 = vmul.f32 %v1086_v21, %v5899_v14 }
 0x2a2   : > { %v3840_v40 = vpop.permute.xlu1 %1127  ;;  %1552 = vmatprep.subr.bf16.mxu1 %v1310_v30  ;;  %v1082_v62 = vpop.permute.xlu0 %1081  ;;  %v5904_v30 = vld [vmem:[#allocation67_spill] sm:$0xff]  ;;  %v1103_v21 = vmul.f32 %v3826_v48, %v5899_v14 }
 0x2a3   : > { %v1090_v10 = vsel %vm431_vm0, %v5898_v29, %v1082_v62  ;;  %v1098_v31 = vsel %vm431_vm0, %v1082_v62, %v5898_v29  ;;  %v5907_v62 = vld [vmem:[#allocation44_spill] sm:$0xff]  ;;  %v1351_v5 = vpack.c.bf16 %v1109_v43, %v1107_v46 }
 0x2a4   : > { %v1113_v28 = vmul.f32 %v1090_v10, %v5899_v14  ;;  %v1114_v54 = vmul.f32 %v1098_v31, %v2946_v23  ;;  %v1022_v59 = vsel %vm409_vm7, %v5907_v62, %v5906_v38  ;;  %v1031_v10 = vsel %vm409_vm7, %v5900_v11, %v5901_v12 }
 0x2a5   : > { %1553 = vmatpush1.bf16.msra.mxu1 %v1309_v24  ;;  %v1048_v24 = vmul.f32 %v1025_v37, %v5903_v50  ;;  %v1044_v31 = vmul.f32 %v1023_v22, %v5903_v50  ;;  %v1045_v37 = vmul.f32 %v1032_v17, %v5905_v49  ;;  %v1030_v11 = vsel %vm409_vm7, %v5906_v38, %v5907_v62 }
 0x2a6   : > { %v3885_v47 = vpop.permute.xlu1 %1143  ;;  %v1353_v19 = vpack.c.bf16 %v1113_v28, %v1111_v4  ;;  %1554 = vmatprep.subr.bf16.mxu1 %v1308_v51  ;;  %v1018_v27 = vpop.permute.xlu0 %1017  ;;  %v1354_v56 = vpack.c.bf16 %v1114_v54, %v1112_v2  ;;  %v1047_v51 = vmul.f32 %v1033_v6, %v5905_v49  ;;  %v5908_v28 = vld [vmem:[#allocation48_spill] sm:$0xff]  ;;  %v5909_v54 = vld [vmem:[#allocation42_spill] sm:$0xff]  ;;  %v1042_v12 = vmul.f32 %v1022_v59, %v5903_v50 }
 0x2a7   : > { %v1026_v32 = vsel %vm409_vm7, %v5904_v30, %v1018_v27  ;;  %v1034_v55 = vsel %vm409_vm7, %v1018_v27, %v5904_v30  ;;  %v1336_v22 = vpack.c.bf16 %v1046_v16, %v1044_v31  ;;  %v1350_v6 = vpack.c.bf16 %v3847_v3, %v1104_v7  ;;  %v5911_v27 = vld [vmem:[#allocation33_spill] sm:$0xff] }
 0x2a8   : > { %v1049_v57 = vmul.f32 %v1034_v55, %v5905_v49  ;;  %v1050_v35 = vmul.f32 %v1026_v32, %v5903_v50  ;;  %1613 = vmatprep.subr.bf16.mxu0 %v1354_v56  ;;  %v1043_v43 = vmul.f32 %v1031_v10, %v5905_v49  ;;  %v1101_v17 = vmul.f32 %v3817_v41, %v5899_v14 }
 0x2a9   : > { %1555 = vmatpush1.bf16.msra.mxu1 %v1307_v0  ;;  %1614 = vmatpush1.bf16.msra.mxu0 %v1353_v19  ;;  %v1021_v0 = vsel %vm409_vm7, %v5909_v54, %v5908_v28  ;;  %v5910_v19 = vld [vmem:[#allocation38_spill] sm:$0xff]  ;;  %v1029_v3 = vsel %vm409_vm7, %v5908_v28, %v5909_v54  ;;  %v1349_v32 = vpack.c.bf16 %v1105_v33, %v1103_v21  ;;  %v5915_v28 = vld [vmem:[#allocation41_spill] sm:$0xff]  ;;  %v5921_v21 = vld [vmem:[#allocation35_spill] sm:$0xff] }
 0x2aa   : > { %v3909_v29 = vpop.permute.xlu1 %1255  ;;  %1615 = vmatprep.subr.bf16.mxu0 %v1352_v18  ;;  %v3916_v34 = vpop.permute.xlu0 %1141  ;;  %v1338_v4 = vpack.c.bf16 %v1050_v35, %v1048_v24  ;;  %v1337_v2 = vpack.c.bf16 %v1049_v57, %v1047_v51  ;;  %v1020_v56 = vsel %vm409_vm7, %v5911_v27, %v5910_v19  ;;  %v1040_v16 = vmul.f32 %v1021_v0, %v5903_v50 }
 0x2ab   : > { %v1028_v48 = vsel %vm409_vm7, %v5910_v19, %v5911_v27  ;;  %v1041_v55 = vmul.f32 %v1030_v11, %v5905_v49  ;;  %v1335_v41 = vpack.c.bf16 %v1045_v37, %v1043_v43  ;;  %v1038_v51 = vmul.f32 %v1020_v56, %v5903_v50  ;;  %v5917_v37 = vld [vmem:[#allocation30_spill] sm:$0xff]  ;;  %v5918_v11 = vld [vmem:[#allocation31_spill] sm:$0xff]  ;;  %v5922_v43 = vld [vmem:[#allocation36_spill] sm:$0xff] }
 0x2ac   : > { %1556 = vmatprep.subr.bf16.mxu1 %v1338_v4  ;;  %v1334_v24 = vpack.c.bf16 %v1042_v12, %v1040_v16  ;;  %v1348_v57 = vpack.c.bf16 %v3820_v42, %v3777_v61  ;;  %v1099_v35 = vmul.f32 %v3774_v20, %v5899_v14  ;;  %v1027_v7 = vsel %vm409_vm7, %v3331_v1, %v3285_v53  ;;  %v5912_v53 = vld [vmem:[#allocation62_spill] sm:$0xff]  ;;  %v5913_v1 = vld [vmem:[#allocation57_spill] sm:$0xff] }
 0x2ad   : > { %1557 = vmatpush2.bf16.msra.mxu1 %v1337_v2  ;;  %1616 = vmatpush1.bf16.msra.mxu0 %v1351_v5  ;;  %v1039_v38 = vmul.f32 %v1029_v3, %v5905_v49  ;;  %v1036_v59 = vmul.f32 %v3793_v39, %v5903_v50  ;;  %v1037_v46 = vmul.f32 %v1028_v48, %v5905_v49  ;;  %v5914_v2 = vld [vmem:[#allocation40_spill] sm:$0xff]  ;;  %v5916_v39 = vld [vmem:[#allocation66_spill] sm:$0xff]  ;;  %v5923_v3 = vld [vmem:[#allocation17_spill] sm:$0xff] }
 0x2ae   : > { %v3937_v18 = vpop.permute.xlu1 %1271  ;;  %1558 = vmatprep.subr.bf16.mxu1 %v1336_v22  ;;  %1617 = vmatprep.subr.bf16.mxu0 %v1350_v6  ;;  %v3946_v30 = vpop.permute.xlu0 %1253  ;;  %v1347_v20 = vpack.c.bf16 %v1101_v17, %v1099_v35  ;;  %v1035_v10 = vmul.f32 %v1027_v7, %v5905_v49  ;;  %v960_v31 = vsel %vm387_vm9, %v5913_v1, %v5912_v53  ;;  %v5919_v22 = vld [vmem:[#allocation60_spill] sm:$0xff]  ;;  %v5920_v6 = vld [vmem:[#allocation55_spill] sm:$0xff]  ;;  %v5924_v48 = vld [vmem:[#allocation69_spill] sm:$0xff] }
 0x2af   : > { %v1333_v42 = vpack.c.bf16 %v1041_v55, %v1039_v38  ;;  %v1332_v4 = vpack.c.bf16 %v1038_v51, %v1036_v59  ;;  %v1346_v54 = vpack.c.bf16 %v5915_v28, %v5914_v2  ;;  %v961_v0 = vsel %vm387_vm9, %v5916_v39, %v3704_v63  ;;  %v5926_v7 = vld [vmem:[#allocation52_spill] sm:$0xff]  ;;  %v5927_v38 = vld [vmem:[#allocation46_spill] sm:$0xff] }
 0x2b0   : > { %v969_v33 = vsel %vm387_vm9, %v3704_v63, %v5916_v39  ;;  %v1344_v12 = vpack.c.bf16 %v5918_v11, %v5917_v37  ;;  %v959_v19 = vsel %vm387_vm9, %v5920_v6, %v5919_v22  ;;  %v1331_v56 = vpack.c.bf16 %v1037_v46, %v1035_v10  ;;  %v5934_v11 = vld [vmem:[#allocation49_spill] sm:$0xff] }
 0x2b1   : > { %1559 = vmatpush2.bf16.msra.mxu1 %v1335_v41  ;;  %1618 = vmatpush1.bf16.msra.mxu0 %v1349_v32  ;;  %v1345_v17 = vpack.c.bf16 %v5922_v43, %v5921_v21  ;;  %v968_v63 = vsel %vm387_vm9, %v5912_v53, %v5913_v1  ;;  %v982_v16 = vmul.f32 %v960_v31, %v5923_v3  ;;  %v5925_v41 = vld [vmem:[#allocation16_spill] sm:$0xff]  ;;  %v5931_v1 = vld [vmem:[#allocation21_spill] sm:$0xff] }
 0x2b2   : > { %v3963_v62 = vpop.permute.xlu1 %1123  ;;  %1560 = vmatprep.subr.bf16.mxu1 %v1334_v24  ;;  %1619 = vmatprep.subr.bf16.mxu0 %v1348_v57  ;;  %v3968_v61 = vpop.permute.xlu0 %1269  ;;  %v983_v51 = vmul.f32 %v969_v33, %v5925_v41  ;;  %v984_v24 = vmul.f32 %v961_v0, %v5923_v3  ;;  %v958_v59 = vsel %vm387_vm9, %v5927_v38, %v5926_v7  ;;  %v5930_v53 = vld [vmem:[#allocation20_spill] sm:$0xff]  ;;  %v5932_v0 = vld [vmem:[#allocation39_spill] sm:$0xff]  ;;  %v5933_v33 = vld [vmem:[#allocation34_spill] sm:$0xff] }
 0x2b3   : > { %v1339_v31 = vpack.c.bf16 %v5931_v1, %v5930_v53  ;;  %v980_v2 = vmul.f32 %v959_v19, %v5923_v3  ;;  %v956_v37 = vsel %vm387_vm9, %v5933_v33, %v5932_v0  ;;  %v5937_v19 = vld [vmem:[#allocation32_spill] sm:$0xff]  ;;  %v978_v43 = vmul.f32 %v958_v59, %v5923_v3  ;;  %v5942_v1 = vld [vmem:[#allocation22_spill] sm:$0xff] }
 0x2b5   : > { %1561 = vmatpush2.bf16.msra.mxu1 %v1333_v42  ;;  %1620 = vmatpush1.bf16.msra.mxu0 %v1347_v20  ;;  %v5928_v20 = vld [vmem:[#allocation28_spill] sm:$0xff]  ;;  %v5929_v42 = vld [vmem:[#allocation29_spill] sm:$0xff] }
 0x2b6   : > { %v3985_v5 = vpop.permute.xlu1 %1139  ;;  %1562 = vmatprep.subr.bf16.mxu1 %v1332_v4  ;;  %1621 = vmatprep.subr.bf16.mxu0 %v1346_v54  ;;  %v954_v27 = vpop.permute.xlu0 %953  ;;  %v1343_v10 = vpack.c.bf16 %v5929_v42, %v5928_v20  ;;  %v967_v4 = vsel %vm387_vm9, %v5919_v22, %v5920_v6  ;;  %v966_v22 = vsel %vm387_vm9, %v5926_v7, %v5927_v38  ;;  %v5936_v6 = vld [vmem:[#allocation37_spill] sm:$0xff]  ;;  %v5940_v42 = vld [vmem:[#allocation24_spill] sm:$0xff] }
 0x2b7   : > { %v962_v32 = vsel %vm387_vm9, %v5924_v48, %v954_v27  ;;  %v970_v55 = vsel %vm387_vm9, %v954_v27, %v5924_v48  ;;  %v5935_v27 = vld [vmem:[#allocation43_spill] sm:$0xff]  ;;  %v955_v21 = vsel %vm387_vm9, %v5937_v19, %v5936_v6  ;;  %v5938_v48 = vld [vmem:[#allocation26_spill] sm:$0xff]  ;;  %v977_v7 = vmul.f32 %v966_v22, %v5925_v41 }
 0x2b8   : > { %v985_v57 = vmul.f32 %v970_v55, %v5925_v41  ;;  %v986_v35 = vmul.f32 %v962_v32, %v5923_v3  ;;  %v5939_v32 = vld [vmem:[#allocation27_spill] sm:$0xff]  ;;  %v963_v59 = vsel %vm387_vm9, %v5936_v6, %v5937_v19  ;;  %v5947_v19 = vld [vmem:[#allocation56_spill] sm:$0xff] }
 0x2b9   : > { %1563 = vmatpush2.bf16.msra.mxu1 %v1331_v56  ;;  %1622 = vmatpush1.bf16.msra.mxu0 %v1345_v17  ;;  %v957_v56 = vsel %vm387_vm9, %v5935_v27, %v5934_v11  ;;  %v1328_v17 = vpack.c.bf16 %v982_v16, %v980_v2  ;;  %v1342_v55 = vpack.c.bf16 %v5939_v32, %v5938_v48 }
 0x2ba   : > { %v4014_v46 = vpop.permute.xlu1 %1251  ;;  %1623 = vmatprep.subr.bf16.mxu0 %v1344_v12  ;;  %v4025_v28 = vpop.permute.xlu0 %1121  ;;  %v1330_v54 = vpack.c.bf16 %v986_v35, %v984_v24  ;;  %v1329_v39 = vpack.c.bf16 %v985_v57, %v983_v51  ;;  %v981_v12 = vmul.f32 %v968_v63, %v5925_v41  ;;  %v964_v51 = vsel %vm387_vm9, %v5932_v0, %v5933_v33  ;;  %v5944_v0 = vld [vmem:[#allocation58_spill] sm:$0xff]  ;;  %v5945_v33 = vld [vmem:[#allocation63_spill] sm:$0xff] }
 0x2bb   : > { %v965_v63 = vsel %vm387_vm9, %v5934_v11, %v5935_v27  ;;  %v979_v24 = vmul.f32 %v967_v4, %v5925_v41  ;;  %v974_v16 = vmul.f32 %v956_v37, %v5923_v3  ;;  %v976_v35 = vmul.f32 %v957_v56, %v5923_v3  ;;  %v5943_v4 = vld [vmem:[#allocation23_spill] sm:$0xff]  ;;  %v5946_v56 = vld [vmem:[#allocation68_spill] sm:$0xff] }
 0x2bc   : > { %1564 = vmatprep.subr.bf16.mxu1 %v1330_v54  ;;  %v1340_v2 = vpack.c.bf16 %v5943_v4, %v5942_v1  ;;  %v972_v54 = vmul.f32 %v955_v21, %v5923_v3  ;;  %v1224_v37 = vsel %vm475_vm1, %v5945_v33, %v5944_v0  ;;  %v973_v27 = vmul.f32 %v964_v51, %v5925_v41  ;;  %v5948_v21 = vld [vmem:[#allocation61_spill] sm:$0xff]  ;;  %v5952_v1 = vld [vmem:[#allocation47_spill] sm:$0xff] }
 0x2bd   : > { %1565 = vmatpush2.bf16.msra.mxu1 %v1329_v39  ;;  %1624 = vmatpush1.bf16.msra.mxu0 %v1343_v10  ;;  %v1327_v20 = vpack.c.bf16 %v981_v12, %v979_v24  ;;  %v5941_v10 = vld [vmem:[#allocation25_spill] sm:$0xff]  ;;  %v975_v39 = vmul.f32 %v965_v63, %v5925_v41  ;;  %v1326_v11 = vpack.c.bf16 %v978_v43, %v976_v35  ;;  %v5950_v63 = vld [vmem:[#allocation70_spill] sm:$0xff] }
 0x2be   : > { %v4056_v57 = vpop.permute.xlu1 %1267  ;;  %1566 = vmatprep.subr.bf16.mxu1 %v1328_v17  ;;  %1625 = vmatprep.subr.bf16.mxu0 %v1342_v55  ;;  %v4061_v38 = vpop.permute.xlu0 %1137  ;;  %v1341_v53 = vpack.c.bf16 %v5941_v10, %v5940_v42  ;;  %v1217_v22 = vsel %vm475_vm1, %v5946_v56, %v3751_v60  ;;  %v1225_v12 = vsel %vm475_vm1, %v3751_v60, %v5946_v56  ;;  %v5949_v60 = vld [vmem:[#allocation5_spill] sm:$0xff]  ;;  %v5955_v56 = vld [vmem:[#allocation51_spill] sm:$0xff] }
 0x2bf   : > { %v1223_v43 = vsel %vm475_vm1, %v5948_v21, %v5947_v19  ;;  %v1325_v48 = vpack.c.bf16 %v977_v7, %v975_v39  ;;  %v1324_v32 = vpack.c.bf16 %v974_v16, %v972_v54  ;;  %v1216_v55 = vsel %vm475_vm1, %v5944_v0, %v5945_v33  ;;  %v5953_v4 = vld [vmem:[#allocation53_spill] sm:$0xff] }
 0x2c0   : > { %v1238_v51 = vmul.f32 %v1224_v37, %v5949_v60  ;;  %v1240_v7 = vmul.f32 %v1225_v12, %v5949_v60  ;;  %v1215_v39 = vsel %vm475_vm1, %v5947_v19, %v5948_v21  ;;  %v1236_v0 = vmul.f32 %v1223_v43, %v5949_v60 }
 0x2c1   : > { %1567 = vmatpush2.bf16.msra.mxu1 %v1327_v20  ;;  %1626 = vmatpush1.bf16.msra.mxu0 %v1341_v53  ;;  %v5951_v20 = vld [vmem:[#allocation4_spill] sm:$0xff]  ;;  %v971_v53 = vmul.f32 %v963_v59, %v5925_v41  ;;  %v1214_v19 = vsel %vm475_vm1, %v5952_v1, %v5953_v4 }
 0x2c2   : > { %v4086_v6 = vpop.permute.xlu1 %1119  ;;  %1568 = vmatprep.subr.bf16.mxu1 %v1326_v11  ;;  %1627 = vmatprep.subr.bf16.mxu0 %v1340_v2  ;;  %v1210_v17 = vpop.permute.xlu0 %1209  ;;  %v1239_v42 = vmul.f32 %v1217_v22, %v5951_v20  ;;  %v1222_v2 = vsel %vm475_vm1, %v5953_v4, %v5952_v1  ;;  %v5954_v11 = vld [vmem:[#allocation45_spill] sm:$0xff]  ;;  %v1368_v43 = vpack.c.bf16 %v1238_v51, %v1236_v0  ;;  %v2747_v51 = vld [vmem:[%s5669_s4 + $0x2c] ss:$20 sps:$4 sm:$0xff]  }
 0x2c3   : > { %v1218_v24 = vsel %vm475_vm1, %v5950_v63, %v1210_v17  ;;  %v1226_v35 = vsel %vm475_vm1, %v1210_v17, %v5950_v63  ;;  %v1221_v22 = vsel %vm475_vm1, %v5955_v56, %v5954_v11  ;;  %v1323_v12 = vpack.c.bf16 %v973_v27, %v971_v53  ;;  %v2744_v17 = vld [vmem:[%s5669_s4] ss:$20 sps:$4 sm:$0xff]  }
 0x2c4   : > { %v1241_v16 = vmul.f32 %v1218_v24, %v5951_v20  ;;  %v1242_v10 = vmul.f32 %v1226_v35, %v5949_v60  ;;  %v1234_v21 = vmul.f32 %v1222_v2, %v5949_v60  ;;  %v1213_v24 = vsel %vm475_vm1, %v5954_v11, %v5955_v56 }
 0x2c5   : > { %1569 = vmatpush2.bf16.msra.mxu1 %v1325_v48  ;;  %1628 = vmatpush1.bf16.msra.mxu0 %v1339_v31  ;;  %v1237_v31 = vmul.f32 %v1216_v55, %v5951_v20  ;;  %v1235_v48 = vmul.f32 %v1215_v39, %v5951_v20  ;;  %v1232_v35 = vmul.f32 %v1221_v22, %v5949_v60 }
 0x2c6   : > { %v4112_v54 = vpop.permute.xlu1 %1135  ;;  %v1369_v33 = vpack.c.bf16 %v1241_v16, %v1239_v42  ;;  %1570 = vmatprep.subr.bf16.mxu1 %v1324_v32  ;;  %v4119_v37 = vpop.permute.xlu0 %1249  ;;  %v1370_v59 = vpack.c.bf16 %v1242_v10, %v1240_v7  ;;  %v5956_v32 = vld [vmem:[#allocation71_spill] sm:$0xff]  ;;  %v1233_v7 = vmul.f32 %v1214_v19, %v5951_v20  ;;  %v1220_v10 = vsel %vm475_vm1, %v3663_v52, %v3635_v15 }
 0x2c7   : > { %v1211_v27 = vsel %vm475_vm1, %v5956_v32, %v3786_v36  ;;  %v1219_v55 = vsel %vm475_vm1, %v3786_v36, %v5956_v32  ;;  %v1212_v36 = vsel %vm475_vm1, %v3635_v15, %v3663_v52  ;;  %v1367_v16 = vpack.c.bf16 %v1237_v31, %v1235_v48 }
 0x2c8   : > { %1629 = vmatprep.subr.bf16.mxu0 %v1370_v59  ;;  %v1227_v53 = vmul.f32 %v1211_v27, %v5951_v20  ;;  %v1228_v1 = vmul.f32 %v1219_v55, %v5949_v60  ;;  %v1366_v4 = vpack.c.bf16 %v1234_v21, %v1232_v35  ;;  %v1231_v2 = vmul.f32 %v1213_v24, %v5951_v20  ;;  %v2749_v21 = vld [vmem:[%s5669_s4 + $0x28] ss:$20 sps:$4 sm:$0xff]   ;;  %v5960_v24 = vld [vmem:[#allocation6_spill] sm:$0xff] }
 0x2c9   : > { %1571 = vmatpush2.bf16.msra.mxu1 %v1323_v12  ;;  %1630 = vmatpush2.bf16.msra.mxu0 %v1369_v33  ;;  %v1229_v39 = vmul.f32 %v1212_v36, %v5951_v20  ;;  %v1153_v0 = vsel %vm453_vm3, %v3840_v40, %v3885_v47  ;;  %v1230_v15 = vmul.f32 %v1220_v10, %v5949_v60  ;;  %v5957_v12 = vld [vmem:[#allocation8_spill] sm:$0xff]  ;;  %v5959_v55 = vld [vmem:[#allocation7_spill] sm:$0xff] }
 0x2ca   : > { %v4143_v63 = vpop.permute.xlu1 %1247  ;;  %v4157_v42 = vpop.permute.xlu0 %1265  ;;  %1631 = vmatprep.subr.bf16.mxu0 %v1368_v43  ;;  %v1161_v52 = vsel %vm453_vm3, %v3885_v47, %v3840_v40  ;;  %v1152_v59 = vsel %vm453_vm3, %v3797_v58, %v3916_v34  ;;  %v1160_v11 = vsel %vm453_vm3, %v3916_v34, %v3797_v58  ;;  %v1365_v22 = vpack.c.bf16 %v1233_v7, %v1231_v2  ;;  %v5958_v43 = vld [vmem:[#allocation9_spill] sm:$0xff]  ;;  %v2750_v27 = vld [vmem:[%s5669_s4 + $0x54] ss:$20 sps:$4 sm:$0xff]  }
 0x2cb   : > { %v1281_v31 = vsel %vm497_vm2, %v3909_v29, %v3937_v18  ;;  %v1289_v40 = vsel %vm497_vm2, %v3937_v18, %v3909_v29  ;;  %v1363_v47 = vpack.c.bf16 %v1229_v39, %v1227_v53  ;;  %v1175_v19 = vmul.f32 %v1153_v0, %v5957_v12 }
 0x2cc   : > { %1573 = vmatmul.mubr.bf16.vlgmr.msra.gmra.mxu1 %v2744_v17  ;;  %v1151_v58 = vsel %vm453_vm3, %v3963_v62, %v3985_v5  ;;  %v1364_v34 = vpack.c.bf16 %v1230_v15, %v1228_v1  ;;  %v1176_v17 = vmul.f32 %v1161_v52, %v5958_v43  ;;  %v4207_v48 = vmul.f32 %v1152_v59, %v5957_v12 }
 0x2cd   : > { %1632 = vmatpush2.bf16.msra.mxu0 %v1367_v16  ;;  %1582 = vmatprep.mubr.bf16.mxu1 %v2747_v51  ;;  %v1174_v29 = vmul.f32 %v1160_v11, %v5958_v43  ;;  %v1159_v18 = vsel %vm453_vm3, %v3985_v5, %v3963_v62  ;;  %v1303_v51 = vmul.f32 %v1281_v31, %v5959_v55 }
 0x2ce   : > { %v4172_v33 = vpop.permute.xlu1 %1263  ;;  %v4187_v56 = vpop.permute.xlu0 %1117  ;;  %1633 = vmatprep.subr.bf16.mxu0 %v1366_v4  ;;  %v1304_v35 = vmul.f32 %v1289_v40, %v5960_v24  ;;  %v1288_v36 = vsel %vm497_vm2, %v3968_v61, %v3946_v30  ;;  %v1287_v62 = vsel %vm497_vm2, %v4056_v57, %v4014_v46  ;;  %v1171_v7 = vmul.f32 %v1151_v58, %v5957_v12 }
 0x2cf   : > { %v1157_v16 = vsel %vm453_vm3, %v4112_v54, %v4086_v6  ;;  %v1280_v1 = vsel %vm497_vm2, %v3946_v30, %v3968_v61  ;;  %v1172_v4 = vmul.f32 %v1159_v18, %v5958_v43  ;;  %v1302_v0 = vmul.f32 %v1288_v36, %v5960_v24 }
 0x2d0   : > { %v1300_v15 = vmul.f32 %v1287_v62, %v5960_v24  ;;  %v1279_v30 = vsel %vm497_vm2, %v4014_v46, %v4056_v57  ;;  %v1168_v61 = vmul.f32 %v1157_v16, %v5958_v43  ;;  %v1359_v31 = vpack.c.bf16 %v4207_v48, %v1171_v7 }
 0x2d1   : > { %1634 = vmatpush2.bf16.msra.mxu0 %v1365_v22  ;;  %v1149_v40 = vsel %vm453_vm3, %v4086_v6, %v4112_v54  ;;  %v2752_v6 = vld [vmem:[%s5669_s4 + $0x50] ss:$20 sps:$4 sm:$0xff]   ;;  %v1299_v54 = vmul.f32 %v1279_v30, %v5959_v55 }
 0x2d2   : > { %v4214_v32 = vpop.permute.xlu1 %1115  ;;  %v1146_v5 = vpop.permute.xlu0 %1145  ;;  %1635 = vmatprep.subr.bf16.mxu0 %v1364_v34  ;;  %v1360_v34 = vpack.c.bf16 %v1174_v29, %v1172_v4  ;;  %v1376_v48 = vpack.c.bf16 %v1302_v0, %v1300_v15  ;;  %v1167_v29 = vmul.f32 %v1149_v40, %v5957_v12 }
 0x2d3   : > { %v1154_v10 = vsel %vm453_vm3, %v3684_v44, %v1146_v5  ;;  %v1162_v53 = vsel %vm453_vm3, %v1146_v5, %v3684_v44  ;;  %v1158_v44 = vsel %vm453_vm3, %v4061_v38, %v4025_v28 }
 0x2d4   : > { %v1177_v2 = vmul.f32 %v1154_v10, %v5957_v12  ;;  %v1178_v39 = vmul.f32 %v1162_v53, %v5958_v43  ;;  %1583 = vmatmul.mubr.bf16.gmra.mxu1 %v2749_v21  ;;  %v1170_v57 = vmul.f32 %v1158_v44, %v5958_v43  ;;  %v1150_v21 = vsel %vm453_vm3, %v4025_v28, %v4061_v38 }
 0x2d5   : > { %1636 = vmatpush2.bf16.msra.mxu0 %v1363_v47  ;;  %1592 = vmatprep.mubr.bf16.mxu1 %v2750_v27  ;;  %v1286_v28 = vsel %vm497_vm2, %v4157_v42, %v4119_v37  ;;  %v1277_v38 = vsel %vm497_vm2, %v4143_v63, %v4172_v33  ;;  %v1169_v10 = vmul.f32 %v1150_v21, %v5957_v12 }
 0x2d6   : > { %v1132_v52 = vpop.permute.xlu1 %1131  ;;  %v1361_v59 = vpack.c.bf16 %v1177_v2, %v1175_v19  ;;  %v1274_v11 = vpop.permute.xlu0 %1273  ;;  %v1362_v22 = vpack.c.bf16 %v1178_v39, %v1176_v17  ;;  %v1358_v62 = vpack.c.bf16 %v1170_v57, %v1168_v61  ;;  %v1278_v53 = vsel %vm497_vm2, %v4119_v37, %v4157_v42 }
 0x2d7   : > { %v1282_v47 = vsel %vm497_vm2, %v3758_v45, %v1274_v11  ;;  %v1290_v46 = vsel %vm497_vm2, %v1274_v11, %v3758_v45  ;;  %v1285_v45 = vsel %vm497_vm2, %v4172_v33, %v4143_v63  ;;  %v1155_v5 = vsel %vm453_vm3, %v1132_v52, %v4214_v32 }
 0x2d8   : > { %v1305_v19 = vmul.f32 %v1282_v47, %v5959_v55  ;;  %v1306_v58 = vmul.f32 %v1290_v46, %v5960_v24  ;;  %1637 = vmatprep.subr.bf16.mxu0 %v1362_v22  ;;  %v1296_v7 = vmul.f32 %v1285_v45, %v5960_v24  ;;  %v1301_v33 = vmul.f32 %v1280_v1, %v5959_v55 }
 0x2d9   : > { %1638 = vmatpush2.bf16.msra.mxu0 %v1361_v59  ;;  %v1298_v4 = vmul.f32 %v1286_v28, %v5960_v24  ;;  %v1164_v2 = vmul.f32 %v1155_v5, %v5958_v43  ;;  %v1357_v15 = vpack.c.bf16 %v1169_v10, %v1167_v29  ;;  %v1295_v44 = vmul.f32 %v1277_v38, %v5959_v55  ;;  %v2762_v29 = vld [vmem:[%s5669_s4 + $0x30] ss:$20 sps:$4 sm:$0xff]   ;;  %v2767_v28 = vld [vmem:[%s5669_s4 + $0x60] ss:$20 sps:$4 sm:$0xff]   ;;  %v2771_v5 = vld [vmem:[%s5669_s4 + $0x88] ss:$20 sps:$4 sm:$0xff]  }
 0x2da   : > { %v1244_v17 = vpop.permute.xlu1 %1243  ;;  %v1377_v18 = vpack.c.bf16 %v1305_v19, %v1303_v51  ;;  %v1134_v27 = vpop.permute.xlu0 %1133  ;;  %1639 = vmatprep.subr.bf16.mxu0 %v1360_v34  ;;  %v1378_v36 = vpack.c.bf16 %v1306_v58, %v1304_v35  ;;  %v2753_v35 = vld [vmem:[%s5669_s4 + $0x7c] ss:$20 sps:$4 sm:$0xff]   ;;  %v1375_v0 = vpack.c.bf16 %v1301_v33, %v1299_v54  ;;  %v1297_v42 = vmul.f32 %v1278_v53, %v5959_v55  ;;  %v2760_v54 = vld [vmem:[%s5669_s4 + $0x34] ss:$20 sps:$4 sm:$0xff]  }
 0x2db   : > { %v1156_v51 = vsel %vm453_vm3, %v1134_v27, %v4187_v56  ;;  %v1148_v16 = vsel %vm453_vm3, %v4187_v56, %v1134_v27  ;;  %v1147_v56 = vsel %vm453_vm3, %v4214_v32, %v1132_v52  ;;  %v1374_v30 = vpack.c.bf16 %v1298_v4, %v1296_v7  ;;  %v2755_v32 = vld [vmem:[%s5669_s4 + $0x78] ss:$20 sps:$4 sm:$0xff]   ;;  %v2770_v38 = vld [vmem:[%s5669_s4 + $0x80] ss:$20 sps:$4 sm:$0xff]  }
 0x2dc   : > { %v1166_v63 = vmul.f32 %v1156_v51, %v5958_v43  ;;  %1593 = vmatmul.mubr.bf16.gmra.mxu1 %v2752_v6  ;;  %1694 = vmatprep.subr.bf16.mxu1 %v1378_v36  ;;  %v1165_v37 = vmul.f32 %v1148_v16, %v5957_v12  ;;  %v1163_v52 = vmul.f32 %v1147_v56, %v5957_v12  ;;  %v2756_v6 = vld [vmem:[%s5669_s4 + $0x8] ss:$20 sps:$4 sm:$0xff]   ;;  %v2763_v27 = vld [vmem:[%s5669_s4 + $0x38] ss:$20 sps:$4 sm:$0xff]  }
 0x2dd   : > { %1640 = vmatpush2.bf16.msra.mxu0 %v1359_v31  ;;  %1695 = vmatpush1.bf16.msra.mxu1 %v1377_v18  ;;  %v1373_v31 = vpack.c.bf16 %v1297_v42, %v1295_v44  ;;  %v2764_v18 = vld [vmem:[%s5669_s4 + $0x5c] ss:$20 sps:$4 sm:$0xff]   ;;  %v2766_v36 = vld [vmem:[%s5669_s4 + $0x58] ss:$20 sps:$4 sm:$0xff]  }
 0x2de   : > { %v1260_v39 = vpop.permute.xlu1 %1259  ;;  %1696 = vmatprep.subr.bf16.mxu1 %v1376_v48  ;;  %v1246_v1 = vpop.permute.xlu0 %1245  ;;  %1641 = vmatprep.subr.bf16.mxu0 %v1358_v62  ;;  %v1356_v61 = vpack.c.bf16 %v1166_v63, %v1164_v2  ;;  %v1355_v40 = vpack.c.bf16 %v1165_v37, %v1163_v52  ;;  %v2759_v48 = vld [vmem:[%s5669_s4 + $0x10] ss:$20 sps:$4 sm:$0xff]  }
 0x2df   : > { %1602 = vmatprep.mubr.bf16.mxu1 %v2753_v35  ;;  %v1275_v59 = vsel %vm497_vm2, %v1244_v17, %v1260_v39  ;;  %v1283_v11 = vsel %vm497_vm2, %v1260_v39, %v1244_v17  ;;  %v5961_v17 = vmov 0   ;;  %v2768_v62 = vld [vmem:[%s5669_s4 + $0x84] ss:$20 sps:$4 sm:$0xff]  }
 0x2e0   : > { %v1291_v57 = vmul.f32 %v1275_v59, %v5959_v55  ;;  %v1292_v19 = vmul.f32 %v1283_v11, %v5960_v24 }
 0x2e1   : > { %1642 = vmatpush2.bf16.msra.mxu0 %v1357_v15  ;;  %1697 = vmatpush1.bf16.msra.mxu1 %v1375_v0 }
 0x2e2   : > { %1698 = vmatprep.subr.bf16.mxu1 %v1374_v30  ;;  %v1262_v22 = vpop.permute.xlu0 %1261  ;;  %1643 = vmatprep.subr.bf16.mxu0 %v1356_v61 }
 0x2e3   : > { %v1276_v47 = vsel %vm497_vm2, %v1246_v1, %v1262_v22  ;;  %v1284_v46 = vsel %vm497_vm2, %v1262_v22, %v1246_v1 }
 0x2e4   : > { %v1293_v58 = vmul.f32 %v1276_v47, %v5959_v55  ;;  %v1294_v34 = vmul.f32 %v1284_v46, %v5960_v24  ;;  %1603 = vmatmul.mubr.bf16.gmra.mxu1 %v2755_v32 }
 0x2e5   : > { %1644 = vmatpush2.bf16.msra.mxu0 %v1355_v40  ;;  %1699 = vmatpush1.bf16.msra.mxu1 %v1373_v31 }
 0x2e6   : > { %v1371_v21 = vpack.c.bf16 %v1293_v58, %v1291_v57  ;;  %v1372_v45 = vpack.c.bf16 %v1294_v34, %v1292_v19  ;;  %1718 = vmatprep.mubr.bf16.mxu1 %v5961_v17 }
 0x2e8   : > { %1646 = vmatmul.mubr.bf16.vlgmr.msra.gmra.mxu0 %v2756_v6  ;;  %1700 = vmatprep.subr.bf16.mxu1 %v1372_v45 }
 0x2e9   : > { %1701 = vmatpush1.bf16.msra.mxu1 %v1371_v21  ;;  %1655 = vmatprep.mubr.bf16.mxu0 %v2760_v54 }
 0x2eb   : > { %v4380_v33 = vpop.permute.xlu1 %1419 }
 0x2ec   : > { %2707 = vmatmul.mubr.msk.bf16.vlgmr.msra.gmra.mxu1 %vm1527_vm15, %v2759_v48 }
 0x2ed   : > { %1728 = vmatprep.mubr.bf16.mxu1 %v5961_v17 }
 0x2ef   : > { %v4388_v56 = vpop.permute.xlu1 %1409  ;;  %v4390_v2 = vpop.permute.xlu0 %1424 }
 0x2f0   : > { %1656 = vmatmul.mubr.bf16.gmra.mxu0 %v2762_v29 }
 0x2f1   : > { %1665 = vmatprep.mubr.bf16.mxu0 %v2764_v18 }
 0x2f3   : > { %v4398_v15 = vpop.permute.xlu1 %1399  ;;  %v4400_v44 = vpop.permute.xlu0 %1414 }
 0x2f4   : > { %2708 = vmatmul.mubr.msk.bf16.gmra.mxu1 %vm1527_vm15, %v2763_v27 }
 0x2f5   : > { %1738 = vmatprep.mubr.bf16.mxu1 %v5961_v17 }
 0x2f7   : > { %v1390_v61 = vpop.permute.xlu1 %1389  ;;  %v4408_v32 = vpop.permute.xlu0 %1404 }
 0x2f8   : > { %1666 = vmatmul.mubr.bf16.gmra.mxu0 %v2766_v36 }
 0x2f9   : > { %1675 = vmatprep.mubr.bf16.mxu0 %v2768_v62 }
 0x2fb   : > { %v1395_v46 = vpop.permute.xlu0 %1394 }
 0x2fc   : > { %2709 = vmatmul.mubr.msk.bf16.gmra.mxu1 %vm1527_vm15, %v2767_v28 }
 0x2fd   : > { %1748 = vmatprep.mubr.bf16.mxu1 %v5961_v17 }
 0x300   : > { %1676 = vmatmul.mubr.bf16.gmra.mxu0 %v2770_v38 }
 0x304   : > { %2710 = vmatmul.mubr.msk.bf16.gmra.mxu1 %vm1527_vm15, %v2771_v5 }
 0x38c   : > { %v1574_v51 = vpop.f32.mrf.mxu1 }
 0x38d   : > { %v1575_v11 = vadd.f32 %v1574_v51, %v1390_v61 }
 0x38e   : > { %v1576_v35 = vpop.f32.mrf.mxu1 }
 0x38f   : > { %v1577_v27 = vadd.f32 %v1576_v35, %v1390_v61 }
 0x390   : > { %v1578_v7 = vpop.f32.mrf.mxu1 }
 0x391   : > { %v1579_v58 = vadd.f32 %v1578_v7, %v1395_v46 }
 0x392   : > { %v1580_v16 = vpop.f32.mrf.mxu1 }
 0x393   : > { %v1581_v38 = vadd.f32 %v1580_v16, %v1395_v46 }
 0x394   : > { %v4378_v63 = vpop.f32.mrf.mxu1 }
 0x396   : > { %v4382_v10 = vpop.f32.mrf.mxu1 }
 0x398   : > { %v4384_v53 = vpop.f32.mrf.mxu1 }
 0x39a   : > { %v4386_v4 = vpop.f32.mrf.mxu1 }
 0x39c   : > { %v4392_v39 = vpop.f32.mrf.mxu1 }
 0x39e   : > { %v4394_v1 = vpop.f32.mrf.mxu1 }
 0x3a0   : > { %v4396_v0 = vpop.f32.mrf.mxu1 }
 0x3a2   : > { %v4402_v37 = vpop.f32.mrf.mxu1 }
 0x3a4   : > { %v4404_v42 = vpop.f32.mrf.mxu1 }
 0x3a6   : > { %v4406_v30 = vpop.f32.mrf.mxu1 }
 0x3a8   : > { %v4410_v52 = vpop.f32.mrf.mxu1  ;;  %v1647_v59 = vpop.f32.mrf.mxu0 }
 0x3a9   : > { %v1648_v40 = vadd.f32 %v1647_v59, %v1575_v11 }
 0x3aa   : > { %v4412_v22 = vpop.f32.mrf.mxu1  ;;  %v1649_v31 = vpop.f32.mrf.mxu0 }
 0x3ab   : > { %v1650_v36 = vadd.f32 %v1649_v31, %v1577_v27  ;;  %v1587_v27 = vadd.f32 %v4382_v10, %v4398_v15  ;;  %v1611_v43 = vadd.f32 %v4412_v22, %v4390_v2 }
 0x3ac   : > { %v1720_v47 = vpop.f32.mrf.mxu1  ;;  %v1651_v57 = vpop.f32.mrf.mxu0 }
 0x3ad   : > { %v1721_v19 = vadd.f32 %v1720_v47, %v1648_v40  ;;  %v1652_v54 = vadd.f32 %v1651_v57, %v1579_v58  ;;  %v1585_v40 = vadd.f32 %v4378_v63, %v4398_v15 }
 0x3ae   : > { %v1722_v34 = vpop.f32.mrf.mxu1  ;;  %v1653_v62 = vpop.f32.mrf.mxu0 }
 0x3af   : > { %vm1759_vm5 = vcmp.ge.f32.partialorder %v1721_v19, 0.0  ;;  %v1775_v6 = vmul.f32 0.2, %v1721_v19  ;;  %v1723_v28 = vadd.f32 %v1722_v34, %v1650_v36  ;;  %v1654_v51 = vadd.f32 %v1653_v62, %v1581_v38 }
 0x3b0   : > { %v1724_v21 = vpop.f32.mrf.mxu1  ;;  %v1657_v59 = vpop.f32.mrf.mxu0  ;;  %v1589_v34 = vadd.f32 %v4384_v53, %v4408_v32  ;;  %v1591_v38 = vadd.f32 %v4386_v4, %v4408_v32 }
 0x3b1   : > { %v4414_v45 = vsel %vm1759_vm5, %v1721_v19, %v1775_v6  ;;  %v1725_v48 = vadd.f32 %v1724_v21, %v1652_v54  ;;  %v1776_v7 = vmul.f32 0.2, %v1723_v28  ;;  %vm1760_vm12 = vcmp.ge.f32.partialorder %v1723_v28, 0.0 }
 0x3b2   : > { %5962 = vst [vmem:[#allocation65_spill] sm:$0xff] %v4414_v45  ;;  %1874 = vrot.lane.b32.xlu1 %v4414_v45, %s2785_s19  ;;  %v1726_v5 = vpop.f32.mrf.mxu1  ;;  %v1659_v47 = vpop.f32.mrf.mxu0  ;;  %v1658_v46 = vadd.f32 %v1657_v59, %v1585_v40  ;;  %v1595_v59 = vadd.f32 %v4392_v39, %v4388_v56 }
 0x3b3   : > { %vm1761_vm11 = vcmp.ge.f32.partialorder %v1725_v48, 0.0  ;;  %v1777_v29 = vmul.f32 0.2, %v1725_v48  ;;  %v1727_v35 = vadd.f32 %v1726_v5, %v1654_v51  ;;  %v4440_v61 = vsel %vm1760_vm12, %v1723_v28, %v1776_v7 }
 0x3b4   : > { %5964 = vst [vmem:[#allocation59_spill] sm:$0xff] %v4440_v61  ;;  %v1730_v31 = vpop.f32.mrf.mxu1  ;;  %v1661_v19 = vpop.f32.mrf.mxu0  ;;  %v1660_v36 = vadd.f32 %v1659_v47, %v1587_v27 }
 0x3b5   : > { %v4418_v18 = vsel %vm1761_vm11, %v1725_v48, %v1777_v29  ;;  %v1778_v16 = vmul.f32 0.2, %v1727_v35  ;;  %vm1762_vm13 = vcmp.ge.f32.partialorder %v1727_v35, 0.0  ;;  %v1731_v58 = vadd.f32 %v1730_v31, %v1658_v46 }
 0x3b6   : > { %5963 = vst [vmem:[#allocation3_spill] sm:$0xff] %v4418_v18  ;;  %1810 = vrot.lane.b32.xlu1 %v4414_v45, %s2788_s21  ;;  %1876 = vrot.lane.b32.xlu0 %v4418_v18, %s2785_s19  ;;  %v1732_v57 = vpop.f32.mrf.mxu1  ;;  %v1662_v63 = vadd.f32 %v1661_v19, %v1589_v34  ;;  %v1663_v62 = vpop.f32.mrf.mxu0  ;;  %v1599_v19 = vadd.f32 %v4396_v0, %v4400_v44 }
 0x3b7   : > { %v4446_v11 = vsel %vm1762_vm13, %v1727_v35, %v1778_v16  ;;  %v1779_v54 = vmul.f32 0.2, %v1731_v58  ;;  %vm1763_vm14 = vcmp.ge.f32.partialorder %v1731_v58, 0.0  ;;  %v1733_v28 = vadd.f32 %v1732_v57, %v1660_v36 }
 0x3b8   : > { %5965 = vst [vmem:[#allocation54_spill] sm:$0xff] %v4446_v11  ;;  %v1734_v6 = vpop.f32.mrf.mxu1  ;;  %v1664_v10 = vadd.f32 %v1663_v62, %v1591_v38  ;;  %v1667_v35 = vpop.f32.mrf.mxu0  ;;  %v1601_v62 = vadd.f32 %v4402_v37, %v4400_v44 }
 0x3b9   : > { %v1735_v21 = vadd.f32 %v1734_v6, %v1662_v63  ;;  %v4468_v48 = vsel %vm1763_vm14, %v1731_v58, %v1779_v54  ;;  %v1780_v15 = vmul.f32 0.2, %v1733_v28  ;;  %vm1764_vm11 = vcmp.ge.f32.partialorder %v1733_v28, 0.0 }
 0x3ba   : > { %2066 = vrot.lane.b32.xlu1 %v4414_v45, %s2781_s15  ;;  %1812 = vrot.lane.b32.xlu0 %v4418_v18, %s2788_s21  ;;  %5966 = vst [vmem:[#allocation64_spill] sm:$0xff] %v4468_v48  ;;  %v1736_v5 = vpop.f32.mrf.mxu1  ;;  %v1669_v31 = vpop.f32.mrf.mxu0  ;;  %v1668_v40 = vadd.f32 %v1667_v35, %v1595_v59 }
 0x3bb   : > { %v1781_v53 = vmul.f32 0.2, %v1735_v21  ;;  %vm1765_vm5 = vcmp.ge.f32.partialorder %v1735_v21, 0.0  ;;  %v1737_v51 = vadd.f32 %v1736_v5, %v1664_v10  ;;  %v4500_v7 = vsel %vm1764_vm11, %v1733_v28, %v1780_v15 }
 0x3bc   : > { %5968 = vst [vmem:[#allocation67_spill] sm:$0xff] %v4500_v7  ;;  %v1740_v16 = vpop.f32.mrf.mxu1  ;;  %v1671_v46 = vpop.f32.mrf.mxu0 }
 0x3bd   : > { %v4474_v29 = vsel %vm1765_vm5, %v1735_v21, %v1781_v53  ;;  %v1782_v4 = vmul.f32 0.2, %v1737_v51  ;;  %vm1766_vm12 = vcmp.ge.f32.partialorder %v1737_v51, 0.0  ;;  %v1741_v57 = vadd.f32 %v1740_v16, %v1668_v40 }
 0x3be   : > { %2002 = vrot.lane.b32.xlu1 %v4414_v45, %s2786_s20  ;;  %2068 = vrot.lane.b32.xlu0 %v4418_v18, %s2781_s15  ;;  %5967 = vst [vmem:[#allocation15_spill] sm:$0xff] %v4474_v29  ;;  %v1742_v47 = vpop.f32.mrf.mxu1  ;;  %v1672_v39 = vadd.f32 %v1671_v46, %v1599_v19  ;;  %v1597_v21 = vadd.f32 %v4394_v1, %v4388_v56  ;;  %v1673_v27 = vpop.f32.mrf.mxu0 }
 0x3bf   : > { %v4506_v32 = vsel %vm1766_vm12, %v1737_v51, %v1782_v4  ;;  %v1783_v34 = vmul.f32 0.2, %v1741_v57  ;;  %vm1767_vm13 = vcmp.ge.f32.partialorder %v1741_v57, 0.0  ;;  %v1674_v56 = vadd.f32 %v1673_v27, %v1601_v62 }
 0x3c0   : > { %5969 = vst [vmem:[#allocation14_spill] sm:$0xff] %v4506_v32  ;;  %v1744_v58 = vpop.f32.mrf.mxu1  ;;  %v1670_v53 = vadd.f32 %v1669_v31, %v1597_v21  ;;  %v1677_v35 = vpop.f32.mrf.mxu0  ;;  %v1605_v40 = vadd.f32 %v4404_v42, %v4380_v33  ;;  %v1609_v42 = vadd.f32 %v4410_v52, %v4390_v2 }
 0x3c1   : > { %v1745_v6 = vadd.f32 %v1744_v58, %v1672_v39  ;;  %v4532_v63 = vsel %vm1767_vm13, %v1741_v57, %v1783_v34 }
 0x3c2   : > { %1938 = vrot.lane.b32.xlu1 %v4414_v45, %s2789_s22  ;;  %2004 = vrot.lane.b32.xlu0 %v4418_v18, %s2786_s20  ;;  %5970 = vst [vmem:[#allocation50_spill] sm:$0xff] %v4532_v63  ;;  %v1743_v36 = vadd.f32 %v1742_v47, %v1670_v53  ;;  %v1746_v28 = vpop.f32.mrf.mxu1  ;;  %v1679_v47 = vpop.f32.mrf.mxu0  ;;  %v1678_v57 = vadd.f32 %v1677_v35, %v1605_v40 }
 0x3c3   : > { %v1785_v0 = vmul.f32 0.2, %v1745_v6  ;;  %vm1769_vm14 = vcmp.ge.f32.partialorder %v1745_v6, 0.0  ;;  %v1747_v38 = vadd.f32 %v1746_v28, %v1674_v56 }
 0x3c4   : > { %v1784_v1 = vmul.f32 0.2, %v1743_v36  ;;  %vm1768_vm5 = vcmp.ge.f32.partialorder %v1743_v36, 0.0  ;;  %v1750_v59 = vpop.f32.mrf.mxu1  ;;  %v1681_v39 = vpop.f32.mrf.mxu0 }
 0x3c5   : > { %v4538_v54 = vsel %vm1769_vm14, %v1745_v6, %v1785_v0  ;;  %v1786_v37 = vmul.f32 0.2, %v1747_v38  ;;  %vm1770_vm11 = vcmp.ge.f32.partialorder %v1747_v38, 0.0  ;;  %v1751_v34 = vadd.f32 %v1750_v59, %v1678_v57 }
 0x3c6   : > { %2194 = vrot.lane.b32.xlu1 %v4414_v45, %s2783_s17  ;;  %1940 = vrot.lane.b32.xlu0 %v4418_v18, %s2789_s22  ;;  %5971 = vst [vmem:[#allocation44_spill] sm:$0xff] %v4538_v54  ;;  %v4566_v44 = vsel %vm1768_vm5, %v1743_v36, %v1784_v1  ;;  %v1752_v19 = vpop.f32.mrf.mxu1  ;;  %v1682_v21 = vadd.f32 %v1681_v39, %v1609_v42 }
 0x3c7   : > { %5972 = vst [vmem:[#allocation48_spill] sm:$0xff] %v4566_v44  ;;  %v4576_v51 = vsel %vm1770_vm11, %v1747_v38, %v1786_v37  ;;  %v1787_v27 = vmul.f32 0.2, %v1751_v34  ;;  %vm1771_vm12 = vcmp.ge.f32.partialorder %v1751_v34, 0.0  ;;  %v1607_v42 = vadd.f32 %v4406_v30, %v4380_v33 }
 0x3c8   : > { %5973 = vst [vmem:[#allocation42_spill] sm:$0xff] %v4576_v51  ;;  %v1754_v0 = vpop.f32.mrf.mxu1 }
 0x3c9   : > { %v1755_v62 = vadd.f32 %v1754_v0, %v1682_v21  ;;  %v4620_v28 = vsel %vm1771_vm12, %v1751_v34, %v1787_v27  ;;  %v1680_v21 = vadd.f32 %v1679_v47, %v1607_v42 }
 0x3ca   : > { %1890 = vrot.lane.b32.xlu1 %v4440_v61, %s2785_s19  ;;  %2196 = vrot.lane.b32.xlu0 %v4418_v18, %s2783_s17  ;;  %5980 = vst [vmem:[#allocation66_spill] sm:$0xff] %v4620_v28  ;;  %v1756_v33 = vpop.f32.mrf.mxu1 }
 0x3cb   : > { %v1789_v1 = vmul.f32 0.2, %v1755_v62  ;;  %vm1773_vm13 = vcmp.ge.f32.partialorder %v1755_v62, 0.0 }
 0x3cd   : > { %v4632_v35 = vsel %vm1773_vm13, %v1755_v62, %v1789_v1  ;;  %v1683_v62 = vpop.f32.mrf.mxu0  ;;  %v1753_v1 = vadd.f32 %v1752_v19, %v1680_v21 }
 0x3ce   : > { %1826 = vrot.lane.b32.xlu1 %v4440_v61, %s2788_s21  ;;  %1892 = vrot.lane.b32.xlu0 %v4446_v11, %s2785_s19  ;;  %5981 = vst [vmem:[#allocation30_spill] sm:$0xff] %v4632_v35  ;;  %v1684_v30 = vadd.f32 %v1683_v62, %v1611_v43 }
 0x3cf   : > { %v1788_v42 = vmul.f32 0.2, %v1753_v1  ;;  %vm1772_vm14 = vcmp.ge.f32.partialorder %v1753_v1, 0.0 }
 0x3d0   : > { %v1757_v24 = vadd.f32 %v1756_v33, %v1684_v30 }
 0x3d1   : > { %v4676_v22 = vsel %vm1772_vm14, %v1753_v1, %v1788_v42 }
 0x3d2   : > { %2082 = vrot.lane.b32.xlu1 %v4440_v61, %s2781_s15  ;;  %1828 = vrot.lane.b32.xlu0 %v4446_v11, %s2788_s21  ;;  %5988 = vst [vmem:[#allocation52_spill] sm:$0xff] %v4676_v22  ;;  %v1790_v21 = vmul.f32 0.2, %v1757_v24  ;;  %vm1774_vm5 = vcmp.ge.f32.partialorder %v1757_v24, 0.0 }
 0x3d4   : > { %v4682_v33 = vsel %vm1774_vm5, %v1757_v24, %v1790_v21 }
 0x3d5   : > { %5989 = vst [vmem:[#allocation46_spill] sm:$0xff] %v4682_v33 }
 0x3d6   : > { %2018 = vrot.lane.b32.xlu1 %v4440_v61, %s2786_s20  ;;  %2084 = vrot.lane.b32.xlu0 %v4446_v11, %s2781_s15 }
 0x3da   : > { %1954 = vrot.lane.b32.xlu1 %v4440_v61, %s2789_s22  ;;  %2020 = vrot.lane.b32.xlu0 %v4446_v11, %s2786_s20 }
 0x3de   : > { %1878 = vrot.lane.b32.xlu1 %v4468_v48, %s2785_s19  ;;  %1956 = vrot.lane.b32.xlu0 %v4446_v11, %s2789_s22 }
 0x3e2   : > { %1814 = vrot.lane.b32.xlu1 %v4468_v48, %s2788_s21  ;;  %1880 = vrot.lane.b32.xlu0 %v4474_v29, %s2785_s19 }
 0x3e6   : > { %2070 = vrot.lane.b32.xlu1 %v4468_v48, %s2781_s15  ;;  %1816 = vrot.lane.b32.xlu0 %v4474_v29, %s2788_s21 }
 0x3ea   : > { %2006 = vrot.lane.b32.xlu1 %v4468_v48, %s2786_s20  ;;  %2072 = vrot.lane.b32.xlu0 %v4474_v29, %s2781_s15 }
 0x3ee   : > { %1942 = vrot.lane.b32.xlu1 %v4468_v48, %s2789_s22  ;;  %2008 = vrot.lane.b32.xlu0 %v4474_v29, %s2786_s20 }
 0x3f2   : > { %2198 = vrot.lane.b32.xlu1 %v4468_v48, %s2783_s17  ;;  %1944 = vrot.lane.b32.xlu0 %v4474_v29, %s2789_s22 }
 0x3f6   : > { %1894 = vrot.lane.b32.xlu1 %v4500_v7, %s2785_s19  ;;  %2200 = vrot.lane.b32.xlu0 %v4474_v29, %s2783_s17 }
 0x3fa   : > { %1830 = vrot.lane.b32.xlu1 %v4500_v7, %s2788_s21  ;;  %1896 = vrot.lane.b32.xlu0 %v4506_v32, %s2785_s19 }
 0x3fe   : > { %2086 = vrot.lane.b32.xlu1 %v4500_v7, %s2781_s15  ;;  %1832 = vrot.lane.b32.xlu0 %v4506_v32, %s2788_s21 }
 0x402   : > { %2022 = vrot.lane.b32.xlu1 %v4500_v7, %s2786_s20  ;;  %2088 = vrot.lane.b32.xlu0 %v4506_v32, %s2781_s15 }
 0x406   : > { %1958 = vrot.lane.b32.xlu1 %v4500_v7, %s2789_s22  ;;  %2024 = vrot.lane.b32.xlu0 %v4506_v32, %s2786_s20 }
 0x40a   : > { %2214 = vrot.lane.b32.xlu1 %v4500_v7, %s2783_s17  ;;  %1960 = vrot.lane.b32.xlu0 %v4506_v32, %s2789_s22 }
 0x40e   : > { %1882 = vrot.lane.b32.xlu1 %v4532_v63, %s2785_s19  ;;  %2216 = vrot.lane.b32.xlu0 %v4506_v32, %s2783_s17 }
 0x412   : > { %1818 = vrot.lane.b32.xlu1 %v4532_v63, %s2788_s21  ;;  %1884 = vrot.lane.b32.xlu0 %v4538_v54, %s2785_s19 }
 0x416   : > { %2074 = vrot.lane.b32.xlu1 %v4532_v63, %s2781_s15  ;;  %1820 = vrot.lane.b32.xlu0 %v4538_v54, %s2788_s21 }
 0x41a   : > { %2010 = vrot.lane.b32.xlu1 %v4532_v63, %s2786_s20  ;;  %2076 = vrot.lane.b32.xlu0 %v4538_v54, %s2781_s15 }
 0x41e   : > { %1946 = vrot.lane.b32.xlu1 %v4532_v63, %s2789_s22  ;;  %2012 = vrot.lane.b32.xlu0 %v4538_v54, %s2786_s20 }
 0x422   : > { %2202 = vrot.lane.b32.xlu1 %v4532_v63, %s2783_s17  ;;  %1948 = vrot.lane.b32.xlu0 %v4538_v54, %s2789_s22 }
 0x424   : > { %v4564_v5 = vpop.permute.xlu1 %1874 }
 0x426   : > { %1898 = vrot.lane.b32.xlu1 %v4566_v44, %s2785_s19  ;;  %2204 = vrot.lane.b32.xlu0 %v4538_v54, %s2783_s17 }
 0x428   : > { %v4572_v10 = vpop.permute.xlu1 %1810  ;;  %v4574_v15 = vpop.permute.xlu0 %1876 }
 0x42a   : > { %1834 = vrot.lane.b32.xlu1 %v4566_v44, %s2788_s21  ;;  %1900 = vrot.lane.b32.xlu0 %v4576_v51, %s2785_s19 }
 0x42c   : > { %v4582_v4 = vpop.permute.xlu1 %2066  ;;  %v4584_v16 = vpop.permute.xlu0 %1812 }
 0x42d   : > { %5974 = vst [vmem:[#allocation38_spill] sm:$0xff] %v4582_v4 }
 0x42e   : > { %2090 = vrot.lane.b32.xlu1 %v4566_v44, %s2781_s15  ;;  %1836 = vrot.lane.b32.xlu0 %v4576_v51, %s2788_s21 }
 0x430   : > { %v4590_v31 = vpop.permute.xlu1 %2002  ;;  %v4594_v46 = vpop.permute.xlu0 %2068 }
 0x431   : > { %5975 = vst [vmem:[#allocation33_spill] sm:$0xff] %v4590_v31  ;;  %5976 = vst [vmem:[#allocation62_spill] sm:$0xff] %v4594_v46 }
 0x432   : > { %2026 = vrot.lane.b32.xlu1 %v4566_v44, %s2786_s20  ;;  %2092 = vrot.lane.b32.xlu0 %v4576_v51, %s2781_s15 }
 0x434   : > { %v4600_v58 = vpop.permute.xlu1 %1938  ;;  %v4602_v6 = vpop.permute.xlu0 %2004 }
 0x435   : > { %5977 = vst [vmem:[#allocation57_spill] sm:$0xff] %v4600_v58  ;;  %5978 = vst [vmem:[#allocation40_spill] sm:$0xff] %v4602_v6 }
 0x436   : > { %1962 = vrot.lane.b32.xlu1 %v4566_v44, %s2789_s22  ;;  %2028 = vrot.lane.b32.xlu0 %v4576_v51, %s2786_s20 }
 0x438   : > { %v4610_v53 = vpop.permute.xlu1 %2194  ;;  %v4612_v36 = vpop.permute.xlu0 %1940 }
 0x439   : > { %5979 = vst [vmem:[#allocation41_spill] sm:$0xff] %v4612_v36 }
 0x43a   : > { %2218 = vrot.lane.b32.xlu1 %v4566_v44, %s2783_s17  ;;  %1964 = vrot.lane.b32.xlu0 %v4576_v51, %s2789_s22 }
 0x43c   : > { %v4618_v52 = vpop.permute.xlu1 %1890  ;;  %v4622_v56 = vpop.permute.xlu0 %2196 }
 0x43e   : > { %1886 = vrot.lane.b32.xlu1 %v4620_v28, %s2785_s19  ;;  %2220 = vrot.lane.b32.xlu0 %v4576_v51, %s2783_s17 }
 0x440   : > { %v4628_v38 = vpop.permute.xlu1 %1826  ;;  %v4630_v37 = vpop.permute.xlu0 %1892 }
 0x442   : > { %1822 = vrot.lane.b32.xlu1 %v4620_v28, %s2788_s21  ;;  %1888 = vrot.lane.b32.xlu0 %v4632_v35, %s2785_s19 }
 0x444   : > { %v4638_v59 = vpop.permute.xlu1 %2082  ;;  %v4640_v40 = vpop.permute.xlu0 %1828 }
 0x445   : > { %5982 = vst [vmem:[#allocation31_spill] sm:$0xff] %v4638_v59 }
 0x446   : > { %2078 = vrot.lane.b32.xlu1 %v4620_v28, %s2781_s15  ;;  %1824 = vrot.lane.b32.xlu0 %v4632_v35, %s2788_s21 }
 0x448   : > { %v4646_v57 = vpop.permute.xlu1 %2018  ;;  %v4648_v39 = vpop.permute.xlu0 %2084 }
 0x449   : > { %5983 = vst [vmem:[#allocation60_spill] sm:$0xff] %v4646_v57  ;;  %5984 = vst [vmem:[#allocation55_spill] sm:$0xff] %v4648_v39 }
 0x44a   : > { %2014 = vrot.lane.b32.xlu1 %v4620_v28, %s2786_s20  ;;  %2080 = vrot.lane.b32.xlu0 %v4632_v35, %s2781_s15 }
 0x44c   : > { %v4654_v34 = vpop.permute.xlu1 %1954  ;;  %v4658_v0 = vpop.permute.xlu0 %2020 }
 0x44d   : > { %5985 = vst [vmem:[#allocation35_spill] sm:$0xff] %v4654_v34  ;;  %5986 = vst [vmem:[#allocation36_spill] sm:$0xff] %v4658_v0 }
 0x44e   : > { %1950 = vrot.lane.b32.xlu1 %v4620_v28, %s2789_s22  ;;  %2016 = vrot.lane.b32.xlu0 %v4632_v35, %s2786_s20 }
 0x450   : > { %v1879_v27 = vpop.permute.xlu1 %1878  ;;  %v4664_v17 = vpop.permute.xlu0 %1956 }
 0x451   : > { %5987 = vst [vmem:[#allocation69_spill] sm:$0xff] %v4664_v17 }
 0x452   : > { %2206 = vrot.lane.b32.xlu1 %v4620_v28, %s2783_s17  ;;  %1952 = vrot.lane.b32.xlu0 %v4632_v35, %s2789_s22 }
 0x454   : > { %v1815_v47 = vpop.permute.xlu1 %1814  ;;  %v1881_v12 = vpop.permute.xlu0 %1880 }
 0x456   : > { %2270 = vrot.lane.b32.xlu1 %v4620_v28, %s2782_s16  ;;  %2208 = vrot.lane.b32.xlu0 %v4632_v35, %s2783_s17 }
 0x458   : > { %v2071_v2 = vpop.permute.xlu1 %2070  ;;  %v1817_v19 = vpop.permute.xlu0 %1816 }
 0x45a   : > { %1902 = vrot.lane.b32.xlu1 %v4676_v22, %s2785_s19  ;;  %2272 = vrot.lane.b32.xlu0 %v4632_v35, %s2782_s16 }
 0x45c   : > { %v2007_v43 = vpop.permute.xlu1 %2006  ;;  %v2073_v62 = vpop.permute.xlu0 %2072 }
 0x45e   : > { %2210 = vrot.lane.b32.xlu1 %v4440_v61, %s2783_s17  ;;  %1904 = vrot.lane.b32.xlu0 %v4682_v33, %s2785_s19 }
 0x460   : > { %v4688_v1 = vpop.permute.xlu1 %1942  ;;  %v2009_v30 = vpop.permute.xlu0 %2008 }
 0x462   : > { %1838 = vrot.lane.b32.xlu1 %v4676_v22, %s2788_s21  ;;  %2212 = vrot.lane.b32.xlu0 %v4446_v11, %s2783_s17 }
 0x464   : > { %v4694_v42 = vpop.permute.xlu1 %2198  ;;  %v4696_v55 = vpop.permute.xlu0 %1944 }
 0x466   : > { %2094 = vrot.lane.b32.xlu1 %v4676_v22, %s2781_s15  ;;  %2268 = vrot.lane.b32.xlu0 %v4538_v54, %s2782_s16 }
 0x468   : > { %v1895_v24 = vpop.permute.xlu1 %1894  ;;  %v4702_v21 = vpop.permute.xlu0 %2200 }
 0x469   : > { %v1908_v58 = vsel %vm365_vm6, %v1879_v27, %v1895_v24  ;;  %v1916_v34 = vsel %vm365_vm6, %v1895_v24, %v1879_v27 }
 0x46a   : > { %2030 = vrot.lane.b32.xlu1 %v4676_v22, %s2786_s20  ;;  %2284 = vrot.lane.b32.xlu0 %v4576_v51, %s2782_s16  ;;  %v4719_v6 = vmul.f32 %v1916_v34, %v3026_v8  ;;  %v4722_v0 = vmul.f32 %v1908_v58, %v3029_v9 }
 0x46c   : > { %v1831_v36 = vpop.permute.xlu1 %1830  ;;  %v1897_v17 = vpop.permute.xlu0 %1896 }
 0x46d   : > { %v1909_v31 = vsel %vm365_vm6, %v1881_v12, %v1897_v17  ;;  %v1917_v57 = vsel %vm365_vm6, %v1897_v17, %v1881_v12  ;;  %v1844_v12 = vsel %vm344_vm8, %v1815_v47, %v1831_v36  ;;  %v1852_v17 = vsel %vm344_vm8, %v1831_v36, %v1815_v47 }
 0x46e   : > { %1966 = vrot.lane.b32.xlu1 %v4676_v22, %s2789_s22  ;;  %v4725_v59 = vmul.f32 %v1917_v57, %v3026_v8  ;;  %v4728_v27 = vmul.f32 %v1909_v31, %v3029_v9  ;;  %1840 = vrot.lane.b32.xlu0 %v4682_v33, %s2788_s21  ;;  %v4747_v39 = vmul.f32 %v1852_v17, %v3053_v25 }
 0x46f   : > { %v4750_v36 = vmul.f32 %v1844_v12, %v3056_v26 }
 0x470   : > { %v2087_v34 = vpop.permute.xlu1 %2086  ;;  %v1833_v24 = vpop.permute.xlu0 %1832  ;;  %5990 = vst [vmem:[#allocation28_spill] sm:$0xff] %v4747_v39 }
 0x471   : > { %v1845_v31 = vsel %vm344_vm8, %v1817_v19, %v1833_v24  ;;  %v1853_v4 = vsel %vm344_vm8, %v1833_v24, %v1817_v19  ;;  %v2100_v19 = vsel %vm431_vm0, %v2071_v2, %v2087_v34  ;;  %v2108_v24 = vsel %vm431_vm0, %v2087_v34, %v2071_v2 }
 0x472   : > { %2222 = vrot.lane.b32.xlu1 %v4676_v22, %s2783_s17  ;;  %v4753_v47 = vmul.f32 %v1853_v4, %v3053_v25  ;;  %v4756_v58 = vmul.f32 %v1845_v31, %v3056_v26  ;;  %2144 = vrot.lane.b32.xlu0 %v4632_v35, %s2784_s18  ;;  %v4775_v46 = vmul.f32 %v2100_v19, %v5899_v14 }
 0x473   : > { %v4778_v2 = vmul.f32 %v2108_v24, %v2946_v23 }
 0x474   : > { %5991 = vst [vmem:[#allocation29_spill] sm:$0xff] %v4753_v47  ;;  %v2023_v17 = vpop.permute.xlu1 %2022  ;;  %v2089_v57 = vpop.permute.xlu0 %2088  ;;  %5992 = vst [vmem:[#allocation20_spill] sm:$0xff] %v4775_v46 }
 0x475   : > { %v2101_v31 = vsel %vm431_vm0, %v2073_v62, %v2089_v57  ;;  %v2109_v35 = vsel %vm431_vm0, %v2089_v57, %v2073_v62  ;;  %5993 = vst [vmem:[#allocation21_spill] sm:$0xff] %v4778_v2  ;;  %v2036_v62 = vsel %vm409_vm7, %v2007_v43, %v2023_v17  ;;  %v2044_v57 = vsel %vm409_vm7, %v2023_v17, %v2007_v43 }
 0x476   : > { %2286 = vrot.lane.b32.xlu1 %v4676_v22, %s2782_s16  ;;  %v4781_v34 = vmul.f32 %v2101_v31, %v5899_v14  ;;  %v4784_v12 = vmul.f32 %v2109_v35, %v2946_v23  ;;  %2096 = vrot.lane.b32.xlu0 %v4682_v33, %s2781_s15  ;;  %v4803_v47 = vmul.f32 %v2044_v57, %v5905_v49 }
 0x477   : > { %v4806_v43 = vmul.f32 %v2036_v62, %v5903_v50 }
 0x478   : > { %5994 = vst [vmem:[#allocation39_spill] sm:$0xff] %v4781_v34  ;;  %5995 = vst [vmem:[#allocation34_spill] sm:$0xff] %v4784_v12  ;;  %v1959_v19 = vpop.permute.xlu1 %1958  ;;  %v2025_v4 = vpop.permute.xlu0 %2024 }
 0x479   : > { %v2037_v35 = vsel %vm409_vm7, %v2009_v30, %v2025_v4  ;;  %v2045_v39 = vsel %vm409_vm7, %v2025_v4, %v2009_v30  ;;  %5996 = vst [vmem:[#allocation49_spill] sm:$0xff] %v4803_v47  ;;  %5997 = vst [vmem:[#allocation43_spill] sm:$0xff] %v4806_v43  ;;  %v1972_v30 = vsel %vm387_vm9, %v4688_v1, %v1959_v19 }
 0x47a   : > { %2266 = vrot.lane.b32.xlu1 %v4532_v63, %s2782_s16  ;;  %v4809_v17 = vmul.f32 %v2045_v39, %v5905_v49  ;;  %v4812_v24 = vmul.f32 %v2037_v35, %v5903_v50  ;;  %2264 = vrot.lane.b32.xlu0 %v4474_v29, %s2782_s16  ;;  %v1980_v4 = vsel %vm387_vm9, %v1959_v19, %v4688_v1 }
 0x47b   : > { %v4841_v62 = vmul.f32 %v1980_v4, %v5925_v41  ;;  %v4844_v47 = vmul.f32 %v1972_v30, %v5923_v3 }
 0x47c   : > { %5998 = vst [vmem:[#allocation37_spill] sm:$0xff] %v4809_v17  ;;  %5999 = vst [vmem:[#allocation32_spill] sm:$0xff] %v4812_v24  ;;  %v2215_v57 = vpop.permute.xlu1 %2214  ;;  %v1961_v39 = vpop.permute.xlu0 %1960 }
 0x47d   : > { %v2228_v35 = vsel %vm475_vm1, %v4694_v42, %v2215_v57  ;;  %v2236_v31 = vsel %vm475_vm1, %v2215_v57, %v4694_v42  ;;  %v1973_v1 = vsel %vm387_vm9, %v4696_v55, %v1961_v39  ;;  %v1981_v19 = vsel %vm387_vm9, %v1961_v39, %v4696_v55  ;;  %6000 = vst [vmem:[#allocation26_spill] sm:$0xff] %v4841_v62 }
 0x47e   : > { %2282 = vrot.lane.b32.xlu1 %v4566_v44, %s2782_s16  ;;  %6001 = vst [vmem:[#allocation27_spill] sm:$0xff] %v4844_v47  ;;  %v4847_v42 = vmul.f32 %v1981_v19, %v5925_v41  ;;  %v4850_v57 = vmul.f32 %v1973_v1, %v5923_v3  ;;  %2032 = vrot.lane.b32.xlu0 %v4682_v33, %s2786_s20  ;;  %v6008_v47 = vld [vmem:[#allocation2_spill] sm:$0xff] }
 0x47f   : > { %v4867_v19 = vmul.f32 %v2228_v35, %v5951_v20  ;;  %v4870_v55 = vmul.f32 %v2236_v31, %v5949_v60 }
 0x480   : > { %6002 = vst [vmem:[#allocation24_spill] sm:$0xff] %v4847_v42  ;;  %6003 = vst [vmem:[#allocation25_spill] sm:$0xff] %v4850_v57  ;;  %v1883_v46 = vpop.permute.xlu1 %1882  ;;  %v2217_v39 = vpop.permute.xlu0 %2216 }
 0x481   : > { %v2229_v30 = vsel %vm475_vm1, %v4702_v21, %v2217_v39  ;;  %v2237_v1 = vsel %vm475_vm1, %v2217_v39, %v4702_v21  ;;  %6004 = vst [vmem:[#allocation22_spill] sm:$0xff] %v4867_v19  ;;  %6005 = vst [vmem:[#allocation23_spill] sm:$0xff] %v4870_v55  ;;  %v2790_v19 = vmov 1983009808  }
 0x482   : > { %2142 = vrot.lane.b32.xlu1 %v4620_v28, %s2784_s18  ;;  %v4873_v62 = vmul.f32 %v2229_v30, %v5951_v20  ;;  %v4876_v4 = vmul.f32 %v2237_v1, %v5949_v60  ;;  %2280 = vrot.lane.b32.xlu0 %v4506_v32, %s2782_s16 }
 0x484   : > { %6006 = vst [vmem:[#allocation58_spill] sm:$0xff] %v4873_v62  ;;  %6007 = vst [vmem:[#allocation63_spill] sm:$0xff] %v4876_v4  ;;  %v1819_v42 = vpop.permute.xlu1 %1818  ;;  %v1885_v39 = vpop.permute.xlu0 %1884  ;;  %v2398_v62 = vunpack.c.l.s4 %v2790_v19  ;;  %v4908_v19 = vld [vmem:[%s5672_s7] sm:$0xff] }
 0x486   : > { %2158 = vrot.lane.b32.xlu1 %v4676_v22, %s2784_s18  ;;  %2140 = vrot.lane.b32.xlu0 %v4538_v54, %s2784_s18  ;;  %v2399_v35 = vunpack.c.0.s8 %v2398_v62 }
 0x488   : > { %v2075_v31 = vpop.permute.xlu1 %2074  ;;  %v1821_v30 = vpop.permute.xlu0 %1820  ;;  %v4901_v57 = vsub.s32 %v2399_v35, %v6008_v47 }
 0x48a   : > { %2262 = vrot.lane.b32.xlu1 %v4468_v48, %s2782_s16  ;;  %2156 = vrot.lane.b32.xlu0 %v4576_v51, %s2784_s18  ;;  %v4914_v62 = vrot.slane %v4908_v19, %v4901_v57 }
 0x48c   : > { %v2011_v1 = vpop.permute.xlu1 %2010  ;;  %v2077_v21 = vpop.permute.xlu0 %2076  ;;  %6009 = vst [vmem:[#allocation68_spill] sm:$0xff] %v4914_v62  ;;  %v2411_v47 = vcombine.high %v4914_v62, %v4914_v62 }
 0x48e   : > { %2278 = vrot.lane.b32.xlu1 %v4500_v7, %s2782_s16  ;;  %1968 = vrot.lane.b32.xlu0 %v4682_v33, %s2789_s22 }
 0x48f   : > { %2459 = vmatprep.mubr.bf16.mxu0 %v2411_v47 }
 0x490   : > { %v4896_v55 = vpop.permute.xlu1 %1946  ;;  %v4898_v4 = vpop.permute.xlu0 %2012 }
 0x492   : > { %2138 = vrot.lane.b32.xlu1 %v4532_v63, %s2784_s18  ;;  %2260 = vrot.lane.b32.xlu0 %v4418_v18, %s2782_s16 }
 0x494   : > { %v4916_v54 = vpop.permute.xlu1 %2202  ;;  %v4918_v17 = vpop.permute.xlu0 %1948 }
 0x496   : > { %2154 = vrot.lane.b32.xlu1 %v4566_v44, %s2784_s18  ;;  %2224 = vrot.lane.b32.xlu0 %v4682_v33, %s2783_s17 }
 0x498   : > { %v1899_v35 = vpop.permute.xlu1 %1898  ;;  %v4926_v63 = vpop.permute.xlu0 %2204 }
 0x499   : > { %v1910_v51 = vsel %vm365_vm6, %v1883_v46, %v1899_v35  ;;  %v1918_v62 = vsel %vm365_vm6, %v1899_v35, %v1883_v46 }
 0x49a   : > { %2258 = vrot.lane.b32.xlu1 %v4414_v45, %s2782_s16  ;;  %2276 = vrot.lane.b32.xlu0 %v4446_v11, %s2782_s16  ;;  %v4947_v34 = vmul.f32 %v1918_v62, %v3026_v8  ;;  %v4950_v46 = vmul.f32 %v1910_v51, %v3029_v9 }
 0x49c   : > { %v1835_v44 = vpop.permute.xlu1 %1834  ;;  %v1901_v28 = vpop.permute.xlu0 %1900 }
 0x49d   : > { %v1846_v47 = vsel %vm344_vm8, %v1819_v42, %v1835_v44  ;;  %v1854_v43 = vsel %vm344_vm8, %v1835_v44, %v1819_v42  ;;  %v1911_v24 = vsel %vm365_vm6, %v1885_v39, %v1901_v28  ;;  %v1919_v22 = vsel %vm365_vm6, %v1901_v28, %v1885_v39 }
 0x49e   : > { %2274 = vrot.lane.b32.xlu1 %v4440_v61, %s2782_s16  ;;  %v4953_v35 = vmul.f32 %v1919_v22, %v3026_v8  ;;  %v4956_v44 = vmul.f32 %v1911_v24, %v3029_v9  ;;  %2288 = vrot.lane.b32.xlu0 %v4682_v33, %s2782_s16  ;;  %v4975_v28 = vmul.f32 %v1854_v43, %v3053_v25 }
 0x49f   : > { %v4978_v12 = vmul.f32 %v1846_v47, %v3056_v26 }
 0x4a0   : > { %v2091_v42 = vpop.permute.xlu1 %2090  ;;  %v1837_v39 = vpop.permute.xlu0 %1836 }
 0x4a1   : > { %v2102_v62 = vsel %vm431_vm0, %v2075_v31, %v2091_v42  ;;  %v2110_v51 = vsel %vm431_vm0, %v2091_v42, %v2075_v31  ;;  %v1847_v24 = vsel %vm344_vm8, %v1821_v30, %v1837_v39  ;;  %v1855_v2 = vsel %vm344_vm8, %v1837_v39, %v1821_v30 }
 0x4a2   : > { %2134 = vrot.lane.b32.xlu1 %v4468_v48, %s2784_s18  ;;  %v4981_v31 = vmul.f32 %v1855_v2, %v3053_v25  ;;  %v4984_v42 = vmul.f32 %v1847_v24, %v3056_v26  ;;  %2136 = vrot.lane.b32.xlu0 %v4474_v29, %s2784_s18  ;;  %v5003_v30 = vmul.f32 %v2102_v62, %v5899_v14 }
 0x4a3   : > { %v5006_v48 = vmul.f32 %v2110_v51, %v2946_v23 }
 0x4a4   : > { %v2027_v22 = vpop.permute.xlu1 %2026  ;;  %v2093_v39 = vpop.permute.xlu0 %2092 }
 0x4a5   : > { %v2038_v43 = vsel %vm409_vm7, %v2011_v1, %v2027_v22  ;;  %v2046_v47 = vsel %vm409_vm7, %v2027_v22, %v2011_v1  ;;  %v2103_v24 = vsel %vm431_vm0, %v2077_v21, %v2093_v39  ;;  %v2111_v29 = vsel %vm431_vm0, %v2093_v39, %v2077_v21 }
 0x4a6   : > { %2150 = vrot.lane.b32.xlu1 %v4500_v7, %s2784_s18  ;;  %v5009_v1 = vmul.f32 %v2103_v24, %v5899_v14  ;;  %v5012_v22 = vmul.f32 %v2111_v29, %v2946_v23  ;;  %2160 = vrot.lane.b32.xlu0 %v4682_v33, %s2784_s18  ;;  %v5027_v24 = vmul.f32 %v2046_v47, %v5905_v49 }
 0x4a7   : > { %v5038_v33 = vmul.f32 %v2038_v43, %v5903_v50 }
 0x4a8   : > { %v1963_v2 = vpop.permute.xlu1 %1962  ;;  %v2029_v39 = vpop.permute.xlu0 %2028 }
 0x4a9   : > { %v1974_v62 = vsel %vm387_vm9, %v4896_v55, %v1963_v2  ;;  %v1982_v51 = vsel %vm387_vm9, %v1963_v2, %v4896_v55  ;;  %v2039_v7 = vsel %vm409_vm7, %v4898_v4, %v2029_v39  ;;  %v2047_v21 = vsel %vm409_vm7, %v2029_v39, %v4898_v4 }
 0x4aa   : > { %2130 = vrot.lane.b32.xlu1 %v4414_v45, %s2784_s18  ;;  %v5041_v55 = vmul.f32 %v2047_v21, %v5905_v49  ;;  %v5044_v47 = vmul.f32 %v2039_v7, %v5903_v50  ;;  %2152 = vrot.lane.b32.xlu0 %v4506_v32, %s2784_s18  ;;  %v2396_v2 = vcombine.high %v4908_v19, %v4908_v19 }
 0x4ab   : > { %v5061_v45 = vmul.f32 %v1982_v51, %v5925_v41  ;;  %v5072_v32 = vmul.f32 %v1974_v62, %v5923_v3 }
 0x4ac   : > { %v2219_v29 = vpop.permute.xlu1 %2218  ;;  %v1965_v39 = vpop.permute.xlu0 %1964 }
 0x4ad   : > { %v2230_v43 = vsel %vm475_vm1, %v4916_v54, %v2219_v29  ;;  %v2238_v7 = vsel %vm475_vm1, %v2219_v29, %v4916_v54  ;;  %6010 = vst [vmem:[#allocation56_spill] sm:$0xff] %v5061_v45  ;;  %v1975_v19 = vsel %vm387_vm9, %v4918_v17, %v1965_v39  ;;  %v1983_v4 = vsel %vm387_vm9, %v1965_v39, %v4918_v17  ;;  %v2594_v29 = vld [vmem:[%s5673_s8] sm:$0xf] }
 0x4ae   : > { %2146 = vrot.lane.b32.xlu1 %v4440_v61, %s2784_s18  ;;  %6011 = vst [vmem:[#allocation61_spill] sm:$0xff] %v5072_v32  ;;  %v5075_v54 = vmul.f32 %v1983_v4, %v5925_v41  ;;  %v5078_v51 = vmul.f32 %v1975_v19, %v5923_v3  ;;  %2132 = vrot.lane.b32.xlu0 %v4418_v18, %s2784_s18 }
 0x4af   : > { %v5086_v17 = vrot.slane %v2396_v2, %v4901_v57  ;;  %v5095_v18 = vmul.f32 %v2230_v43, %v5951_v20  ;;  %v5104_v2 = vmul.f32 %v2238_v7, %v5949_v60 }
 0x4b0   : > { %6012 = vst [vmem:[#allocation70_spill] sm:$0xff] %v5075_v54  ;;  %6013 = vst [vmem:[#allocation4_spill] sm:$0xff] %v5078_v51  ;;  %v1887_v39 = vpop.permute.xlu1 %1886  ;;  %v2221_v21 = vpop.permute.xlu0 %2220 }
 0x4b1   : > { %6014 = vst [vmem:[#allocation47_spill] sm:$0xff] %v5086_v17  ;;  %v2412_v19 = vcombine.high %v5086_v17, %v5086_v17  ;;  %6015 = vst [vmem:[#allocation53_spill] sm:$0xff] %v5095_v18  ;;  %v2231_v61 = vsel %vm475_vm1, %v4926_v63, %v2221_v21  ;;  %v2239_v57 = vsel %vm475_vm1, %v2221_v21, %v4926_v63 }
 0x4b2   : > { %2597 = vperm.xlu1 %2738, %v2594_v29   ;;  %6016 = vst [vmem:[#allocation45_spill] sm:$0xff] %v5104_v2  ;;  %v5107_v62 = vmul.f32 %v2231_v61, %v5951_v20  ;;  %v5110_v4 = vmul.f32 %v2239_v57, %v5949_v60  ;;  %2148 = vrot.lane.b32.xlu0 %v4446_v11, %s2784_s18 }
 0x4b3   : > { %2500 = vmatprep.mubr.bf16.mxu1 %v2412_v19 }
 0x4b4   : > { %6017 = vst [vmem:[#allocation51_spill] sm:$0xff] %v5107_v62  ;;  %6018 = vst [vmem:[#allocation71_spill] sm:$0xff] %v5110_v4  ;;  %v1823_v43 = vpop.permute.xlu1 %1822  ;;  %v1889_v45 = vpop.permute.xlu0 %1888 }
 0x4b8   : > { %v5118_v7 = vpop.permute.xlu1 %2078  ;;  %v1825_v21 = vpop.permute.xlu0 %1824 }
 0x4bc   : > { %v5120_v61 = vpop.permute.xlu1 %2014  ;;  %v5122_v29 = vpop.permute.xlu0 %2080 }
 0x4c0   : > { %v5124_v57 = vpop.permute.xlu1 %1950  ;;  %v5126_v54 = vpop.permute.xlu0 %2016 }
 0x4c1   : > { %6019 = vst [vmem:[#allocation2_spill] sm:$0xff] %v5124_v57 }
 0x4c4   : > { %v5128_v19 = vpop.permute.xlu1 %2206  ;;  %v5130_v60 = vpop.permute.xlu0 %1952 }
 0x4c5   : > { %6020 = vst [vmem:[#allocation72_spill] sm:$0xff] %v5128_v19  ;;  %6021 = vst [vmem:[#allocation73_spill] sm:$0xff] %v5130_v60 }
 0x4c8   : > { %v5132_v17 = vpop.permute.xlu1 %2270  ;;  %v5134_v18 = vpop.permute.xlu0 %2208 }
 0x4c9   : > { %6022 = vst [vmem:[#allocation74_spill] sm:$0xff] %v5132_v17  ;;  %6023 = vst [vmem:[#allocation75_spill] sm:$0xff] %v5134_v18 }
 0x4cc   : > { %v1903_v63 = vpop.permute.xlu1 %1902  ;;  %v5136_v62 = vpop.permute.xlu0 %2272 }
 0x4cd   : > { %6024 = vst [vmem:[#allocation76_spill] sm:$0xff] %v5136_v62  ;;  %v1912_v2 = vsel %vm365_vm6, %v1887_v39, %v1903_v63  ;;  %v1920_v4 = vsel %vm365_vm6, %v1903_v63, %v1887_v39 }
 0x4ce   : > { %v1934_v18 = vmul.f32 %v1920_v4, %v3026_v8  ;;  %v1935_v11 = vmul.f32 %v1912_v2, %v3029_v9  ;;  %v6025_v4 = vpack.c.bf16 %v4956_v44, %v4950_v46  ;;  %v1906_v2 = vsel %vm365_vm6, %v4564_v5, %v4618_v52 }
 0x4cf   : > { %v1914_v46 = vsel %vm365_vm6, %v4618_v52, %v4564_v5  ;;  %v1923_v44 = vmul.f32 %v1906_v2, %v3029_v9 }
 0x4d0   : > { %v5142_v32 = vpop.permute.xlu1 %2210  ;;  %v1905_v51 = vpop.permute.xlu0 %1904 }
 0x4d1   : > { %v1913_v19 = vsel %vm365_vm6, %v1889_v45, %v1905_v51  ;;  %v1921_v17 = vsel %vm365_vm6, %v1905_v51, %v1889_v45  ;;  %v2226_v39 = vsel %vm475_vm1, %v4610_v53, %v5142_v32 }
 0x4d2   : > { %v1936_v62 = vmul.f32 %v1921_v17, %v3026_v8  ;;  %v1937_v3 = vmul.f32 %v1913_v19, %v3029_v9  ;;  %v5163_v51 = vmul.f32 %v2226_v39, %v5951_v20  ;;  %v6026_v19 = vpack.c.bf16 %v4953_v35, %v4947_v34 }
 0x4d3   : > { %v1922_v34 = vmul.f32 %v1914_v46, %v3026_v8 }
 0x4d4   : > { %v1839_v63 = vpop.permute.xlu1 %1838  ;;  %v2336_v41 = vpack.c.bf16 %v1936_v62, %v1934_v18  ;;  %v5156_v60 = vpop.permute.xlu0 %2212  ;;  %v2337_v57 = vpack.c.bf16 %v1937_v3, %v1935_v11  ;;  %v1907_v18 = vsel %vm365_vm6, %v4574_v15, %v4630_v37 }
 0x4d5   : > { %v2227_v45 = vsel %vm475_vm1, %v4622_v56, %v5156_v60  ;;  %v1848_v35 = vsel %vm344_vm8, %v1823_v43, %v1839_v63 }
 0x4d6   : > { %v5166_v17 = vmul.f32 %v2227_v45, %v5951_v20  ;;  %2427 = vmatprep.subr.bf16.mxu0 %v2337_v57  ;;  %v1925_v57 = vmul.f32 %v1907_v18, %v3029_v9  ;;  %v1856_v18 = vsel %vm344_vm8, %v1839_v63, %v1823_v43  ;;  %v6028_v9 = vpack.c.bf16 %v4725_v59, %v4719_v6 }
 0x4d7   : > { %2428 = vmatpush1.bf16.msra.mxu0 %v2336_v41  ;;  %v1915_v41 = vsel %vm365_vm6, %v4630_v37, %v4574_v15  ;;  %v1870_v2 = vmul.f32 %v1856_v18, %v3053_v25 }
 0x4d8   : > { %v2095_v62 = vpop.permute.xlu1 %2094  ;;  %v2378_v3 = vpack.c.bf16 %v5166_v17, %v5163_v51  ;;  %v5174_v11 = vpop.permute.xlu0 %2268  ;;  %2429 = vmatprep.subr.bf16.mxu0 %v6025_v4  ;;  %v6027_v4 = vpack.c.bf16 %v4728_v27, %v4722_v0  ;;  %v1924_v15 = vmul.f32 %v1915_v41, %v3026_v8  ;;  %v2331_v37 = vpack.c.bf16 %v1925_v57, %v1923_v44 }
 0x4d9   : > { %v1871_v41 = vmul.f32 %v1848_v35, %v3056_v26  ;;  %v2104_v46 = vsel %vm431_vm0, %v5118_v7, %v2095_v62  ;;  %v2112_v44 = vsel %vm431_vm0, %v2095_v62, %v5118_v7  ;;  %v1851_v35 = vsel %vm344_vm8, %v4640_v40, %v4584_v16 }
 0x4da   : > { %v2330_v0 = vpack.c.bf16 %v1924_v15, %v1922_v34  ;;  %v1842_v15 = vsel %vm344_vm8, %v4572_v10, %v4628_v38  ;;  %v6029_v34 = vpack.c.bf16 %v4984_v42, %v4978_v12  ;;  %v2127_v12 = vmul.f32 %v2112_v44, %v2946_v23  ;;  %v6038_v44 = vld [vmem:[#allocation31_spill] sm:$0xff] }
 0x4db   : > { %2430 = vmatpush1.bf16.msra.mxu0 %v6026_v19 }
 0x4dc   : > { %v2031_v39 = vpop.permute.xlu1 %2030  ;;  %v5196_v45 = vpop.permute.xlu0 %2284  ;;  %2431 = vmatprep.subr.bf16.mxu0 %v6027_v4 }
 0x4df   : > { %2432 = vmatpush1.bf16.msra.mxu0 %v6028_v9  ;;  %v2126_v9 = vmul.f32 %v2104_v46, %v5899_v14  ;;  %v6037_v46 = vld [vmem:[#allocation38_spill] sm:$0xff] }
 0x4e0   : > { %v5210_v5 = vpop.permute.xlu1 %1966  ;;  %v1841_v52 = vpop.permute.xlu0 %1840  ;;  %2433 = vmatprep.subr.bf16.mxu0 %v2331_v37 }
 0x4e1   : > { %v1849_v27 = vsel %vm344_vm8, %v1825_v21, %v1841_v52  ;;  %v1857_v8 = vsel %vm344_vm8, %v1841_v52, %v1825_v21  ;;  %v1843_v21 = vsel %vm344_vm8, %v4584_v16, %v4640_v40  ;;  %v1850_v16 = vsel %vm344_vm8, %v4628_v38, %v4572_v10  ;;  %v6032_v38 = vld [vmem:[#allocation62_spill] sm:$0xff] }
 0x4e2   : > { %v1872_v43 = vmul.f32 %v1857_v8, %v3053_v25  ;;  %v1873_v6 = vmul.f32 %v1849_v27, %v3056_v26  ;;  %v1861_v7 = vmul.f32 %v1843_v21, %v3056_v26  ;;  %v6030_v40 = vpack.c.bf16 %v4981_v31, %v4975_v28 }
 0x4e3   : > { %2434 = vmatpush1.bf16.msra.mxu0 %v2330_v0  ;;  %v1860_v27 = vmul.f32 %v1851_v35, %v3053_v25  ;;  %v1858_v10 = vmul.f32 %v1850_v16, %v3053_v25 }
 0x4e4   : > { %v5220_v59 = vpop.permute.xlu1 %2222  ;;  %v2328_v63 = vpack.c.bf16 %v1872_v43, %v1870_v2  ;;  %v5222_v57 = vpop.permute.xlu0 %2144  ;;  %v2329_v19 = vpack.c.bf16 %v1873_v6, %v1871_v41  ;;  %v6031_v41 = vpack.c.bf16 %v4756_v58, %v4750_v36  ;;  %v6033_v6 = vld [vmem:[#allocation55_spill] sm:$0xff]  ;;  %v6034_v58 = vld [vmem:[#allocation29_spill] sm:$0xff]  ;;  %v6035_v36 = vld [vmem:[#allocation28_spill] sm:$0xff] }
 0x4e5   : > { %v2107_v28 = vsel %vm431_vm0, %v6033_v6, %v6032_v38  ;;  %v2322_v21 = vpack.c.bf16 %v1860_v27, %v1858_v10  ;;  %v6045_v10 = vld [vmem:[#allocation40_spill] sm:$0xff] }
 0x4e6   : > { %2435 = vmatprep.subr.bf16.mxu0 %v2329_v19  ;;  %v6036_v19 = vpack.c.bf16 %v6034_v58, %v6035_v36  ;;  %v6050_v58 = vld [vmem:[#allocation60_spill] sm:$0xff]  ;;  %v6051_v36 = vld [vmem:[#allocation33_spill] sm:$0xff] }
 0x4e7   : > { %2436 = vmatpush1.bf16.msra.mxu0 %v2328_v63  ;;  %v2048_v63 = vsel %vm409_vm7, %v2031_v39, %v5120_v61 }
 0x4e8   : > { %v5234_v4 = vpop.permute.xlu1 %2286  ;;  %v2097_v37 = vpop.permute.xlu0 %2096  ;;  %2437 = vmatprep.subr.bf16.mxu0 %v6029_v34  ;;  %v6039_v34 = vpack.c.bf16 %v5012_v22, %v5006_v48 }
 0x4e9   : > { %v2105_v62 = vsel %vm431_vm0, %v5122_v29, %v2097_v37  ;;  %v2113_v18 = vsel %vm431_vm0, %v2097_v37, %v5122_v29  ;;  %v1859_v29 = vmul.f32 %v1842_v15, %v3056_v26  ;;  %v2040_v26 = vsel %vm409_vm7, %v5120_v61, %v2031_v39 }
 0x4ea   : > { %v2128_v42 = vmul.f32 %v2105_v62, %v5899_v14  ;;  %v2129_v52 = vmul.f32 %v2113_v18, %v2946_v23  ;;  %v2106_v15 = vsel %vm431_vm0, %v6038_v44, %v6037_v46  ;;  %v2099_v61 = vsel %vm431_vm0, %v6032_v38, %v6033_v6  ;;  %v6047_v6 = vld [vmem:[#allocation20_spill] sm:$0xff] }
 0x4eb   : > { %2438 = vmatpush1.bf16.msra.mxu0 %v6030_v40  ;;  %v2323_v31 = vpack.c.bf16 %v1861_v7, %v1859_v29  ;;  %v2117_v39 = vmul.f32 %v2107_v28, %v2946_v23  ;;  %v2062_v62 = vmul.f32 %v2048_v63, %v5905_v49  ;;  %v2063_v48 = vmul.f32 %v2040_v26, %v5903_v50  ;;  %v6041_v40 = vld [vmem:[#allocation34_spill] sm:$0xff]  ;;  %v6042_v29 = vld [vmem:[#allocation21_spill] sm:$0xff] }
 0x4ec   : > { %v5265_v0 = vpop.permute.xlu1 %2266  ;;  %v2368_v8 = vpack.c.bf16 %v2128_v42, %v2126_v9  ;;  %v5269_v2 = vpop.permute.xlu0 %2264  ;;  %2439 = vmatprep.subr.bf16.mxu0 %v6031_v41  ;;  %v2369_v43 = vpack.c.bf16 %v2129_v52, %v2127_v12  ;;  %v6040_v9 = vpack.c.bf16 %v5009_v1, %v5003_v30  ;;  %v2115_v42 = vmul.f32 %v2106_v15, %v2946_v23  ;;  %v6046_v23 = vld [vmem:[#allocation39_spill] sm:$0xff]  ;;  %v6053_v15 = vld [vmem:[#allocation46_spill] sm:$0xff] }
 0x4ed   : > { %v6043_v27 = vpack.c.bf16 %v6041_v40, %v6042_v29  ;;  %v2116_v30 = vmul.f32 %v2099_v61, %v5899_v14  ;;  %v6048_v28 = vpack.c.bf16 %v6046_v23, %v6047_v6  ;;  %v6049_v63 = vpack.c.bf16 %v5044_v47, %v5038_v33  ;;  %v6068_v23 = vld [vmem:[#allocation73_spill] sm:$0xff] }
 0x4ee   : > { %2468 = vmatprep.subr.bf16.mxu1 %v2369_v43  ;;  %v2363_v1 = vpack.c.bf16 %v2117_v39, %v2115_v42  ;;  %v6044_v43 = vld [vmem:[#allocation36_spill] sm:$0xff]  ;;  %v6054_v33 = vpack.c.bf16 %v5041_v55, %v5027_v24  ;;  %v6058_v55 = vld [vmem:[#allocation66_spill] sm:$0xff] }
 0x4ef   : > { %2440 = vmatpush1.bf16.msra.mxu0 %v6036_v19  ;;  %2469 = vmatpush1.bf16.msra.mxu1 %v2368_v8  ;;  %v2035_v38 = vsel %vm409_vm7, %v6045_v10, %v6044_v43  ;;  %v2034_v19 = vsel %vm409_vm7, %v6051_v36, %v6050_v58 }
 0x4f0   : > { %v5288_v25 = vpop.permute.xlu1 %2282  ;;  %v2033_v37 = vpop.permute.xlu0 %2032  ;;  %2441 = vmatprep.subr.bf16.mxu0 %v2323_v31  ;;  %2470 = vmatprep.subr.bf16.mxu1 %v6039_v34  ;;  %v2042_v34 = vsel %vm409_vm7, %v6050_v58, %v6051_v36  ;;  %v2051_v61 = vmul.f32 %v2034_v19, %v5903_v50  ;;  %v6071_v58 = vld [vmem:[#allocation16_spill] sm:$0xff]  ;;  %v6072_v19 = vld [vmem:[#allocation17_spill] sm:$0xff] }
 0x4f1   : > { %v2041_v35 = vsel %vm409_vm7, %v5126_v54, %v2033_v37  ;;  %v2049_v7 = vsel %vm409_vm7, %v2033_v37, %v5126_v54  ;;  %v2098_v54 = vsel %vm431_vm0, %v6037_v46, %v6038_v44  ;;  %v2053_v46 = vmul.f32 %v2035_v38, %v5903_v50  ;;  %v6052_v44 = vld [vmem:[#allocation52_spill] sm:$0xff] }
 0x4f2   : > { %v2064_v22 = vmul.f32 %v2049_v7, %v5905_v49  ;;  %v2065_v18 = vmul.f32 %v2041_v35, %v5903_v50  ;;  %v2114_v41 = vmul.f32 %v2098_v54, %v5899_v14  ;;  %v2361_v37 = vpack.c.bf16 %v6053_v15, %v6052_v44  ;;  %v6055_v35 = vld [vmem:[#allocation32_spill] sm:$0xff]  ;;  %v6056_v7 = vld [vmem:[#allocation43_spill] sm:$0xff]  ;;  %v6061_v54 = vld [vmem:[#allocation42_spill] sm:$0xff] }
 0x4f3   : > { %2442 = vmatpush1.bf16.msra.mxu0 %v2322_v21  ;;  %2471 = vmatpush1.bf16.msra.mxu1 %v6040_v9  ;;  %v2043_v21 = vsel %vm409_vm7, %v6044_v43, %v6045_v10  ;;  %v6060_v9 = vld [vmem:[#allocation48_spill] sm:$0xff]  ;;  %v6062_v50 = vld [vmem:[#allocation2_spill] sm:$0xff] }
 0x4f4   : > { %v5315_v12 = vpop.permute.xlu1 %2142  ;;  %v2352_v52 = vpack.c.bf16 %v2064_v22, %v2062_v62  ;;  %v5322_v16 = vpop.permute.xlu0 %2280  ;;  %2472 = vmatprep.subr.bf16.mxu1 %v6043_v27  ;;  %v2353_v8 = vpack.c.bf16 %v2065_v18, %v2063_v48  ;;  %v2362_v14 = vpack.c.bf16 %v2116_v30, %v2114_v41  ;;  %v6057_v62 = vpack.c.bf16 %v6055_v35, %v6056_v7  ;;  %v6059_v48 = vld [vmem:[#allocation30_spill] sm:$0xff]  ;;  %v6063_v27 = vld [vmem:[#allocation37_spill] sm:$0xff]  ;;  %v6074_v35 = vld [vmem:[#allocation15_spill] sm:$0xff] }
 0x4f5   : > { %v2052_v24 = vmul.f32 %v2043_v21, %v5905_v49  ;;  %v2360_v22 = vpack.c.bf16 %v6059_v48, %v6058_v55  ;;  %v2347_v18 = vpack.c.bf16 %v2053_v46, %v2051_v61  ;;  %v2359_v42 = vpack.c.bf16 %v6061_v54, %v6060_v9  ;;  %v6067_v43 = vld [vmem:[#allocation14_spill] sm:$0xff]  ;;  %v6073_v61 = vld [vmem:[#allocation64_spill] sm:$0xff] }
 0x4f6   : > { %2443 = vmatprep.subr.bf16.mxu0 %v2353_v8  ;;  %v1976_v40 = vsel %vm387_vm9, %v6062_v50, %v5210_v5  ;;  %v1984_v29 = vsel %vm387_vm9, %v5210_v5, %v6062_v50  ;;  %v6064_v8 = vld [vmem:[#allocation49_spill] sm:$0xff]  ;;  %v2356_v7 = vpack.c.bf16 %v6074_v35, %v6073_v61  ;;  %v6079_v54 = vld [vmem:[#allocation72_spill] sm:$0xff]  ;;  %v2234_v61 = vsel %vm475_vm1, %v5142_v32, %v4610_v53  ;;  %v6089_v35 = vld [vmem:[#allocation70_spill] sm:$0xff] }
 0x4f7   : > { %2444 = vmatpush2.bf16.msra.mxu0 %v2352_v52  ;;  %2473 = vmatpush1.bf16.msra.mxu1 %v6048_v28  ;;  %v2050_v52 = vmul.f32 %v2042_v34, %v5905_v49  ;;  %v6065_v30 = vpack.c.bf16 %v6063_v27, %v6064_v8  ;;  %v6066_v49 = vld [vmem:[#allocation67_spill] sm:$0xff]  ;;  %v6069_v28 = vld [vmem:[#allocation50_spill] sm:$0xff]  ;;  %v1998_v36 = vmul.f32 %v1984_v29, %v6071_v58  ;;  %v6081_v29 = vld [vmem:[#allocation57_spill] sm:$0xff] }
 0x4f8   : > { %v5336_v31 = vpop.permute.xlu1 %2158  ;;  %v5338_v26 = vpop.permute.xlu0 %2140  ;;  %2445 = vmatprep.subr.bf16.mxu0 %v6049_v63  ;;  %2474 = vmatprep.subr.bf16.mxu1 %v2363_v1  ;;  %v2357_v10 = vpack.c.bf16 %v6067_v43, %v6066_v49  ;;  %v6070_v63 = vld [vmem:[#allocation44_spill] sm:$0xff]  ;;  %v1999_v21 = vmul.f32 %v1976_v40, %v6072_v19  ;;  %v6080_v40 = vld [vmem:[#allocation35_spill] sm:$0xff]  ;;  %v6083_v49 = vld [vmem:[#allocation61_spill] sm:$0xff] }
 0x4f9   : > { %v2346_v38 = vpack.c.bf16 %v2052_v24, %v2050_v52  ;;  %v6076_v24 = vld [vmem:[#allocation41_spill] sm:$0xff]  ;;  %v2240_v52 = vsel %vm475_vm1, %v5220_v59, %v6079_v54  ;;  %v1970_v27 = vsel %vm387_vm9, %v6081_v29, %v6080_v40  ;;  %v1978_v8 = vsel %vm387_vm9, %v6080_v40, %v6081_v29  ;;  %v6093_v53 = vld [vmem:[#allocation27_spill] sm:$0xff] }
 0x4fa   : > { %v6092_v32 = vld [vmem:[#allocation25_spill] sm:$0xff]  ;;  %v6096_v40 = vld [vmem:[#allocation7_spill] sm:$0xff] }
 0x4fb   : > { %2446 = vmatpush2.bf16.msra.mxu0 %v6054_v33  ;;  %2475 = vmatpush1.bf16.msra.mxu1 %v2362_v14  ;;  %v2358_v14 = vpack.c.bf16 %v6070_v63, %v6069_v28 }
 0x4fc   : > { %v5357_v47 = vpop.permute.xlu1 %2262  ;;  %v5364_v39 = vpop.permute.xlu0 %2156  ;;  %2447 = vmatprep.subr.bf16.mxu0 %v6057_v62  ;;  %2476 = vmatprep.subr.bf16.mxu1 %v2361_v37  ;;  %v6075_v62 = vld [vmem:[#allocation69_spill] sm:$0xff] }
 0x4fd   : > { %v1971_v55 = vsel %vm387_vm9, %v6076_v24, %v6075_v62  ;;  %v1979_v48 = vsel %vm387_vm9, %v6075_v62, %v6076_v24 }
 0x4ff   : > { %2448 = vmatpush2.bf16.msra.mxu0 %v6065_v30  ;;  %2477 = vmatpush1.bf16.msra.mxu1 %v2360_v22  ;;  %v6077_v22 = vld [vmem:[#allocation59_spill] sm:$0xff] }
 0x500   : > { %v5386_v1 = vpop.permute.xlu1 %2278  ;;  %v1969_v41 = vpop.permute.xlu0 %1968  ;;  %2449 = vmatprep.subr.bf16.mxu0 %v2347_v18  ;;  %2478 = vmatprep.subr.bf16.mxu1 %v2359_v42  ;;  %v6078_v18 = vld [vmem:[#allocation54_spill] sm:$0xff]  ;;  %v2232_v42 = vsel %vm475_vm1, %v6079_v54, %v5220_v59  ;;  %v6085_v59 = vld [vmem:[#allocation65_spill] sm:$0xff] }
 0x501   : > { %v1977_v6 = vsel %vm387_vm9, %v6068_v23, %v1969_v41  ;;  %v1985_v5 = vsel %vm387_vm9, %v1969_v41, %v6068_v23  ;;  %v2355_v9 = vpack.c.bf16 %v6078_v18, %v6077_v22  ;;  %v6082_v41 = vld [vmem:[#allocation4_spill] sm:$0xff]  ;;  %v1988_v23 = vmul.f32 %v1979_v48, %v6071_v58 }
 0x502   : > { %v2000_v46 = vmul.f32 %v1985_v5, %v6071_v58  ;;  %v2001_v44 = vmul.f32 %v1977_v6, %v6072_v19  ;;  %v6084_v43 = vpack.c.bf16 %v6082_v41, %v6083_v49  ;;  %v1989_v6 = vmul.f32 %v1971_v55, %v6072_v19  ;;  %v6087_v5 = vld [vmem:[#allocation75_spill] sm:$0xff] }
 0x503   : > { %2450 = vmatpush2.bf16.msra.mxu0 %v2346_v38  ;;  %2479 = vmatpush1.bf16.msra.mxu1 %v2358_v14  ;;  %v2254_v14 = vmul.f32 %v2232_v42, %v5951_v20  ;;  %v6094_v48 = vpack.c.bf16 %v6092_v32, %v6093_v53  ;;  %v2303_v18 = vsel %vm497_vm2, %v5196_v45, %v5174_v11  ;;  %v6108_v32 = vld [vmem:[#allocation63_spill] sm:$0xff] }
 0x504   : > { %v5402_v15 = vpop.permute.xlu1 %2138  ;;  %v2344_v37 = vpack.c.bf16 %v2000_v46, %v1998_v36  ;;  %v5404_v33 = vpop.permute.xlu0 %2260  ;;  %2480 = vmatprep.subr.bf16.mxu1 %v2357_v10  ;;  %v2345_v34 = vpack.c.bf16 %v2001_v44, %v1999_v21  ;;  %v6086_v10 = vld [vmem:[#allocation3_spill] sm:$0xff]  ;;  %v6088_v36 = vld [vmem:[#allocation5_spill] sm:$0xff] }
 0x505   : > { %v2354_v38 = vpack.c.bf16 %v6086_v10, %v6085_v59  ;;  %v2255_v21 = vmul.f32 %v2240_v52, %v6088_v36  ;;  %v2243_v42 = vmul.f32 %v2234_v61, %v6088_v36  ;;  %v2302_v52 = vsel %vm497_vm2, %v5288_v25, %v5265_v0  ;;  %v6109_v53 = vld [vmem:[#allocation23_spill] sm:$0xff] }
 0x506   : > { %2451 = vmatprep.subr.bf16.mxu0 %v2345_v34  ;;  %v1987_v34 = vmul.f32 %v1970_v27, %v6072_v19  ;;  %v2176_v61 = vsel %vm453_vm3, %v5336_v31, %v5315_v12 }
 0x507   : > { %2452 = vmatpush2.bf16.msra.mxu0 %v2344_v37  ;;  %2481 = vmatpush1.bf16.msra.mxu1 %v2356_v7  ;;  %v1986_v37 = vmul.f32 %v1978_v8, %v6071_v58  ;;  %v6090_v7 = vld [vmem:[#allocation56_spill] sm:$0xff]  ;;  %v2295_v58 = vsel %vm497_vm2, %v5174_v11, %v5196_v45 }
 0x508   : > { %v5426_v50 = vpop.permute.xlu1 %2154  ;;  %v2225_v30 = vpop.permute.xlu0 %2224  ;;  %2453 = vmatprep.subr.bf16.mxu0 %v6084_v43  ;;  %2482 = vmatprep.subr.bf16.mxu1 %v2355_v9  ;;  %v6091_v62 = vpack.c.bf16 %v6089_v35, %v6090_v7  ;;  %v2294_v9 = vsel %vm497_vm2, %v5265_v0, %v5288_v25  ;;  %v2339_v11 = vpack.c.bf16 %v1989_v6, %v1987_v34  ;;  %v6097_v8 = vld [vmem:[#allocation24_spill] sm:$0xff]  ;;  %v6100_v43 = vld [vmem:[#allocation6_spill] sm:$0xff]  ;;  %v6105_v35 = vld [vmem:[#allocation51_spill] sm:$0xff] }
 0x509   : > { %v2233_v28 = vsel %vm475_vm1, %v6087_v5, %v2225_v30  ;;  %v2241_v63 = vsel %vm475_vm1, %v2225_v30, %v6087_v5  ;;  %v2338_v54 = vpack.c.bf16 %v1988_v23, %v1986_v37  ;;  %v5496_v29 = vmul.f32 %v2295_v58, %v6096_v40  ;;  %v6098_v30 = vld [vmem:[#allocation26_spill] sm:$0xff]  ;;  %v6102_v23 = vld [vmem:[#allocation45_spill] sm:$0xff] }
 0x50a   : > { %v2256_v46 = vmul.f32 %v2233_v28, %v5951_v20  ;;  %v2257_v44 = vmul.f32 %v2241_v63, %v6088_v36  ;;  %v2235_v20 = vsel %vm475_vm1, %v5156_v60, %v4622_v56  ;;  %v6095_v60 = vld [vmem:[#allocation74_spill] sm:$0xff]  ;;  %v6099_v41 = vpack.c.bf16 %v6097_v8, %v6098_v30  ;;  %v6104_v28 = vld [vmem:[#allocation76_spill] sm:$0xff]  ;;  %v6106_v7 = vld [vmem:[#allocation53_spill] sm:$0xff] }
 0x50b   : > { %2454 = vmatpush2.bf16.msra.mxu0 %v6091_v62  ;;  %2483 = vmatpush1.bf16.msra.mxu1 %v2354_v38  ;;  %v2296_v56 = vsel %vm497_vm2, %v6095_v60, %v5234_v4  ;;  %v2245_v45 = vmul.f32 %v2235_v20, %v6088_v36  ;;  %v2304_v27 = vsel %vm497_vm2, %v5234_v4, %v6095_v60  ;;  %v6101_v38 = vld [vmem:[#allocation71_spill] sm:$0xff] }
 0x50c   : > { %v5462_v24 = vpop.permute.xlu1 %2258  ;;  %v2384_v19 = vpack.c.bf16 %v2256_v46, %v2254_v14  ;;  %v5472_v55 = vpop.permute.xlu0 %2276  ;;  %2455 = vmatprep.subr.bf16.mxu0 %v6094_v48  ;;  %v2385_v22 = vpack.c.bf16 %v2257_v44, %v2255_v21  ;;  %v2317_v0 = vmul.f32 %v2303_v18, %v6100_v43  ;;  %v2318_v25 = vmul.f32 %v2296_v56, %v6096_v40 }
 0x50d   : > { %v2314_v59 = vmul.f32 %v2294_v9, %v6096_v40  ;;  %v6103_v6 = vpack.c.bf16 %v6101_v38, %v6102_v23  ;;  %v2315_v4 = vmul.f32 %v2302_v52, %v6100_v43  ;;  %v2300_v5 = vsel %vm497_vm2, %v5386_v1, %v5357_v47  ;;  %v6111_v9 = vld [vmem:[#allocation8_spill] sm:$0xff]  ;;  %v6113_v52 = vld [vmem:[#allocation9_spill] sm:$0xff] }
 0x50e   : > { %2484 = vmatprep.subr.bf16.mxu1 %v2385_v22  ;;  %v2319_v36 = vmul.f32 %v2304_v27, %v6100_v43  ;;  %v2293_v21 = vsel %vm497_vm2, %v5269_v2, %v5322_v16  ;;  %v2301_v37 = vsel %vm497_vm2, %v5322_v16, %v5269_v2  ;;  %v2168_v34 = vsel %vm453_vm3, %v5315_v12, %v5336_v31  ;;  %v6115_v27 = vld [vmem:[#allocation22_spill] sm:$0xff] }
 0x50f   : > { %2456 = vmatpush2.bf16.msra.mxu0 %v6099_v41  ;;  %2485 = vmatpush2.bf16.msra.mxu1 %v2384_v19  ;;  %v6107_v62 = vpack.c.bf16 %v6105_v35, %v6106_v7  ;;  %v2292_v2 = vsel %vm497_vm2, %v5357_v47, %v5386_v1  ;;  %v2311_v16 = vmul.f32 %v2300_v5, %v6100_v43  ;;  %v6112_v1 = vld [vmem:[#allocation68_spill] sm:$0xff] }
 0x510   : > { %v2275_v49 = vpop.permute.xlu1 %2274  ;;  %v2289_v10 = vpop.permute.xlu0 %2288  ;;  %2457 = vmatprep.subr.bf16.mxu0 %v2339_v11  ;;  %2486 = vmatprep.subr.bf16.mxu1 %v6103_v6  ;;  %v6110_v48 = vpack.c.bf16 %v6108_v32, %v6109_v53  ;;  %v2390_v31 = vpack.c.bf16 %v5496_v29, %v2314_v59  ;;  %v2312_v22 = vmul.f32 %v2293_v21, %v6096_v40 }
 0x511   : > { %v2297_v63 = vsel %vm497_vm2, %v6104_v28, %v2289_v10  ;;  %v2305_v14 = vsel %vm497_vm2, %v2289_v10, %v6104_v28  ;;  %v2391_v18 = vpack.c.bf16 %v2317_v0, %v2315_v4  ;;  %v2379_v60 = vpack.c.bf16 %v2245_v45, %v2243_v42  ;;  %v6114_v45 = vld [vmem:[#allocation58_spill] sm:$0xff] }
 0x512   : > { %v2320_v46 = vmul.f32 %v2297_v63, %v6096_v40  ;;  %v2321_v44 = vmul.f32 %v2305_v14, %v6100_v43  ;;  %v2313_v56 = vmul.f32 %v2301_v37, %v6100_v43  ;;  %v2174_v47 = vsel %vm453_vm3, %v5426_v50, %v5402_v15 }
 0x513   : > { %2458 = vmatpush2.bf16.msra.mxu0 %v2338_v54  ;;  %2487 = vmatpush2.bf16.msra.mxu1 %v6107_v62  ;;  %v2190_v54 = vmul.f32 %v2168_v34, %v6111_v9  ;;  %v2191_v11 = vmul.f32 %v2176_v61, %v6113_v52  ;;  %v2310_v29 = vmul.f32 %v2292_v2, %v6096_v40 }
 0x514   : > { %v5544_v20 = vpop.permute.xlu1 %2134  ;;  %v2392_v58 = vpack.c.bf16 %v2320_v46, %v2318_v25  ;;  %v2137_v19 = vpop.permute.xlu0 %2136  ;;  %2488 = vmatprep.subr.bf16.mxu1 %v6110_v48  ;;  %v2393_v12 = vpack.c.bf16 %v2321_v44, %v2319_v36  ;;  %v2298_v42 = vsel %vm497_vm2, %v2275_v49, %v5462_v24  ;;  %v6116_v8 = vpack.c.bf16 %v6114_v45, %v6115_v27  ;;  %v6122_v45 = vld [vmem:[#allocation18_spill] sm:$0xff] }
 0x515   : > { %v2175_v41 = vsel %vm453_vm3, %v5364_v39, %v5338_v26  ;;  %v2166_v0 = vsel %vm453_vm3, %v5402_v15, %v5426_v50  ;;  %v2389_v59 = vpack.c.bf16 %v2313_v56, %v2311_v16  ;;  %v2187_v10 = vmul.f32 %v2174_v47, %v6113_v52  ;;  %v1807_v27 = vld [vmem:[%s5671_s6] sm:$0x3] }
 0x516   : > { %2517 = vmatprep.subr.bf16.mxu0 %v2393_v12  ;;  %2460 = vmatmul.mubr.bf16.vlgmr.msra.gmra.mxu0 %v6112_v1  ;;  %v2299_v38 = vsel %vm497_vm2, %v5472_v55, %v5404_v33  ;;  %v6117_v15 = vmov 0   ;;  %v2290_v50 = vsel %vm497_vm2, %v5462_v24, %v2275_v49  ;;  %v2307_v4 = vmul.f32 %v2298_v42, %v6100_v43  ;;  %v6118_v12 = vld [vmem:[#allocation10_spill] sm:$0xff]  ;;  %v6119_v1 = vld [vmem:[#allocation11_spill] sm:$0xff] }
 0x517   : > { %2489 = vmatpush2.bf16.msra.mxu1 %v6116_v8  ;;  %2518 = vmatpush1.bf16.msra.mxu0 %v2392_v58  ;;  %v2167_v63 = vsel %vm453_vm3, %v5338_v26, %v5364_v39  ;;  %v2189_v14 = vmul.f32 %v2175_v41, %v6113_v52  ;;  %v2291_v49 = vsel %vm497_vm2, %v5404_v33, %v5472_v55 }
 0x518   : > { %v2151_v30 = vpop.permute.xlu1 %2150  ;;  %v2161_v25 = vpop.permute.xlu0 %2160  ;;  %2519 = vmatprep.subr.bf16.mxu0 %v2391_v18  ;;  %2490 = vmatprep.subr.bf16.mxu1 %v2379_v60  ;;  %v2309_v36 = vmul.f32 %v2299_v38, %v6100_v43  ;;  %v2186_v39 = vmul.f32 %v2166_v0, %v6111_v9  ;;  %v2306_v44 = vmul.f32 %v2290_v50, %v6096_v40 }
 0x519   : > { %v2169_v23 = vsel %vm453_vm3, %v5222_v57, %v2161_v25  ;;  %v2177_v6 = vsel %vm453_vm3, %v2161_v25, %v5222_v57  ;;  %2541 = vmatprep.mubr.bf16.mxu0 %v6117_v15  ;;  %v2388_v57 = vpack.c.bf16 %v2312_v22, %v2310_v29  ;;  %v2172_v51 = vsel %vm453_vm3, %v2151_v30, %v5544_v20  ;;  %v6120_v29 = vld [vmem:[#allocation12_spill] sm:$0xff] }
 0x51a   : > { %v2192_v5 = vmul.f32 %v2169_v23, %v6111_v9  ;;  %v2193_v28 = vmul.f32 %v2177_v6, %v6113_v52  ;;  %v2387_v55 = vpack.c.bf16 %v2309_v36, %v2307_v4  ;;  %v2375_v43 = vpack.c.bf16 %v2189_v14, %v2187_v10 }
 0x51b   : > { %2491 = vmatpush2.bf16.msra.mxu1 %v2378_v3  ;;  %2520 = vmatpush1.bf16.msra.mxu0 %v2390_v31  ;;  %v2188_v37 = vmul.f32 %v2167_v63, %v6111_v9  ;;  %v2308_v34 = vmul.f32 %v2291_v49, %v6096_v40  ;;  %v2164_v61 = vsel %vm453_vm3, %v5544_v20, %v2151_v30  ;;  %v2711_v20 = vld.sshfl [vmem:[%s5672_s7 + $0x8] sm:$0x3 pattern:$0x76325410] }
 0x51c   : > { %v2131_v24 = vpop.permute.xlu1 %2130  ;;  %v2376_v21 = vpack.c.bf16 %v2192_v5, %v2190_v54  ;;  %v2153_v46 = vpop.permute.xlu0 %2152  ;;  %2521 = vmatprep.subr.bf16.mxu0 %v2389_v59  ;;  %v2377_v26 = vpack.c.bf16 %v2193_v28, %v2191_v11  ;;  %v2183_v35 = vmul.f32 %v2172_v51, %v6113_v52  ;;  %v2182_v32 = vmul.f32 %v2164_v61, %v6111_v9 }
 0x51d   : > { %v2173_v17 = vsel %vm453_vm3, %v2153_v46, %v2137_v19  ;;  %v2165_v3 = vsel %vm453_vm3, %v2137_v19, %v2153_v46  ;;  %v2374_v2 = vpack.c.bf16 %v2188_v37, %v2186_v39  ;;  %v2386_v16 = vpack.c.bf16 %v2308_v34, %v2306_v44 }
 0x51e   : > { %v2185_v33 = vmul.f32 %v2173_v17, %v6113_v52  ;;  %2492 = vmatprep.subr.bf16.mxu1 %v2377_v26  ;;  %v2184_v58 = vmul.f32 %v2165_v3, %v6111_v9 }
 0x51f   : > { %2493 = vmatpush2.bf16.msra.mxu1 %v2376_v21  ;;  %2522 = vmatpush1.bf16.msra.mxu0 %v2388_v57 }
 0x520   : > { %v2133_v7 = vpop.permute.xlu0 %2132  ;;  %2523 = vmatprep.subr.bf16.mxu0 %v2387_v55  ;;  %v2147_v62 = vpop.permute.xlu1 %2146  ;;  %2494 = vmatprep.subr.bf16.mxu1 %v2375_v43  ;;  %v2373_v19 = vpack.c.bf16 %v2185_v33, %v2183_v35  ;;  %v2372_v31 = vpack.c.bf16 %v2184_v58, %v2182_v32 }
 0x521   : > { %v2162_v40 = vsel %vm453_vm3, %v2131_v24, %v2147_v62  ;;  %v2170_v53 = vsel %vm453_vm3, %v2147_v62, %v2131_v24 }
 0x522   : > { %v2178_v60 = vmul.f32 %v2162_v40, %v6111_v9  ;;  %v2179_v56 = vmul.f32 %v2170_v53, %v6113_v52 }
 0x523   : > { %2495 = vmatpush2.bf16.msra.mxu1 %v2374_v2  ;;  %2524 = vmatpush1.bf16.msra.mxu0 %v2386_v16 }
 0x524   : > { %v2149_v48 = vpop.permute.xlu0 %2148  ;;  %2496 = vmatprep.subr.bf16.mxu1 %v2373_v19  ;;  %2713 = vmatprep.subr.msk.bf16.mxu0 %vm643_vm4, %v6118_v12 }
 0x525   : > { %v2163_v22 = vsel %vm453_vm3, %v2133_v7, %v2149_v48  ;;  %v2171_v18 = vsel %vm453_vm3, %v2149_v48, %v2133_v7 }
 0x526   : > { %v2180_v54 = vmul.f32 %v2163_v22, %v6111_v9  ;;  %v2181_v47 = vmul.f32 %v2171_v18, %v6113_v52  ;;  %2712 = vmatmul.mubr.msk.bf16.vlgmr.msra.gmra.mxu0 %vm1527_vm15, %v2711_v20  ;;  %v6123_v9 = vld [vmem:[#allocation47_spill] sm:$0xff] }
 0x527   : > { %2497 = vmatpush2.bf16.msra.mxu1 %v2372_v31  ;;  %2564 = vmatpush1.bf16.msra.mxu0 %v6119_v1  ;;  %v6124_v52 = vld [vmem:[#allocation19_spill] sm:$0xff] }
 0x528   : > { %v2370_v11 = vpack.c.bf16 %v2180_v54, %v2178_v60  ;;  %2565 = vmatprep.subr.bf16.mxu0 %v6120_v29  ;;  %v2371_v42 = vpack.c.bf16 %v2181_v47, %v2179_v56  ;;  %2585 = vmatprep.mubr.bf16.mxu0 %v6117_v15 }
 0x52a   : > { %2498 = vmatprep.subr.bf16.mxu1 %v2371_v42 }
 0x52b   : > { %2499 = vmatpush2.bf16.msra.mxu1 %v2370_v11  ;;  %2566 = vmatpush1.bf16.msra.mxu0 %v6121_v13 }
 0x52c   : > { %2567 = vmatprep.subr.bf16.mxu0 %v6122_v45 }
 0x52d   : > { %v2598_v36 = vpop.permute.xlu1 %2597 }
 0x52e   : > { %2501 = vmatmul.mubr.bf16.vlgmr.msra.gmra.mxu1 %v6123_v9 }
 0x52f   : > { %2568 = vmatpush1.bf16.msra.mxu0 %v6124_v52 }
 0x532   : > { %2714 = vmatmul.mubr.msk.bf16.vlgmr.msra.gmra.mxu0 %vm630_vm10, %v1807_v27 }
 0x5d6   : > { %v2461_v8 = vpop.f32.mrf.mxu0 }
 0x5d8   : > { %v2463_v30 = vpop.f32.mrf.mxu0 }
 0x5da   : > { %v2465_v41 = vpop.f32.mrf.mxu0 }
 0x5dc   : > { %v2466_v0 = vpop.f32.mrf.mxu0 }
 0x5e6   : > { %v2543_v25 = vpop.f32.mrf.mxu0 }
 0x5e8   : > { %v2545_v59 = vpop.f32.mrf.mxu0 }
 0x5ea   : > { %v2547_v10 = vpop.f32.mrf.mxu0 }
 0x5ec   : > { %v2548_v38 = vpop.f32.mrf.mxu0 }
 0x5ee   : > { %v2502_v23 = vpop.f32.mrf.mxu1 }
 0x5ef   : > { %v2503_v6 = vadd.f32 %v2502_v23, %v2461_v8 }
 0x5f0   : > { %v2504_v15 = vpop.f32.mrf.mxu1 }
 0x5f1   : > { %v2505_v50 = vadd.f32 %v2504_v15, %v2463_v30  ;;  %v2544_v4 = vadd.f32 %v2543_v25, %v2503_v6 }
 0x5f2   : > { %v2587_v5 = vpop.f32.mrf.mxu0  ;;  %v2506_v28 = vpop.f32.mrf.mxu1 }
 0x5f3   : > { %v2588_v63 = vadd.f32 %v2587_v5, %v2544_v4  ;;  %v2546_v14 = vadd.f32 %v2545_v59, %v2505_v50 }
 0x5f4   : > { %v2589_v57 = vpop.f32.mrf.mxu0  ;;  %v2507_v24 = vpop.f32.mrf.mxu1 }
 0x5f5   : > { %v2590_v49 = vadd.f32 %v2589_v57, %v2546_v14  ;;  %v2600_v46 = vadd.f32 %v2598_v36, %v2588_v63 }
 0x5f6   : > { %v2591_v21 = vpop.f32.mrf.mxu0 }
 0x5f7   : > { %v2601_v26 = vadd.f32 %v2598_v36, %v2590_v49 }
 0x5f8   : > { %v2592_v39 = vpop.f32.mrf.mxu0 }
 0x5f9   : > { %v2604_v44 = vcombine.low %v2600_v46, %v2601_v26 }
 0x5fb   : > { %2606 = vst [vmem:[%s332_s13] sm:$0xff] %v2604_v44 }
 0x5fc PF: > { %s19_s30 = sadd.s32 1, %s2779_s30  }
 0x5fd   : > { %p16_p4 = scmp.ge.s32.totalorder %s19_s30, 4  }
 0x5ff   :  { %18 = sbr.rel (!%p16_p4) target bundleno = 1 (0x1), region = 93 }

</bundles_post_ra>
